<compile_context>
chip_gen: v7x
topology: tpu7x:2x2x1
jax: 0.10.0
libtpu: 0.0.40
codegen_flags: <defaults>
</compile_context>

<pallas_src>
import functools
import math

import jax
import jax.numpy as jnp
from jax.experimental import pallas as pl
from jax.experimental.pallas import tpu as pltpu

# ----------------------------- model config ---------------------------------
D_MODEL = 16
NUM_HEADS = 4
NUM_LAYERS = 4
D_FF = 128
LN_EPS = 1e-5

_KPARAM_ORDER = ["wqkv", "bqkv", "wo", "bo", "w1", "b1", "w2", "b2"]


def _round_up(x, m):
    return ((x + m - 1) // m) * m


# ------------------------------ Pallas kernel --------------------------------
def _layer_norm_cols(x):
    # x: (D, TN) f32, normalize over the D (sublane) axis.
    # LN affine (gamma/beta) is folded into the downstream weights host-side.
    mu = jnp.mean(x, axis=0, keepdims=True)
    xc = x - mu
    var = jnp.mean(xc * xc, axis=0, keepdims=True)
    return xc * jax.lax.rsqrt(var + LN_EPS)


def _mxu(w, x):
    # bf16 operands, f32 accumulation on the MXU
    return jnp.dot(w.astype(jnp.bfloat16), x.astype(jnp.bfloat16),
                   preferred_element_type=jnp.float32)


def transformer_kernel(x_ref, hsel_ref, hselt_ref,
                       wqkv_ref, bqkv_ref, wo_ref, bo_ref,
                       w1_ref, b1_ref, w2_ref, b2_ref,
                       o_ref, *, num_layers, num_heads, d_model, bf16_eltwise):
    bseq = x_ref.shape[0]                   # attention sequence length (= token batch B)
    cdt = jnp.bfloat16 if bf16_eltwise else jnp.float32

    hsel = hsel_ref[...]                    # (H, D)  0/1 head-sum selector (bf16)
    hselt = hselt_ref[...]                  # (D, H)  0/1 head-broadcast selector (bf16)

    # one (D, TN) lane-dense activation slab per sequence position (B is tiny)
    xs = [x_ref[b] for b in range(bseq)]    # f32

    for l in range(num_layers):
        wqkv, bqkv = wqkv_ref[l], bqkv_ref[l]       # (3D, D) bf16, (3D, 1) f32
        wo, bo = wo_ref[l], bo_ref[l]               # (D, D) bf16,  (D, 1) f32
        w1, b1 = w1_ref[l], b1_ref[l]               # (Dff, D) bf16, (Dff, 1) f32
        w2, b2 = w2_ref[l], b2_ref[l]               # (D, Dff) bf16, (D, 1) f32
        b1c = b1.astype(cdt)                        # tiny (Dff, 1) cast, once per layer

        # ---- pre-LN (affine folded) + fused QKV projection: one MXU dot per b ----
        qkv = [_mxu(wqkv, _layer_norm_cols(xs[b])) + bqkv for b in range(bseq)]
        qs = [qkv[b][0:d_model, :] for b in range(bseq)]            # q-scale folded host-side
        ks = [qkv[b][d_model:2 * d_model, :] for b in range(bseq)]
        vs = [qkv[b][2 * d_model:3 * d_model, :] for b in range(bseq)]

        # ---- multi-head self-attention across the B axis ----
        if bseq == 2:
            # softmax over 2 key positions == sigmoid of the per-head score diff.
            # s_i0 - s_i1 = head_sum(q_i * (k0 - k1))  (exact)
            dk = (ks[0] - ks[1]).astype(cdt)                        # (D, TN)
            dv = (vs[0] - vs[1]).astype(cdt)                        # (D, TN)
            v1c = vs[1].astype(cdt)
            qsc = [q.astype(cdt) for q in qs]
            new_xs = []
            for i in range(2):
                d_i = _mxu(hsel, qsc[i] * dk)                       # (H, TN) f32
                w_i = pl.reciprocal(1.0 + jnp.exp(-d_i), approx=True)   # sigmoid (EUP)
                wb = _mxu(hselt, w_i).astype(cdt)                   # head-broadcast (D, TN)
                o_i = v1c + wb * dv                                 # == w*v0 + (1-w)*v1
                new_xs.append(xs[i] + _mxu(wo, o_i) + bo)           # residual
            xs = new_xs
        else:
            # general path for other sequence lengths (unrolled B^2 loop, f32 math)
            new_xs = []
            for i in range(bseq):
                scores = [_mxu(hsel, qs[i] * ks[j]) for j in range(bseq)]
                m = scores[0]
                for s in scores[1:]:
                    m = jnp.maximum(m, s)
                exps = [jnp.exp(s - m) for s in scores]
                denom = exps[0]
                for e in exps[1:]:
                    denom = denom + e
                inv = pl.reciprocal(denom, approx=True)             # EUP
                o_i = None
                for j in range(bseq):
                    w_ij = _mxu(hselt, exps[j] * inv)               # (D, TN) head-broadcast
                    contrib = w_ij * vs[j]
                    o_i = contrib if o_i is None else o_i + contrib
                new_xs.append(xs[i] + _mxu(wo, o_i) + bo)
            xs = new_xs

        # ---- pre-LN feed-forward (relu); bias+ReLU epilogue in bf16 on v6e/v7x ----
        for b in range(bseq):
            xn2 = _layer_norm_cols(xs[b])
            h = _mxu(w1, xn2).astype(cdt)                           # (Dff, TN)
            hid = jnp.maximum(h + b1c, 0.0)
            xs[b] = xs[b] + _mxu(w2, hid) + b2                      # residual (f32)

    for b in range(bseq):
        o_ref[b] = xs[b].astype(o_ref.dtype)


def _replicated_spec(shape):
    nd = len(shape)
    return pl.BlockSpec(shape, lambda i, _nd=nd: (0,) * _nd)


def _use_bf16_eltwise():
    # bf16 VALU exists on v6e / v7x; v5e (and older) keep f32 elementwise.
    try:
        kind = jax.devices()[0].device_kind.lower()
    except Exception:  # pragma: no cover
        return False
    return ("v6" in kind) or ("v7" in kind)


def transformer_encoder_pallas(x_bdn, kparams, tile_n=2048, bf16_eltwise=None):
    """x_bdn: (B, D, N) f32, N = num_windows * window_size (lane axis)."""
    B, D, N = x_bdn.shape
    if bf16_eltwise is None:
        bf16_eltwise = _use_bf16_eltwise()

    # Lane tile: as large as tile_n allows, but keep >= 2 grid steps whenever
    # N > 128 so both TensorCores on dual-TC parts (v7x) get work.
    n128 = _round_up(N, 128)
    tile = min(_round_up(max(tile_n, 128), 128), n128)
    if n128 > 128:
        tile = min(tile, max(128, _round_up((n128 + 1) // 2, 128)))
    Np = _round_up(N, tile)
    if Np != N:
        x_bdn = jnp.pad(x_bdn, ((0, 0), (0, 0), (0, Np - N)))
    grid = (Np // tile,)

    hd = D // NUM_HEADS
    eye = jnp.eye(NUM_HEADS, dtype=jnp.float32)
    hsel = jnp.repeat(eye, hd, axis=1).astype(jnp.bfloat16)    # (H, D) head-sum
    hselt = jnp.repeat(eye, hd, axis=0).astype(jnp.bfloat16)   # (D, H) head-broadcast

    weights = [kparams[k] for k in _KPARAM_ORDER]

    in_specs = [pl.BlockSpec((B, D, tile), lambda i: (0, 0, i)),
                _replicated_spec(hsel.shape), _replicated_spec(hselt.shape)]
    in_specs += [_replicated_spec(w.shape) for w in weights]
    out_spec = pl.BlockSpec((B, D, tile), lambda i: (0, 0, i))

    kernel = functools.partial(transformer_kernel,
                               num_layers=NUM_LAYERS,
                               num_heads=NUM_HEADS,
                               d_model=D,
                               bf16_eltwise=bf16_eltwise)
    y = pl.pallas_call(
        kernel,
        out_shape=jax.ShapeDtypeStruct((B, D, Np), jnp.float32),
        grid=grid,
        in_specs=in_specs,
        out_specs=out_spec,
        compiler_params=pltpu.CompilerParams(
            dimension_semantics=("parallel",),
            vmem_limit_bytes=32 * 1024 * 1024),
    )(x_bdn, hsel, hselt, *weights)
    return y[:, :, :N]


# --------------------------- params / glue code -------------------------------
def init_params(key):
    ks = jax.random.split(key, 12)
    w = lambda k, shape, s: s * jax.random.normal(k, shape, jnp.float32)
    p = {
        "embedding": jax.random.normal(ks[0], (3, D_MODEL), jnp.float32),
        "ln1_g": jnp.ones((NUM_LAYERS, D_MODEL), jnp.float32),
        "ln1_b": jnp.zeros((NUM_LAYERS, D_MODEL), jnp.float32),
        "wqkv": w(ks[1], (NUM_LAYERS, 3 * D_MODEL, D_MODEL), 0.25),   # torch in_proj_weight
        "bqkv": w(ks[2], (NUM_LAYERS, 3 * D_MODEL), 0.05),
        "wo": w(ks[3], (NUM_LAYERS, D_MODEL, D_MODEL), 0.25),
        "bo": w(ks[4], (NUM_LAYERS, D_MODEL), 0.05),
        "ln2_g": jnp.ones((NUM_LAYERS, D_MODEL), jnp.float32),
        "ln2_b": jnp.zeros((NUM_LAYERS, D_MODEL), jnp.float32),
        "w1": w(ks[5], (NUM_LAYERS, D_FF, D_MODEL), 0.25),
        "b1": w(ks[6], (NUM_LAYERS, D_FF), 0.05),
        "w2": w(ks[7], (NUM_LAYERS, D_MODEL, D_FF), 0.1),
        "b2": w(ks[8], (NUM_LAYERS, D_MODEL), 0.05),
        "fc_w": w(ks[9], (1, D_MODEL), 0.25),
        "fc_b": w(ks[10], (1,), 0.05),
    }
    return p


def kernel_params(p):
    """Host-side (exact) weight folds:
       - pre-LN gamma/beta folded into wqkv/bqkv and w1/b1,
       - 1/sqrt(head_dim) folded into the Q rows of wqkv/bqkv.
       Activations are transposed in the kernel, so torch (out, in) weights are
       used directly as y = W @ x. Matmul weights pre-cast to bf16 (MXU inputs);
       biases stay f32 and become (out, 1) lane-broadcast columns."""
    hd = D_MODEL // NUM_HEADS
    qscale = 1.0 / math.sqrt(hd)

    # LN1 affine fold: W' = W * g (scale input columns), b' = b + W @ beta
    wqkv = p["wqkv"] * p["ln1_g"][:, None, :]
    bqkv = p["bqkv"] + jnp.einsum("lod,ld->lo", p["wqkv"], p["ln1_b"])
    # q-scale fold (rows 0:D are the Q projection)
    qsc = jnp.concatenate([jnp.full((D_MODEL,), qscale, jnp.float32),
                           jnp.ones((2 * D_MODEL,), jnp.float32)])
    wqkv = wqkv * qsc[None, :, None]
    bqkv = bqkv * qsc[None, :]
    # LN2 affine fold into the FFN first layer
    w1 = p["w1"] * p["ln2_g"][:, None, :]
    b1 = p["b1"] + jnp.einsum("lod,ld->lo", p["w1"], p["ln2_b"])

    bf = lambda a: a.astype(jnp.bfloat16)
    col = lambda a: a[:, :, None]
    return dict(
        wqkv=bf(wqkv), bqkv=col(bqkv),
        wo=bf(p["wo"]), bo=col(p["bo"]),
        w1=bf(w1), b1=col(b1),
        w2=bf(p["w2"]), b2=col(p["b2"]),
    )


def snp_transformer_forward(tokens, params, window_size, stride, tile_n=2048):
    B, L = tokens.shape
    emb = jnp.take(params["embedding"], tokens, axis=0)              # (B, L, D)
    starts = list(range(0, L - window_size + 1, stride))
    wins = jnp.stack([emb[:, s:s + window_size, :] for s in starts], axis=1)  # (B, nw, W, D)
    N = len(starts) * window_size
    x_bnd = wins.reshape(B, N, D_MODEL)                              # (B, N, D)
    x_bdn = jnp.transpose(x_bnd, (0, 2, 1))                          # (B, D, N)  lane-dense N
    y = transformer_encoder_pallas(x_bdn, kernel_params(params), tile_n=tile_n)  # (B, D, N)
    # mean over W then over windows == uniform mean over all N window positions
    pooled = y.mean(axis=2)                                          # (B, D)
    out = pooled @ params["fc_w"].T + params["fc_b"]                 # (B, 1)
    return jnp.squeeze(out)


# ----------------------- pure-JAX reference (for checking) --------------------
def _ln_ref(x, g, b):
    mu = x.mean(axis=-1, keepdims=True)
    var = ((x - mu) ** 2).mean(axis=-1, keepdims=True)
    return (x - mu) * jax.lax.rsqrt(var + LN_EPS) * g + b


def reference_forward(tokens, p, window_size, stride):
    B, L = tokens.shape
    D = D_MODEL
    hd = D // NUM_HEADS
    emb = jnp.take(p["embedding"], tokens, axis=0)

    def encoder(x):                       # x: (W, B, D); batch_first -> seq axis is B
        Wb, S, _ = x.shape
        for l in range(NUM_LAYERS):
            xn = _ln_ref(x, p["ln1_g"][l], p["ln1_b"][l])
            qkv = xn @ p["wqkv"][l].T + p["bqkv"][l]
            q, k, v = jnp.split(qkv, 3, axis=-1)
            q = q.reshape(Wb, S, NUM_HEADS, hd) / math.sqrt(hd)
            k = k.reshape(Wb, S, NUM_HEADS, hd)
            v = v.reshape(Wb, S, NUM_HEADS, hd)
            s = jnp.einsum("wqhd,wkhd->whqk", q, k)
            a = jax.nn.softmax(s, axis=-1)
            o = jnp.einsum("whqk,wkhd->wqhd", a, v).reshape(Wb, S, D)
            x = x + (o @ p["wo"][l].T + p["bo"][l])
            xn2 = _ln_ref(x, p["ln2_g"][l], p["ln2_b"][l])
            h = jax.nn.relu(xn2 @ p["w1"][l].T + p["b1"][l])
            x = x + (h @ p["w2"][l].T + p["b2"][l])
        return x

    outs = []
    for start in range(0, L - window_size + 1, stride):
        window = emb[:, start:start + window_size, :]
        window = jnp.transpose(window, (1, 0, 2))
        outs.append(encoder(window).mean(axis=0))
    outs = jnp.stack(outs, axis=1)
    final = outs.mean(axis=1)
    return jnp.squeeze(final @ p["fc_w"].T + p["fc_b"])


# ----------------------------------- main -------------------------------------
if __name__ == "__main__":
    key = jax.random.PRNGKey(0)
    pkey, tkey = jax.random.split(key)
    params = init_params(pkey)

    # small demo shapes: batch=2, L=256, window=64, stride=64 -> 4 windows, N=256
    # tile caps to 128 here -> a 2-step grid (uses both TCs on dual-TC parts).
    B, L = 2, 256
    window_size, stride = 64, 64
    tokens = jax.random.randint(tkey, (B, L), 0, 3, dtype=jnp.int32)

    out = snp_transformer_forward(tokens, params, window_size, stride, tile_n=128)
    out = jax.block_until_ready(out)

    ref = reference_forward(tokens, params, window_size, stride)
    ref = jax.block_until_ready(ref)

    assert out.shape == (B,) and ref.shape == (B,)
    assert bool(jnp.allclose(out, ref, atol=3e-2, rtol=3e-2)), (out, ref)
    print("KERNEL_OK")
</pallas_src>

<mosaic_0001>
module attributes {stable_mosaic.version = 11 : i64} {
  func.func @transformer_kernel(%arg0: i32, %arg1: memref<2x16x128xf32, #tpu.memory_space<vmem>>, %arg2: memref<4x16xbf16, #tpu.memory_space<vmem>>, %arg3: memref<16x4xbf16, #tpu.memory_space<vmem>>, %arg4: memref<4x48x16xbf16, #tpu.memory_space<vmem>>, %arg5: memref<4x48x1xf32, #tpu.memory_space<vmem>>, %arg6: memref<4x16x16xbf16, #tpu.memory_space<vmem>>, %arg7: memref<4x16x1xf32, #tpu.memory_space<vmem>>, %arg8: memref<4x128x16xbf16, #tpu.memory_space<vmem>>, %arg9: memref<4x128x1xf32, #tpu.memory_space<vmem>>, %arg10: memref<4x16x128xbf16, #tpu.memory_space<vmem>>, %arg11: memref<4x16x1xf32, #tpu.memory_space<vmem>>, %arg12: memref<2x16x128xf32, #tpu.memory_space<vmem>>) attributes {dimension_semantics = [#tpu.dimension_semantics<parallel>], iteration_bounds = array<i64: 2>, scalar_prefetch = 0 : i64, scratch_operands = 0 : i64, tpu.core_type = #tpu.core_type<tc>, window_params = [{transform_indices = @transform_0, window_bounds = array<i64: 2, 16, 128>}, {pipeline_mode = #tpu.pipeline_mode<synchronous>, transform_indices = @transform_1, window_bounds = array<i64: 4, 16>}, {pipeline_mode = #tpu.pipeline_mode<synchronous>, transform_indices = @transform_2, window_bounds = array<i64: 16, 4>}, {pipeline_mode = #tpu.pipeline_mode<synchronous>, transform_indices = @transform_3, window_bounds = array<i64: 4, 48, 16>}, {pipeline_mode = #tpu.pipeline_mode<synchronous>, transform_indices = @transform_4, window_bounds = array<i64: 4, 48, 1>}, {pipeline_mode = #tpu.pipeline_mode<synchronous>, transform_indices = @transform_5, window_bounds = array<i64: 4, 16, 16>}, {pipeline_mode = #tpu.pipeline_mode<synchronous>, transform_indices = @transform_6, window_bounds = array<i64: 4, 16, 1>}, {pipeline_mode = #tpu.pipeline_mode<synchronous>, transform_indices = @transform_7, window_bounds = array<i64: 4, 128, 16>}, {pipeline_mode = #tpu.pipeline_mode<synchronous>, transform_indices = @transform_8, window_bounds = array<i64: 4, 128, 1>}, {pipeline_mode = #tpu.pipeline_mode<synchronous>, transform_indices = @transform_9, window_bounds = array<i64: 4, 16, 128>}, {pipeline_mode = #tpu.pipeline_mode<synchronous>, transform_indices = @transform_10, window_bounds = array<i64: 4, 16, 1>}, {transform_indices = @transform_11, window_bounds = array<i64: 2, 16, 128>}]} {
    %c0 = arith.constant 0 : index
    %c0_0 = arith.constant 0 : index
    %0 = vector.load %arg2[%c0, %c0_0] : memref<4x16xbf16, #tpu.memory_space<vmem>>, vector<4x16xbf16>
    %c0_1 = arith.constant 0 : index
    %c0_2 = arith.constant 0 : index
    %1 = vector.load %arg3[%c0_1, %c0_2] : memref<16x4xbf16, #tpu.memory_space<vmem>>, vector<16x4xbf16>
    %c0_3 = arith.constant 0 : index
    %c0_4 = arith.constant 0 : index
    %c0_5 = arith.constant 0 : index
    %2 = vector.load %arg1[%c0_3, %c0_4, %c0_5] : memref<2x16x128xf32, #tpu.memory_space<vmem>>, vector<1x16x128xf32>
    %3 = vector.shape_cast %2 : vector<1x16x128xf32> to vector<16x128xf32>
    %c1 = arith.constant 1 : index
    %c0_6 = arith.constant 0 : index
    %c0_7 = arith.constant 0 : index
    %4 = vector.load %arg1[%c1, %c0_6, %c0_7] : memref<2x16x128xf32, #tpu.memory_space<vmem>>, vector<1x16x128xf32>
    %5 = vector.shape_cast %4 : vector<1x16x128xf32> to vector<16x128xf32>
    %c0_8 = arith.constant 0 : index
    %c0_9 = arith.constant 0 : index
    %c0_10 = arith.constant 0 : index
    %6 = vector.load %arg4[%c0_8, %c0_9, %c0_10] : memref<4x48x16xbf16, #tpu.memory_space<vmem>>, vector<1x48x16xbf16>
    %7 = vector.shape_cast %6 : vector<1x48x16xbf16> to vector<48x16xbf16>
    %c0_11 = arith.constant 0 : index
    %c0_12 = arith.constant 0 : index
    %c0_13 = arith.constant 0 : index
    %8 = vector.load %arg5[%c0_11, %c0_12, %c0_13] : memref<4x48x1xf32, #tpu.memory_space<vmem>>, vector<1x48x1xf32>
    %9 = vector.shape_cast %8 : vector<1x48x1xf32> to vector<48x1xf32>
    %c0_14 = arith.constant 0 : index
    %c0_15 = arith.constant 0 : index
    %c0_16 = arith.constant 0 : index
    %10 = vector.load %arg6[%c0_14, %c0_15, %c0_16] : memref<4x16x16xbf16, #tpu.memory_space<vmem>>, vector<1x16x16xbf16>
    %11 = vector.shape_cast %10 : vector<1x16x16xbf16> to vector<16x16xbf16>
    %c0_17 = arith.constant 0 : index
    %c0_18 = arith.constant 0 : index
    %c0_19 = arith.constant 0 : index
    %12 = vector.load %arg7[%c0_17, %c0_18, %c0_19] : memref<4x16x1xf32, #tpu.memory_space<vmem>>, vector<1x16x1xf32>
    %13 = vector.shape_cast %12 : vector<1x16x1xf32> to vector<16x1xf32>
    %c0_20 = arith.constant 0 : index
    %c0_21 = arith.constant 0 : index
    %c0_22 = arith.constant 0 : index
    %14 = vector.load %arg8[%c0_20, %c0_21, %c0_22] : memref<4x128x16xbf16, #tpu.memory_space<vmem>>, vector<1x128x16xbf16>
    %15 = vector.shape_cast %14 : vector<1x128x16xbf16> to vector<128x16xbf16>
    %c0_23 = arith.constant 0 : index
    %c0_24 = arith.constant 0 : index
    %c0_25 = arith.constant 0 : index
    %16 = vector.load %arg9[%c0_23, %c0_24, %c0_25] : memref<4x128x1xf32, #tpu.memory_space<vmem>>, vector<1x128x1xf32>
    %17 = vector.shape_cast %16 : vector<1x128x1xf32> to vector<128x1xf32>
    %c0_26 = arith.constant 0 : index
    %c0_27 = arith.constant 0 : index
    %c0_28 = arith.constant 0 : index
    %18 = vector.load %arg10[%c0_26, %c0_27, %c0_28] : memref<4x16x128xbf16, #tpu.memory_space<vmem>>, vector<1x16x128xbf16>
    %19 = vector.shape_cast %18 : vector<1x16x128xbf16> to vector<16x128xbf16>
    %c0_29 = arith.constant 0 : index
    %c0_30 = arith.constant 0 : index
    %c0_31 = arith.constant 0 : index
    %20 = vector.load %arg11[%c0_29, %c0_30, %c0_31] : memref<4x16x1xf32, #tpu.memory_space<vmem>>, vector<1x16x1xf32>
    %21 = vector.shape_cast %20 : vector<1x16x1xf32> to vector<16x1xf32>
    %cst = arith.constant dense<0.000000e+00> : vector<128xf32>
    %22 = vector.multi_reduction <add>, %3, %cst [0] : vector<16x128xf32> to vector<128xf32>
    %23 = vector.shape_cast %22 : vector<128xf32> to vector<1x128xf32>
    %cst_32 = arith.constant 1.600000e+01 : f32
    %24 = vector.broadcast %cst_32 : f32 to vector<1x128xf32>
    %25 = arith.divf %23, %24 : vector<1x128xf32>
    %26 = vector.broadcast %25 : vector<1x128xf32> to vector<16x128xf32>
    %27 = arith.subf %3, %26 : vector<16x128xf32>
    %28 = arith.mulf %27, %27 : vector<16x128xf32>
    %cst_33 = arith.constant dense<0.000000e+00> : vector<128xf32>
    %29 = vector.multi_reduction <add>, %28, %cst_33 [0] : vector<16x128xf32> to vector<128xf32>
    %30 = vector.shape_cast %29 : vector<128xf32> to vector<1x128xf32>
    %cst_34 = arith.constant 1.600000e+01 : f32
    %31 = vector.broadcast %cst_34 : f32 to vector<1x128xf32>
    %32 = arith.divf %30, %31 : vector<1x128xf32>
    %cst_35 = arith.constant 9.99999974E-6 : f32
    %33 = vector.broadcast %cst_35 : f32 to vector<1x128xf32>
    %34 = arith.addf %32, %33 : vector<1x128xf32>
    %35 = math.rsqrt %34 : vector<1x128xf32>
    %36 = vector.broadcast %35 : vector<1x128xf32> to vector<16x128xf32>
    %37 = arith.mulf %27, %36 : vector<16x128xf32>
    %38 = arith.truncf %37 : vector<16x128xf32> to vector<16x128xbf16>
    %cst_36 = arith.constant dense<0.000000e+00> : vector<48x128xf32>
    %39 = tpu.matmul %7, %38, %cst_36 {dimension_numbers = #tpu.dot_dimension_numbers<[1], [0], [0], [1], [0, 0, 1, 1], [], []>} : vector<48x16xbf16>, vector<16x128xbf16>, vector<48x128xf32> -> vector<48x128xf32>
    %40 = vector.broadcast %9 : vector<48x1xf32> to vector<48x128xf32>
    %41 = arith.addf %39, %40 : vector<48x128xf32>
    %cst_37 = arith.constant dense<0.000000e+00> : vector<128xf32>
    %42 = vector.multi_reduction <add>, %5, %cst_37 [0] : vector<16x128xf32> to vector<128xf32>
    %43 = vector.shape_cast %42 : vector<128xf32> to vector<1x128xf32>
    %cst_38 = arith.constant 1.600000e+01 : f32
    %44 = vector.broadcast %cst_38 : f32 to vector<1x128xf32>
    %45 = arith.divf %43, %44 : vector<1x128xf32>
    %46 = vector.broadcast %45 : vector<1x128xf32> to vector<16x128xf32>
    %47 = arith.subf %5, %46 : vector<16x128xf32>
    %48 = arith.mulf %47, %47 : vector<16x128xf32>
    %cst_39 = arith.constant dense<0.000000e+00> : vector<128xf32>
    %49 = vector.multi_reduction <add>, %48, %cst_39 [0] : vector<16x128xf32> to vector<128xf32>
    %50 = vector.shape_cast %49 : vector<128xf32> to vector<1x128xf32>
    %cst_40 = arith.constant 1.600000e+01 : f32
    %51 = vector.broadcast %cst_40 : f32 to vector<1x128xf32>
    %52 = arith.divf %50, %51 : vector<1x128xf32>
    %cst_41 = arith.constant 9.99999974E-6 : f32
    %53 = vector.broadcast %cst_41 : f32 to vector<1x128xf32>
    %54 = arith.addf %52, %53 : vector<1x128xf32>
    %55 = math.rsqrt %54 : vector<1x128xf32>
    %56 = vector.broadcast %55 : vector<1x128xf32> to vector<16x128xf32>
    %57 = arith.mulf %47, %56 : vector<16x128xf32>
    %58 = arith.truncf %57 : vector<16x128xf32> to vector<16x128xbf16>
    %cst_42 = arith.constant dense<0.000000e+00> : vector<48x128xf32>
    %59 = tpu.matmul %7, %58, %cst_42 {dimension_numbers = #tpu.dot_dimension_numbers<[1], [0], [0], [1], [0, 0, 1, 1], [], []>} : vector<48x16xbf16>, vector<16x128xbf16>, vector<48x128xf32> -> vector<48x128xf32>
    %60 = vector.broadcast %9 : vector<48x1xf32> to vector<48x128xf32>
    %61 = arith.addf %59, %60 : vector<48x128xf32>
    %62 = vector.extract_strided_slice %41 {offsets = [0, 0], sizes = [16, 128], strides = [1, 1]} : vector<48x128xf32> to vector<16x128xf32>
    %63 = vector.extract_strided_slice %61 {offsets = [0, 0], sizes = [16, 128], strides = [1, 1]} : vector<48x128xf32> to vector<16x128xf32>
    %64 = vector.extract_strided_slice %41 {offsets = [16, 0], sizes = [16, 128], strides = [1, 1]} : vector<48x128xf32> to vector<16x128xf32>
    %65 = vector.extract_strided_slice %61 {offsets = [16, 0], sizes = [16, 128], strides = [1, 1]} : vector<48x128xf32> to vector<16x128xf32>
    %66 = vector.extract_strided_slice %41 {offsets = [32, 0], sizes = [16, 128], strides = [1, 1]} : vector<48x128xf32> to vector<16x128xf32>
    %67 = vector.extract_strided_slice %61 {offsets = [32, 0], sizes = [16, 128], strides = [1, 1]} : vector<48x128xf32> to vector<16x128xf32>
    %68 = arith.subf %64, %65 : vector<16x128xf32>
    %69 = arith.subf %66, %67 : vector<16x128xf32>
    %70 = arith.mulf %62, %68 : vector<16x128xf32>
    %71 = arith.truncf %70 : vector<16x128xf32> to vector<16x128xbf16>
    %cst_43 = arith.constant dense<0.000000e+00> : vector<4x128xf32>
    %72 = tpu.matmul %0, %71, %cst_43 {dimension_numbers = #tpu.dot_dimension_numbers<[1], [0], [0], [1], [0, 0, 1, 1], [], []>} : vector<4x16xbf16>, vector<16x128xbf16>, vector<4x128xf32> -> vector<4x128xf32>
    %cst_44 = arith.constant 0.000000e+00 : f32
    %73 = vector.broadcast %cst_44 : f32 to vector<4x128xf32>
    %74 = arith.subf %73, %72 : vector<4x128xf32>
    %75 = math.exp %74 : vector<4x128xf32>
    %cst_45 = arith.constant 1.000000e+00 : f32
    %76 = vector.broadcast %cst_45 : f32 to vector<4x128xf32>
    %77 = arith.addf %76, %75 : vector<4x128xf32>
    %78 = tpu.reciprocal %77 {approx = true} : vector<4x128xf32> -> vector<4x128xf32>
    %79 = arith.truncf %78 : vector<4x128xf32> to vector<4x128xbf16>
    %cst_46 = arith.constant dense<0.000000e+00> : vector<16x128xf32>
    %80 = tpu.matmul %1, %79, %cst_46 {dimension_numbers = #tpu.dot_dimension_numbers<[1], [0], [0], [1], [0, 0, 1, 1], [], []>} : vector<16x4xbf16>, vector<4x128xbf16>, vector<16x128xf32> -> vector<16x128xf32>
    %81 = arith.mulf %80, %69 : vector<16x128xf32>
    %82 = arith.addf %67, %81 : vector<16x128xf32>
    %83 = arith.truncf %82 : vector<16x128xf32> to vector<16x128xbf16>
    %cst_47 = arith.constant dense<0.000000e+00> : vector<16x128xf32>
    %84 = tpu.matmul %11, %83, %cst_47 {dimension_numbers = #tpu.dot_dimension_numbers<[1], [0], [0], [1], [0, 0, 1, 1], [], []>} : vector<16x16xbf16>, vector<16x128xbf16>, vector<16x128xf32> -> vector<16x128xf32>
    %85 = arith.addf %3, %84 : vector<16x128xf32>
    %86 = vector.broadcast %13 : vector<16x1xf32> to vector<16x128xf32>
    %87 = arith.addf %85, %86 : vector<16x128xf32>
    %88 = arith.mulf %63, %68 : vector<16x128xf32>
    %89 = arith.truncf %88 : vector<16x128xf32> to vector<16x128xbf16>
    %cst_48 = arith.constant dense<0.000000e+00> : vector<4x128xf32>
    %90 = tpu.matmul %0, %89, %cst_48 {dimension_numbers = #tpu.dot_dimension_numbers<[1], [0], [0], [1], [0, 0, 1, 1], [], []>} : vector<4x16xbf16>, vector<16x128xbf16>, vector<4x128xf32> -> vector<4x128xf32>
    %cst_49 = arith.constant 0.000000e+00 : f32
    %91 = vector.broadcast %cst_49 : f32 to vector<4x128xf32>
    %92 = arith.subf %91, %90 : vector<4x128xf32>
    %93 = math.exp %92 : vector<4x128xf32>
    %cst_50 = arith.constant 1.000000e+00 : f32
    %94 = vector.broadcast %cst_50 : f32 to vector<4x128xf32>
    %95 = arith.addf %94, %93 : vector<4x128xf32>
    %96 = tpu.reciprocal %95 {approx = true} : vector<4x128xf32> -> vector<4x128xf32>
    %97 = arith.truncf %96 : vector<4x128xf32> to vector<4x128xbf16>
    %cst_51 = arith.constant dense<0.000000e+00> : vector<16x128xf32>
    %98 = tpu.matmul %1, %97, %cst_51 {dimension_numbers = #tpu.dot_dimension_numbers<[1], [0], [0], [1], [0, 0, 1, 1], [], []>} : vector<16x4xbf16>, vector<4x128xbf16>, vector<16x128xf32> -> vector<16x128xf32>
    %99 = arith.mulf %98, %69 : vector<16x128xf32>
    %100 = arith.addf %67, %99 : vector<16x128xf32>
    %101 = arith.truncf %100 : vector<16x128xf32> to vector<16x128xbf16>
    %cst_52 = arith.constant dense<0.000000e+00> : vector<16x128xf32>
    %102 = tpu.matmul %11, %101, %cst_52 {dimension_numbers = #tpu.dot_dimension_numbers<[1], [0], [0], [1], [0, 0, 1, 1], [], []>} : vector<16x16xbf16>, vector<16x128xbf16>, vector<16x128xf32> -> vector<16x128xf32>
    %103 = arith.addf %5, %102 : vector<16x128xf32>
    %104 = vector.broadcast %13 : vector<16x1xf32> to vector<16x128xf32>
    %105 = arith.addf %103, %104 : vector<16x128xf32>
    %cst_53 = arith.constant dense<0.000000e+00> : vector<128xf32>
    %106 = vector.multi_reduction <add>, %87, %cst_53 [0] : vector<16x128xf32> to vector<128xf32>
    %107 = vector.shape_cast %106 : vector<128xf32> to vector<1x128xf32>
    %cst_54 = arith.constant 1.600000e+01 : f32
    %108 = vector.broadcast %cst_54 : f32 to vector<1x128xf32>
    %109 = arith.divf %107, %108 : vector<1x128xf32>
    %110 = vector.broadcast %109 : vector<1x128xf32> to vector<16x128xf32>
    %111 = arith.subf %87, %110 : vector<16x128xf32>
    %112 = arith.mulf %111, %111 : vector<16x128xf32>
    %cst_55 = arith.constant dense<0.000000e+00> : vector<128xf32>
    %113 = vector.multi_reduction <add>, %112, %cst_55 [0] : vector<16x128xf32> to vector<128xf32>
    %114 = vector.shape_cast %113 : vector<128xf32> to vector<1x128xf32>
    %cst_56 = arith.constant 1.600000e+01 : f32
    %115 = vector.broadcast %cst_56 : f32 to vector<1x128xf32>
    %116 = arith.divf %114, %115 : vector<1x128xf32>
    %cst_57 = arith.constant 9.99999974E-6 : f32
    %117 = vector.broadcast %cst_57 : f32 to vector<1x128xf32>
    %118 = arith.addf %116, %117 : vector<1x128xf32>
    %119 = math.rsqrt %118 : vector<1x128xf32>
    %120 = vector.broadcast %119 : vector<1x128xf32> to vector<16x128xf32>
    %121 = arith.mulf %111, %120 : vector<16x128xf32>
    %122 = arith.truncf %121 : vector<16x128xf32> to vector<16x128xbf16>
    %cst_58 = arith.constant dense<0.000000e+00> : vector<128x128xf32>
    %123 = tpu.matmul %15, %122, %cst_58 {dimension_numbers = #tpu.dot_dimension_numbers<[1], [0], [0], [1], [0, 0, 1, 1], [], []>} : vector<128x16xbf16>, vector<16x128xbf16>, vector<128x128xf32> -> vector<128x128xf32>
    %124 = vector.broadcast %17 : vector<128x1xf32> to vector<128x128xf32>
    %125 = arith.addf %123, %124 : vector<128x128xf32>
    %cst_59 = arith.constant 0.000000e+00 : f32
    %126 = vector.broadcast %cst_59 : f32 to vector<128x128xf32>
    %127 = arith.maximumf %125, %126 : vector<128x128xf32>
    %128 = arith.truncf %127 : vector<128x128xf32> to vector<128x128xbf16>
    %cst_60 = arith.constant dense<0.000000e+00> : vector<16x128xf32>
    %129 = tpu.matmul %19, %128, %cst_60 {dimension_numbers = #tpu.dot_dimension_numbers<[1], [0], [0], [1], [0, 0, 1, 1], [], []>} : vector<16x128xbf16>, vector<128x128xbf16>, vector<16x128xf32> -> vector<16x128xf32>
    %130 = arith.addf %87, %129 : vector<16x128xf32>
    %131 = vector.broadcast %21 : vector<16x1xf32> to vector<16x128xf32>
    %132 = arith.addf %130, %131 : vector<16x128xf32>
    %cst_61 = arith.constant dense<0.000000e+00> : vector<128xf32>
    %133 = vector.multi_reduction <add>, %105, %cst_61 [0] : vector<16x128xf32> to vector<128xf32>
    %134 = vector.shape_cast %133 : vector<128xf32> to vector<1x128xf32>
    %cst_62 = arith.constant 1.600000e+01 : f32
    %135 = vector.broadcast %cst_62 : f32 to vector<1x128xf32>
    %136 = arith.divf %134, %135 : vector<1x128xf32>
    %137 = vector.broadcast %136 : vector<1x128xf32> to vector<16x128xf32>
    %138 = arith.subf %105, %137 : vector<16x128xf32>
    %139 = arith.mulf %138, %138 : vector<16x128xf32>
    %cst_63 = arith.constant dense<0.000000e+00> : vector<128xf32>
    %140 = vector.multi_reduction <add>, %139, %cst_63 [0] : vector<16x128xf32> to vector<128xf32>
    %141 = vector.shape_cast %140 : vector<128xf32> to vector<1x128xf32>
    %cst_64 = arith.constant 1.600000e+01 : f32
    %142 = vector.broadcast %cst_64 : f32 to vector<1x128xf32>
    %143 = arith.divf %141, %142 : vector<1x128xf32>
    %cst_65 = arith.constant 9.99999974E-6 : f32
    %144 = vector.broadcast %cst_65 : f32 to vector<1x128xf32>
    %145 = arith.addf %143, %144 : vector<1x128xf32>
    %146 = math.rsqrt %145 : vector<1x128xf32>
    %147 = vector.broadcast %146 : vector<1x128xf32> to vector<16x128xf32>
    %148 = arith.mulf %138, %147 : vector<16x128xf32>
    %149 = arith.truncf %148 : vector<16x128xf32> to vector<16x128xbf16>
    %cst_66 = arith.constant dense<0.000000e+00> : vector<128x128xf32>
    %150 = tpu.matmul %15, %149, %cst_66 {dimension_numbers = #tpu.dot_dimension_numbers<[1], [0], [0], [1], [0, 0, 1, 1], [], []>} : vector<128x16xbf16>, vector<16x128xbf16>, vector<128x128xf32> -> vector<128x128xf32>
    %151 = vector.broadcast %17 : vector<128x1xf32> to vector<128x128xf32>
    %152 = arith.addf %150, %151 : vector<128x128xf32>
    %cst_67 = arith.constant 0.000000e+00 : f32
    %153 = vector.broadcast %cst_67 : f32 to vector<128x128xf32>
    %154 = arith.maximumf %152, %153 : vector<128x128xf32>
    %155 = arith.truncf %154 : vector<128x128xf32> to vector<128x128xbf16>
    %cst_68 = arith.constant dense<0.000000e+00> : vector<16x128xf32>
    %156 = tpu.matmul %19, %155, %cst_68 {dimension_numbers = #tpu.dot_dimension_numbers<[1], [0], [0], [1], [0, 0, 1, 1], [], []>} : vector<16x128xbf16>, vector<128x128xbf16>, vector<16x128xf32> -> vector<16x128xf32>
    %157 = arith.addf %105, %156 : vector<16x128xf32>
    %158 = vector.broadcast %21 : vector<16x1xf32> to vector<16x128xf32>
    %159 = arith.addf %157, %158 : vector<16x128xf32>
    %c1_69 = arith.constant 1 : index
    %c0_70 = arith.constant 0 : index
    %c0_71 = arith.constant 0 : index
    %160 = vector.load %arg4[%c1_69, %c0_70, %c0_71] : memref<4x48x16xbf16, #tpu.memory_space<vmem>>, vector<1x48x16xbf16>
    %161 = vector.shape_cast %160 : vector<1x48x16xbf16> to vector<48x16xbf16>
    %c1_72 = arith.constant 1 : index
    %c0_73 = arith.constant 0 : index
    %c0_74 = arith.constant 0 : index
    %162 = vector.load %arg5[%c1_72, %c0_73, %c0_74] : memref<4x48x1xf32, #tpu.memory_space<vmem>>, vector<1x48x1xf32>
    %163 = vector.shape_cast %162 : vector<1x48x1xf32> to vector<48x1xf32>
    %c1_75 = arith.constant 1 : index
    %c0_76 = arith.constant 0 : index
    %c0_77 = arith.constant 0 : index
    %164 = vector.load %arg6[%c1_75, %c0_76, %c0_77] : memref<4x16x16xbf16, #tpu.memory_space<vmem>>, vector<1x16x16xbf16>
    %165 = vector.shape_cast %164 : vector<1x16x16xbf16> to vector<16x16xbf16>
    %c1_78 = arith.constant 1 : index
    %c0_79 = arith.constant 0 : index
    %c0_80 = arith.constant 0 : index
    %166 = vector.load %arg7[%c1_78, %c0_79, %c0_80] : memref<4x16x1xf32, #tpu.memory_space<vmem>>, vector<1x16x1xf32>
    %167 = vector.shape_cast %166 : vector<1x16x1xf32> to vector<16x1xf32>
    %c1_81 = arith.constant 1 : index
    %c0_82 = arith.constant 0 : index
    %c0_83 = arith.constant 0 : index
    %168 = vector.load %arg8[%c1_81, %c0_82, %c0_83] : memref<4x128x16xbf16, #tpu.memory_space<vmem>>, vector<1x128x16xbf16>
    %169 = vector.shape_cast %168 : vector<1x128x16xbf16> to vector<128x16xbf16>
    %c1_84 = arith.constant 1 : index
    %c0_85 = arith.constant 0 : index
    %c0_86 = arith.constant 0 : index
    %170 = vector.load %arg9[%c1_84, %c0_85, %c0_86] : memref<4x128x1xf32, #tpu.memory_space<vmem>>, vector<1x128x1xf32>
    %171 = vector.shape_cast %170 : vector<1x128x1xf32> to vector<128x1xf32>
    %c1_87 = arith.constant 1 : index
    %c0_88 = arith.constant 0 : index
    %c0_89 = arith.constant 0 : index
    %172 = vector.load %arg10[%c1_87, %c0_88, %c0_89] : memref<4x16x128xbf16, #tpu.memory_space<vmem>>, vector<1x16x128xbf16>
    %173 = vector.shape_cast %172 : vector<1x16x128xbf16> to vector<16x128xbf16>
    %c1_90 = arith.constant 1 : index
    %c0_91 = arith.constant 0 : index
    %c0_92 = arith.constant 0 : index
    %174 = vector.load %arg11[%c1_90, %c0_91, %c0_92] : memref<4x16x1xf32, #tpu.memory_space<vmem>>, vector<1x16x1xf32>
    %175 = vector.shape_cast %174 : vector<1x16x1xf32> to vector<16x1xf32>
    %cst_93 = arith.constant dense<0.000000e+00> : vector<128xf32>
    %176 = vector.multi_reduction <add>, %132, %cst_93 [0] : vector<16x128xf32> to vector<128xf32>
    %177 = vector.shape_cast %176 : vector<128xf32> to vector<1x128xf32>
    %cst_94 = arith.constant 1.600000e+01 : f32
    %178 = vector.broadcast %cst_94 : f32 to vector<1x128xf32>
    %179 = arith.divf %177, %178 : vector<1x128xf32>
    %180 = vector.broadcast %179 : vector<1x128xf32> to vector<16x128xf32>
    %181 = arith.subf %132, %180 : vector<16x128xf32>
    %182 = arith.mulf %181, %181 : vector<16x128xf32>
    %cst_95 = arith.constant dense<0.000000e+00> : vector<128xf32>
    %183 = vector.multi_reduction <add>, %182, %cst_95 [0] : vector<16x128xf32> to vector<128xf32>
    %184 = vector.shape_cast %183 : vector<128xf32> to vector<1x128xf32>
    %cst_96 = arith.constant 1.600000e+01 : f32
    %185 = vector.broadcast %cst_96 : f32 to vector<1x128xf32>
    %186 = arith.divf %184, %185 : vector<1x128xf32>
    %cst_97 = arith.constant 9.99999974E-6 : f32
    %187 = vector.broadcast %cst_97 : f32 to vector<1x128xf32>
    %188 = arith.addf %186, %187 : vector<1x128xf32>
    %189 = math.rsqrt %188 : vector<1x128xf32>
    %190 = vector.broadcast %189 : vector<1x128xf32> to vector<16x128xf32>
    %191 = arith.mulf %181, %190 : vector<16x128xf32>
    %192 = arith.truncf %191 : vector<16x128xf32> to vector<16x128xbf16>
    %cst_98 = arith.constant dense<0.000000e+00> : vector<48x128xf32>
    %193 = tpu.matmul %161, %192, %cst_98 {dimension_numbers = #tpu.dot_dimension_numbers<[1], [0], [0], [1], [0, 0, 1, 1], [], []>} : vector<48x16xbf16>, vector<16x128xbf16>, vector<48x128xf32> -> vector<48x128xf32>
    %194 = vector.broadcast %163 : vector<48x1xf32> to vector<48x128xf32>
    %195 = arith.addf %193, %194 : vector<48x128xf32>
    %cst_99 = arith.constant dense<0.000000e+00> : vector<128xf32>
    %196 = vector.multi_reduction <add>, %159, %cst_99 [0] : vector<16x128xf32> to vector<128xf32>
    %197 = vector.shape_cast %196 : vector<128xf32> to vector<1x128xf32>
    %cst_100 = arith.constant 1.600000e+01 : f32
    %198 = vector.broadcast %cst_100 : f32 to vector<1x128xf32>
    %199 = arith.divf %197, %198 : vector<1x128xf32>
    %200 = vector.broadcast %199 : vector<1x128xf32> to vector<16x128xf32>
    %201 = arith.subf %159, %200 : vector<16x128xf32>
    %202 = arith.mulf %201, %201 : vector<16x128xf32>
    %cst_101 = arith.constant dense<0.000000e+00> : vector<128xf32>
    %203 = vector.multi_reduction <add>, %202, %cst_101 [0] : vector<16x128xf32> to vector<128xf32>
    %204 = vector.shape_cast %203 : vector<128xf32> to vector<1x128xf32>
    %cst_102 = arith.constant 1.600000e+01 : f32
    %205 = vector.broadcast %cst_102 : f32 to vector<1x128xf32>
    %206 = arith.divf %204, %205 : vector<1x128xf32>
    %cst_103 = arith.constant 9.99999974E-6 : f32
    %207 = vector.broadcast %cst_103 : f32 to vector<1x128xf32>
    %208 = arith.addf %206, %207 : vector<1x128xf32>
    %209 = math.rsqrt %208 : vector<1x128xf32>
    %210 = vector.broadcast %209 : vector<1x128xf32> to vector<16x128xf32>
    %211 = arith.mulf %201, %210 : vector<16x128xf32>
    %212 = arith.truncf %211 : vector<16x128xf32> to vector<16x128xbf16>
    %cst_104 = arith.constant dense<0.000000e+00> : vector<48x128xf32>
    %213 = tpu.matmul %161, %212, %cst_104 {dimension_numbers = #tpu.dot_dimension_numbers<[1], [0], [0], [1], [0, 0, 1, 1], [], []>} : vector<48x16xbf16>, vector<16x128xbf16>, vector<48x128xf32> -> vector<48x128xf32>
    %214 = vector.broadcast %163 : vector<48x1xf32> to vector<48x128xf32>
    %215 = arith.addf %213, %214 : vector<48x128xf32>
    %216 = vector.extract_strided_slice %195 {offsets = [0, 0], sizes = [16, 128], strides = [1, 1]} : vector<48x128xf32> to vector<16x128xf32>
    %217 = vector.extract_strided_slice %215 {offsets = [0, 0], sizes = [16, 128], strides = [1, 1]} : vector<48x128xf32> to vector<16x128xf32>
    %218 = vector.extract_strided_slice %195 {offsets = [16, 0], sizes = [16, 128], strides = [1, 1]} : vector<48x128xf32> to vector<16x128xf32>
    %219 = vector.extract_strided_slice %215 {offsets = [16, 0], sizes = [16, 128], strides = [1, 1]} : vector<48x128xf32> to vector<16x128xf32>
    %220 = vector.extract_strided_slice %195 {offsets = [32, 0], sizes = [16, 128], strides = [1, 1]} : vector<48x128xf32> to vector<16x128xf32>
    %221 = vector.extract_strided_slice %215 {offsets = [32, 0], sizes = [16, 128], strides = [1, 1]} : vector<48x128xf32> to vector<16x128xf32>
    %222 = arith.subf %218, %219 : vector<16x128xf32>
    %223 = arith.subf %220, %221 : vector<16x128xf32>
    %224 = arith.mulf %216, %222 : vector<16x128xf32>
    %225 = arith.truncf %224 : vector<16x128xf32> to vector<16x128xbf16>
    %cst_105 = arith.constant dense<0.000000e+00> : vector<4x128xf32>
    %226 = tpu.matmul %0, %225, %cst_105 {dimension_numbers = #tpu.dot_dimension_numbers<[1], [0], [0], [1], [0, 0, 1, 1], [], []>} : vector<4x16xbf16>, vector<16x128xbf16>, vector<4x128xf32> -> vector<4x128xf32>
    %cst_106 = arith.constant 0.000000e+00 : f32
    %227 = vector.broadcast %cst_106 : f32 to vector<4x128xf32>
    %228 = arith.subf %227, %226 : vector<4x128xf32>
    %229 = math.exp %228 : vector<4x128xf32>
    %cst_107 = arith.constant 1.000000e+00 : f32
    %230 = vector.broadcast %cst_107 : f32 to vector<4x128xf32>
    %231 = arith.addf %230, %229 : vector<4x128xf32>
    %232 = tpu.reciprocal %231 {approx = true} : vector<4x128xf32> -> vector<4x128xf32>
    %233 = arith.truncf %232 : vector<4x128xf32> to vector<4x128xbf16>
    %cst_108 = arith.constant dense<0.000000e+00> : vector<16x128xf32>
    %234 = tpu.matmul %1, %233, %cst_108 {dimension_numbers = #tpu.dot_dimension_numbers<[1], [0], [0], [1], [0, 0, 1, 1], [], []>} : vector<16x4xbf16>, vector<4x128xbf16>, vector<16x128xf32> -> vector<16x128xf32>
    %235 = arith.mulf %234, %223 : vector<16x128xf32>
    %236 = arith.addf %221, %235 : vector<16x128xf32>
    %237 = arith.truncf %236 : vector<16x128xf32> to vector<16x128xbf16>
    %cst_109 = arith.constant dense<0.000000e+00> : vector<16x128xf32>
    %238 = tpu.matmul %165, %237, %cst_109 {dimension_numbers = #tpu.dot_dimension_numbers<[1], [0], [0], [1], [0, 0, 1, 1], [], []>} : vector<16x16xbf16>, vector<16x128xbf16>, vector<16x128xf32> -> vector<16x128xf32>
    %239 = arith.addf %132, %238 : vector<16x128xf32>
    %240 = vector.broadcast %167 : vector<16x1xf32> to vector<16x128xf32>
    %241 = arith.addf %239, %240 : vector<16x128xf32>
    %242 = arith.mulf %217, %222 : vector<16x128xf32>
    %243 = arith.truncf %242 : vector<16x128xf32> to vector<16x128xbf16>
    %cst_110 = arith.constant dense<0.000000e+00> : vector<4x128xf32>
    %244 = tpu.matmul %0, %243, %cst_110 {dimension_numbers = #tpu.dot_dimension_numbers<[1], [0], [0], [1], [0, 0, 1, 1], [], []>} : vector<4x16xbf16>, vector<16x128xbf16>, vector<4x128xf32> -> vector<4x128xf32>
    %cst_111 = arith.constant 0.000000e+00 : f32
    %245 = vector.broadcast %cst_111 : f32 to vector<4x128xf32>
    %246 = arith.subf %245, %244 : vector<4x128xf32>
    %247 = math.exp %246 : vector<4x128xf32>
    %cst_112 = arith.constant 1.000000e+00 : f32
    %248 = vector.broadcast %cst_112 : f32 to vector<4x128xf32>
    %249 = arith.addf %248, %247 : vector<4x128xf32>
    %250 = tpu.reciprocal %249 {approx = true} : vector<4x128xf32> -> vector<4x128xf32>
    %251 = arith.truncf %250 : vector<4x128xf32> to vector<4x128xbf16>
    %cst_113 = arith.constant dense<0.000000e+00> : vector<16x128xf32>
    %252 = tpu.matmul %1, %251, %cst_113 {dimension_numbers = #tpu.dot_dimension_numbers<[1], [0], [0], [1], [0, 0, 1, 1], [], []>} : vector<16x4xbf16>, vector<4x128xbf16>, vector<16x128xf32> -> vector<16x128xf32>
    %253 = arith.mulf %252, %223 : vector<16x128xf32>
    %254 = arith.addf %221, %253 : vector<16x128xf32>
    %255 = arith.truncf %254 : vector<16x128xf32> to vector<16x128xbf16>
    %cst_114 = arith.constant dense<0.000000e+00> : vector<16x128xf32>
    %256 = tpu.matmul %165, %255, %cst_114 {dimension_numbers = #tpu.dot_dimension_numbers<[1], [0], [0], [1], [0, 0, 1, 1], [], []>} : vector<16x16xbf16>, vector<16x128xbf16>, vector<16x128xf32> -> vector<16x128xf32>
    %257 = arith.addf %159, %256 : vector<16x128xf32>
    %258 = vector.broadcast %167 : vector<16x1xf32> to vector<16x128xf32>
    %259 = arith.addf %257, %258 : vector<16x128xf32>
    %cst_115 = arith.constant dense<0.000000e+00> : vector<128xf32>
    %260 = vector.multi_reduction <add>, %241, %cst_115 [0] : vector<16x128xf32> to vector<128xf32>
    %261 = vector.shape_cast %260 : vector<128xf32> to vector<1x128xf32>
    %cst_116 = arith.constant 1.600000e+01 : f32
    %262 = vector.broadcast %cst_116 : f32 to vector<1x128xf32>
    %263 = arith.divf %261, %262 : vector<1x128xf32>
    %264 = vector.broadcast %263 : vector<1x128xf32> to vector<16x128xf32>
    %265 = arith.subf %241, %264 : vector<16x128xf32>
    %266 = arith.mulf %265, %265 : vector<16x128xf32>
    %cst_117 = arith.constant dense<0.000000e+00> : vector<128xf32>
    %267 = vector.multi_reduction <add>, %266, %cst_117 [0] : vector<16x128xf32> to vector<128xf32>
    %268 = vector.shape_cast %267 : vector<128xf32> to vector<1x128xf32>
    %cst_118 = arith.constant 1.600000e+01 : f32
    %269 = vector.broadcast %cst_118 : f32 to vector<1x128xf32>
    %270 = arith.divf %268, %269 : vector<1x128xf32>
    %cst_119 = arith.constant 9.99999974E-6 : f32
    %271 = vector.broadcast %cst_119 : f32 to vector<1x128xf32>
    %272 = arith.addf %270, %271 : vector<1x128xf32>
    %273 = math.rsqrt %272 : vector<1x128xf32>
    %274 = vector.broadcast %273 : vector<1x128xf32> to vector<16x128xf32>
    %275 = arith.mulf %265, %274 : vector<16x128xf32>
    %276 = arith.truncf %275 : vector<16x128xf32> to vector<16x128xbf16>
    %cst_120 = arith.constant dense<0.000000e+00> : vector<128x128xf32>
    %277 = tpu.matmul %169, %276, %cst_120 {dimension_numbers = #tpu.dot_dimension_numbers<[1], [0], [0], [1], [0, 0, 1, 1], [], []>} : vector<128x16xbf16>, vector<16x128xbf16>, vector<128x128xf32> -> vector<128x128xf32>
    %278 = vector.broadcast %171 : vector<128x1xf32> to vector<128x128xf32>
    %279 = arith.addf %277, %278 : vector<128x128xf32>
    %cst_121 = arith.constant 0.000000e+00 : f32
    %280 = vector.broadcast %cst_121 : f32 to vector<128x128xf32>
    %281 = arith.maximumf %279, %280 : vector<128x128xf32>
    %282 = arith.truncf %281 : vector<128x128xf32> to vector<128x128xbf16>
    %cst_122 = arith.constant dense<0.000000e+00> : vector<16x128xf32>
    %283 = tpu.matmul %173, %282, %cst_122 {dimension_numbers = #tpu.dot_dimension_numbers<[1], [0], [0], [1], [0, 0, 1, 1], [], []>} : vector<16x128xbf16>, vector<128x128xbf16>, vector<16x128xf32> -> vector<16x128xf32>
    %284 = arith.addf %241, %283 : vector<16x128xf32>
    %285 = vector.broadcast %175 : vector<16x1xf32> to vector<16x128xf32>
    %286 = arith.addf %284, %285 : vector<16x128xf32>
    %cst_123 = arith.constant dense<0.000000e+00> : vector<128xf32>
    %287 = vector.multi_reduction <add>, %259, %cst_123 [0] : vector<16x128xf32> to vector<128xf32>
    %288 = vector.shape_cast %287 : vector<128xf32> to vector<1x128xf32>
    %cst_124 = arith.constant 1.600000e+01 : f32
    %289 = vector.broadcast %cst_124 : f32 to vector<1x128xf32>
    %290 = arith.divf %288, %289 : vector<1x128xf32>
    %291 = vector.broadcast %290 : vector<1x128xf32> to vector<16x128xf32>
    %292 = arith.subf %259, %291 : vector<16x128xf32>
    %293 = arith.mulf %292, %292 : vector<16x128xf32>
    %cst_125 = arith.constant dense<0.000000e+00> : vector<128xf32>
    %294 = vector.multi_reduction <add>, %293, %cst_125 [0] : vector<16x128xf32> to vector<128xf32>
    %295 = vector.shape_cast %294 : vector<128xf32> to vector<1x128xf32>
    %cst_126 = arith.constant 1.600000e+01 : f32
    %296 = vector.broadcast %cst_126 : f32 to vector<1x128xf32>
    %297 = arith.divf %295, %296 : vector<1x128xf32>
    %cst_127 = arith.constant 9.99999974E-6 : f32
    %298 = vector.broadcast %cst_127 : f32 to vector<1x128xf32>
    %299 = arith.addf %297, %298 : vector<1x128xf32>
    %300 = math.rsqrt %299 : vector<1x128xf32>
    %301 = vector.broadcast %300 : vector<1x128xf32> to vector<16x128xf32>
    %302 = arith.mulf %292, %301 : vector<16x128xf32>
    %303 = arith.truncf %302 : vector<16x128xf32> to vector<16x128xbf16>
    %cst_128 = arith.constant dense<0.000000e+00> : vector<128x128xf32>
    %304 = tpu.matmul %169, %303, %cst_128 {dimension_numbers = #tpu.dot_dimension_numbers<[1], [0], [0], [1], [0, 0, 1, 1], [], []>} : vector<128x16xbf16>, vector<16x128xbf16>, vector<128x128xf32> -> vector<128x128xf32>
    %305 = vector.broadcast %171 : vector<128x1xf32> to vector<128x128xf32>
    %306 = arith.addf %304, %305 : vector<128x128xf32>
    %cst_129 = arith.constant 0.000000e+00 : f32
    %307 = vector.broadcast %cst_129 : f32 to vector<128x128xf32>
    %308 = arith.maximumf %306, %307 : vector<128x128xf32>
    %309 = arith.truncf %308 : vector<128x128xf32> to vector<128x128xbf16>
    %cst_130 = arith.constant dense<0.000000e+00> : vector<16x128xf32>
    %310 = tpu.matmul %173, %309, %cst_130 {dimension_numbers = #tpu.dot_dimension_numbers<[1], [0], [0], [1], [0, 0, 1, 1], [], []>} : vector<16x128xbf16>, vector<128x128xbf16>, vector<16x128xf32> -> vector<16x128xf32>
    %311 = arith.addf %259, %310 : vector<16x128xf32>
    %312 = vector.broadcast %175 : vector<16x1xf32> to vector<16x128xf32>
    %313 = arith.addf %311, %312 : vector<16x128xf32>
    %c2 = arith.constant 2 : index
    %c0_131 = arith.constant 0 : index
    %c0_132 = arith.constant 0 : index
    %314 = vector.load %arg4[%c2, %c0_131, %c0_132] : memref<4x48x16xbf16, #tpu.memory_space<vmem>>, vector<1x48x16xbf16>
    %315 = vector.shape_cast %314 : vector<1x48x16xbf16> to vector<48x16xbf16>
    %c2_133 = arith.constant 2 : index
    %c0_134 = arith.constant 0 : index
    %c0_135 = arith.constant 0 : index
    %316 = vector.load %arg5[%c2_133, %c0_134, %c0_135] : memref<4x48x1xf32, #tpu.memory_space<vmem>>, vector<1x48x1xf32>
    %317 = vector.shape_cast %316 : vector<1x48x1xf32> to vector<48x1xf32>
    %c2_136 = arith.constant 2 : index
    %c0_137 = arith.constant 0 : index
    %c0_138 = arith.constant 0 : index
    %318 = vector.load %arg6[%c2_136, %c0_137, %c0_138] : memref<4x16x16xbf16, #tpu.memory_space<vmem>>, vector<1x16x16xbf16>
    %319 = vector.shape_cast %318 : vector<1x16x16xbf16> to vector<16x16xbf16>
    %c2_139 = arith.constant 2 : index
    %c0_140 = arith.constant 0 : index
    %c0_141 = arith.constant 0 : index
    %320 = vector.load %arg7[%c2_139, %c0_140, %c0_141] : memref<4x16x1xf32, #tpu.memory_space<vmem>>, vector<1x16x1xf32>
    %321 = vector.shape_cast %320 : vector<1x16x1xf32> to vector<16x1xf32>
    %c2_142 = arith.constant 2 : index
    %c0_143 = arith.constant 0 : index
    %c0_144 = arith.constant 0 : index
    %322 = vector.load %arg8[%c2_142, %c0_143, %c0_144] : memref<4x128x16xbf16, #tpu.memory_space<vmem>>, vector<1x128x16xbf16>
    %323 = vector.shape_cast %322 : vector<1x128x16xbf16> to vector<128x16xbf16>
    %c2_145 = arith.constant 2 : index
    %c0_146 = arith.constant 0 : index
    %c0_147 = arith.constant 0 : index
    %324 = vector.load %arg9[%c2_145, %c0_146, %c0_147] : memref<4x128x1xf32, #tpu.memory_space<vmem>>, vector<1x128x1xf32>
    %325 = vector.shape_cast %324 : vector<1x128x1xf32> to vector<128x1xf32>
    %c2_148 = arith.constant 2 : index
    %c0_149 = arith.constant 0 : index
    %c0_150 = arith.constant 0 : index
    %326 = vector.load %arg10[%c2_148, %c0_149, %c0_150] : memref<4x16x128xbf16, #tpu.memory_space<vmem>>, vector<1x16x128xbf16>
    %327 = vector.shape_cast %326 : vector<1x16x128xbf16> to vector<16x128xbf16>
    %c2_151 = arith.constant 2 : index
    %c0_152 = arith.constant 0 : index
    %c0_153 = arith.constant 0 : index
    %328 = vector.load %arg11[%c2_151, %c0_152, %c0_153] : memref<4x16x1xf32, #tpu.memory_space<vmem>>, vector<1x16x1xf32>
    %329 = vector.shape_cast %328 : vector<1x16x1xf32> to vector<16x1xf32>
    %cst_154 = arith.constant dense<0.000000e+00> : vector<128xf32>
    %330 = vector.multi_reduction <add>, %286, %cst_154 [0] : vector<16x128xf32> to vector<128xf32>
    %331 = vector.shape_cast %330 : vector<128xf32> to vector<1x128xf32>
    %cst_155 = arith.constant 1.600000e+01 : f32
    %332 = vector.broadcast %cst_155 : f32 to vector<1x128xf32>
    %333 = arith.divf %331, %332 : vector<1x128xf32>
    %334 = vector.broadcast %333 : vector<1x128xf32> to vector<16x128xf32>
    %335 = arith.subf %286, %334 : vector<16x128xf32>
    %336 = arith.mulf %335, %335 : vector<16x128xf32>
    %cst_156 = arith.constant dense<0.000000e+00> : vector<128xf32>
    %337 = vector.multi_reduction <add>, %336, %cst_156 [0] : vector<16x128xf32> to vector<128xf32>
    %338 = vector.shape_cast %337 : vector<128xf32> to vector<1x128xf32>
    %cst_157 = arith.constant 1.600000e+01 : f32
    %339 = vector.broadcast %cst_157 : f32 to vector<1x128xf32>
    %340 = arith.divf %338, %339 : vector<1x128xf32>
    %cst_158 = arith.constant 9.99999974E-6 : f32
    %341 = vector.broadcast %cst_158 : f32 to vector<1x128xf32>
    %342 = arith.addf %340, %341 : vector<1x128xf32>
    %343 = math.rsqrt %342 : vector<1x128xf32>
    %344 = vector.broadcast %343 : vector<1x128xf32> to vector<16x128xf32>
    %345 = arith.mulf %335, %344 : vector<16x128xf32>
    %346 = arith.truncf %345 : vector<16x128xf32> to vector<16x128xbf16>
    %cst_159 = arith.constant dense<0.000000e+00> : vector<48x128xf32>
    %347 = tpu.matmul %315, %346, %cst_159 {dimension_numbers = #tpu.dot_dimension_numbers<[1], [0], [0], [1], [0, 0, 1, 1], [], []>} : vector<48x16xbf16>, vector<16x128xbf16>, vector<48x128xf32> -> vector<48x128xf32>
    %348 = vector.broadcast %317 : vector<48x1xf32> to vector<48x128xf32>
    %349 = arith.addf %347, %348 : vector<48x128xf32>
    %cst_160 = arith.constant dense<0.000000e+00> : vector<128xf32>
    %350 = vector.multi_reduction <add>, %313, %cst_160 [0] : vector<16x128xf32> to vector<128xf32>
    %351 = vector.shape_cast %350 : vector<128xf32> to vector<1x128xf32>
    %cst_161 = arith.constant 1.600000e+01 : f32
    %352 = vector.broadcast %cst_161 : f32 to vector<1x128xf32>
    %353 = arith.divf %351, %352 : vector<1x128xf32>
    %354 = vector.broadcast %353 : vector<1x128xf32> to vector<16x128xf32>
    %355 = arith.subf %313, %354 : vector<16x128xf32>
    %356 = arith.mulf %355, %355 : vector<16x128xf32>
    %cst_162 = arith.constant dense<0.000000e+00> : vector<128xf32>
    %357 = vector.multi_reduction <add>, %356, %cst_162 [0] : vector<16x128xf32> to vector<128xf32>
    %358 = vector.shape_cast %357 : vector<128xf32> to vector<1x128xf32>
    %cst_163 = arith.constant 1.600000e+01 : f32
    %359 = vector.broadcast %cst_163 : f32 to vector<1x128xf32>
    %360 = arith.divf %358, %359 : vector<1x128xf32>
    %cst_164 = arith.constant 9.99999974E-6 : f32
    %361 = vector.broadcast %cst_164 : f32 to vector<1x128xf32>
    %362 = arith.addf %360, %361 : vector<1x128xf32>
    %363 = math.rsqrt %362 : vector<1x128xf32>
    %364 = vector.broadcast %363 : vector<1x128xf32> to vector<16x128xf32>
    %365 = arith.mulf %355, %364 : vector<16x128xf32>
    %366 = arith.truncf %365 : vector<16x128xf32> to vector<16x128xbf16>
    %cst_165 = arith.constant dense<0.000000e+00> : vector<48x128xf32>
    %367 = tpu.matmul %315, %366, %cst_165 {dimension_numbers = #tpu.dot_dimension_numbers<[1], [0], [0], [1], [0, 0, 1, 1], [], []>} : vector<48x16xbf16>, vector<16x128xbf16>, vector<48x128xf32> -> vector<48x128xf32>
    %368 = vector.broadcast %317 : vector<48x1xf32> to vector<48x128xf32>
    %369 = arith.addf %367, %368 : vector<48x128xf32>
    %370 = vector.extract_strided_slice %349 {offsets = [0, 0], sizes = [16, 128], strides = [1, 1]} : vector<48x128xf32> to vector<16x128xf32>
    %371 = vector.extract_strided_slice %369 {offsets = [0, 0], sizes = [16, 128], strides = [1, 1]} : vector<48x128xf32> to vector<16x128xf32>
    %372 = vector.extract_strided_slice %349 {offsets = [16, 0], sizes = [16, 128], strides = [1, 1]} : vector<48x128xf32> to vector<16x128xf32>
    %373 = vector.extract_strided_slice %369 {offsets = [16, 0], sizes = [16, 128], strides = [1, 1]} : vector<48x128xf32> to vector<16x128xf32>
    %374 = vector.extract_strided_slice %349 {offsets = [32, 0], sizes = [16, 128], strides = [1, 1]} : vector<48x128xf32> to vector<16x128xf32>
    %375 = vector.extract_strided_slice %369 {offsets = [32, 0], sizes = [16, 128], strides = [1, 1]} : vector<48x128xf32> to vector<16x128xf32>
    %376 = arith.subf %372, %373 : vector<16x128xf32>
    %377 = arith.subf %374, %375 : vector<16x128xf32>
    %378 = arith.mulf %370, %376 : vector<16x128xf32>
    %379 = arith.truncf %378 : vector<16x128xf32> to vector<16x128xbf16>
    %cst_166 = arith.constant dense<0.000000e+00> : vector<4x128xf32>
    %380 = tpu.matmul %0, %379, %cst_166 {dimension_numbers = #tpu.dot_dimension_numbers<[1], [0], [0], [1], [0, 0, 1, 1], [], []>} : vector<4x16xbf16>, vector<16x128xbf16>, vector<4x128xf32> -> vector<4x128xf32>
    %cst_167 = arith.constant 0.000000e+00 : f32
    %381 = vector.broadcast %cst_167 : f32 to vector<4x128xf32>
    %382 = arith.subf %381, %380 : vector<4x128xf32>
    %383 = math.exp %382 : vector<4x128xf32>
    %cst_168 = arith.constant 1.000000e+00 : f32
    %384 = vector.broadcast %cst_168 : f32 to vector<4x128xf32>
    %385 = arith.addf %384, %383 : vector<4x128xf32>
    %386 = tpu.reciprocal %385 {approx = true} : vector<4x128xf32> -> vector<4x128xf32>
    %387 = arith.truncf %386 : vector<4x128xf32> to vector<4x128xbf16>
    %cst_169 = arith.constant dense<0.000000e+00> : vector<16x128xf32>
    %388 = tpu.matmul %1, %387, %cst_169 {dimension_numbers = #tpu.dot_dimension_numbers<[1], [0], [0], [1], [0, 0, 1, 1], [], []>} : vector<16x4xbf16>, vector<4x128xbf16>, vector<16x128xf32> -> vector<16x128xf32>
    %389 = arith.mulf %388, %377 : vector<16x128xf32>
    %390 = arith.addf %375, %389 : vector<16x128xf32>
    %391 = arith.truncf %390 : vector<16x128xf32> to vector<16x128xbf16>
    %cst_170 = arith.constant dense<0.000000e+00> : vector<16x128xf32>
    %392 = tpu.matmul %319, %391, %cst_170 {dimension_numbers = #tpu.dot_dimension_numbers<[1], [0], [0], [1], [0, 0, 1, 1], [], []>} : vector<16x16xbf16>, vector<16x128xbf16>, vector<16x128xf32> -> vector<16x128xf32>
    %393 = arith.addf %286, %392 : vector<16x128xf32>
    %394 = vector.broadcast %321 : vector<16x1xf32> to vector<16x128xf32>
    %395 = arith.addf %393, %394 : vector<16x128xf32>
    %396 = arith.mulf %371, %376 : vector<16x128xf32>
    %397 = arith.truncf %396 : vector<16x128xf32> to vector<16x128xbf16>
    %cst_171 = arith.constant dense<0.000000e+00> : vector<4x128xf32>
    %398 = tpu.matmul %0, %397, %cst_171 {dimension_numbers = #tpu.dot_dimension_numbers<[1], [0], [0], [1], [0, 0, 1, 1], [], []>} : vector<4x16xbf16>, vector<16x128xbf16>, vector<4x128xf32> -> vector<4x128xf32>
    %cst_172 = arith.constant 0.000000e+00 : f32
    %399 = vector.broadcast %cst_172 : f32 to vector<4x128xf32>
    %400 = arith.subf %399, %398 : vector<4x128xf32>
    %401 = math.exp %400 : vector<4x128xf32>
    %cst_173 = arith.constant 1.000000e+00 : f32
    %402 = vector.broadcast %cst_173 : f32 to vector<4x128xf32>
    %403 = arith.addf %402, %401 : vector<4x128xf32>
    %404 = tpu.reciprocal %403 {approx = true} : vector<4x128xf32> -> vector<4x128xf32>
    %405 = arith.truncf %404 : vector<4x128xf32> to vector<4x128xbf16>
    %cst_174 = arith.constant dense<0.000000e+00> : vector<16x128xf32>
    %406 = tpu.matmul %1, %405, %cst_174 {dimension_numbers = #tpu.dot_dimension_numbers<[1], [0], [0], [1], [0, 0, 1, 1], [], []>} : vector<16x4xbf16>, vector<4x128xbf16>, vector<16x128xf32> -> vector<16x128xf32>
    %407 = arith.mulf %406, %377 : vector<16x128xf32>
    %408 = arith.addf %375, %407 : vector<16x128xf32>
    %409 = arith.truncf %408 : vector<16x128xf32> to vector<16x128xbf16>
    %cst_175 = arith.constant dense<0.000000e+00> : vector<16x128xf32>
    %410 = tpu.matmul %319, %409, %cst_175 {dimension_numbers = #tpu.dot_dimension_numbers<[1], [0], [0], [1], [0, 0, 1, 1], [], []>} : vector<16x16xbf16>, vector<16x128xbf16>, vector<16x128xf32> -> vector<16x128xf32>
    %411 = arith.addf %313, %410 : vector<16x128xf32>
    %412 = vector.broadcast %321 : vector<16x1xf32> to vector<16x128xf32>
    %413 = arith.addf %411, %412 : vector<16x128xf32>
    %cst_176 = arith.constant dense<0.000000e+00> : vector<128xf32>
    %414 = vector.multi_reduction <add>, %395, %cst_176 [0] : vector<16x128xf32> to vector<128xf32>
    %415 = vector.shape_cast %414 : vector<128xf32> to vector<1x128xf32>
    %cst_177 = arith.constant 1.600000e+01 : f32
    %416 = vector.broadcast %cst_177 : f32 to vector<1x128xf32>
    %417 = arith.divf %415, %416 : vector<1x128xf32>
    %418 = vector.broadcast %417 : vector<1x128xf32> to vector<16x128xf32>
    %419 = arith.subf %395, %418 : vector<16x128xf32>
    %420 = arith.mulf %419, %419 : vector<16x128xf32>
    %cst_178 = arith.constant dense<0.000000e+00> : vector<128xf32>
    %421 = vector.multi_reduction <add>, %420, %cst_178 [0] : vector<16x128xf32> to vector<128xf32>
    %422 = vector.shape_cast %421 : vector<128xf32> to vector<1x128xf32>
    %cst_179 = arith.constant 1.600000e+01 : f32
    %423 = vector.broadcast %cst_179 : f32 to vector<1x128xf32>
    %424 = arith.divf %422, %423 : vector<1x128xf32>
    %cst_180 = arith.constant 9.99999974E-6 : f32
    %425 = vector.broadcast %cst_180 : f32 to vector<1x128xf32>
    %426 = arith.addf %424, %425 : vector<1x128xf32>
    %427 = math.rsqrt %426 : vector<1x128xf32>
    %428 = vector.broadcast %427 : vector<1x128xf32> to vector<16x128xf32>
    %429 = arith.mulf %419, %428 : vector<16x128xf32>
    %430 = arith.truncf %429 : vector<16x128xf32> to vector<16x128xbf16>
    %cst_181 = arith.constant dense<0.000000e+00> : vector<128x128xf32>
    %431 = tpu.matmul %323, %430, %cst_181 {dimension_numbers = #tpu.dot_dimension_numbers<[1], [0], [0], [1], [0, 0, 1, 1], [], []>} : vector<128x16xbf16>, vector<16x128xbf16>, vector<128x128xf32> -> vector<128x128xf32>
    %432 = vector.broadcast %325 : vector<128x1xf32> to vector<128x128xf32>
    %433 = arith.addf %431, %432 : vector<128x128xf32>
    %cst_182 = arith.constant 0.000000e+00 : f32
    %434 = vector.broadcast %cst_182 : f32 to vector<128x128xf32>
    %435 = arith.maximumf %433, %434 : vector<128x128xf32>
    %436 = arith.truncf %435 : vector<128x128xf32> to vector<128x128xbf16>
    %cst_183 = arith.constant dense<0.000000e+00> : vector<16x128xf32>
    %437 = tpu.matmul %327, %436, %cst_183 {dimension_numbers = #tpu.dot_dimension_numbers<[1], [0], [0], [1], [0, 0, 1, 1], [], []>} : vector<16x128xbf16>, vector<128x128xbf16>, vector<16x128xf32> -> vector<16x128xf32>
    %438 = arith.addf %395, %437 : vector<16x128xf32>
    %439 = vector.broadcast %329 : vector<16x1xf32> to vector<16x128xf32>
    %440 = arith.addf %438, %439 : vector<16x128xf32>
    %cst_184 = arith.constant dense<0.000000e+00> : vector<128xf32>
    %441 = vector.multi_reduction <add>, %413, %cst_184 [0] : vector<16x128xf32> to vector<128xf32>
    %442 = vector.shape_cast %441 : vector<128xf32> to vector<1x128xf32>
    %cst_185 = arith.constant 1.600000e+01 : f32
    %443 = vector.broadcast %cst_185 : f32 to vector<1x128xf32>
    %444 = arith.divf %442, %443 : vector<1x128xf32>
    %445 = vector.broadcast %444 : vector<1x128xf32> to vector<16x128xf32>
    %446 = arith.subf %413, %445 : vector<16x128xf32>
    %447 = arith.mulf %446, %446 : vector<16x128xf32>
    %cst_186 = arith.constant dense<0.000000e+00> : vector<128xf32>
    %448 = vector.multi_reduction <add>, %447, %cst_186 [0] : vector<16x128xf32> to vector<128xf32>
    %449 = vector.shape_cast %448 : vector<128xf32> to vector<1x128xf32>
    %cst_187 = arith.constant 1.600000e+01 : f32
    %450 = vector.broadcast %cst_187 : f32 to vector<1x128xf32>
    %451 = arith.divf %449, %450 : vector<1x128xf32>
    %cst_188 = arith.constant 9.99999974E-6 : f32
    %452 = vector.broadcast %cst_188 : f32 to vector<1x128xf32>
    %453 = arith.addf %451, %452 : vector<1x128xf32>
    %454 = math.rsqrt %453 : vector<1x128xf32>
    %455 = vector.broadcast %454 : vector<1x128xf32> to vector<16x128xf32>
    %456 = arith.mulf %446, %455 : vector<16x128xf32>
    %457 = arith.truncf %456 : vector<16x128xf32> to vector<16x128xbf16>
    %cst_189 = arith.constant dense<0.000000e+00> : vector<128x128xf32>
    %458 = tpu.matmul %323, %457, %cst_189 {dimension_numbers = #tpu.dot_dimension_numbers<[1], [0], [0], [1], [0, 0, 1, 1], [], []>} : vector<128x16xbf16>, vector<16x128xbf16>, vector<128x128xf32> -> vector<128x128xf32>
    %459 = vector.broadcast %325 : vector<128x1xf32> to vector<128x128xf32>
    %460 = arith.addf %458, %459 : vector<128x128xf32>
    %cst_190 = arith.constant 0.000000e+00 : f32
    %461 = vector.broadcast %cst_190 : f32 to vector<128x128xf32>
    %462 = arith.maximumf %460, %461 : vector<128x128xf32>
    %463 = arith.truncf %462 : vector<128x128xf32> to vector<128x128xbf16>
    %cst_191 = arith.constant dense<0.000000e+00> : vector<16x128xf32>
    %464 = tpu.matmul %327, %463, %cst_191 {dimension_numbers = #tpu.dot_dimension_numbers<[1], [0], [0], [1], [0, 0, 1, 1], [], []>} : vector<16x128xbf16>, vector<128x128xbf16>, vector<16x128xf32> -> vector<16x128xf32>
    %465 = arith.addf %413, %464 : vector<16x128xf32>
    %466 = vector.broadcast %329 : vector<16x1xf32> to vector<16x128xf32>
    %467 = arith.addf %465, %466 : vector<16x128xf32>
    %c3 = arith.constant 3 : index
    %c0_192 = arith.constant 0 : index
    %c0_193 = arith.constant 0 : index
    %468 = vector.load %arg4[%c3, %c0_192, %c0_193] : memref<4x48x16xbf16, #tpu.memory_space<vmem>>, vector<1x48x16xbf16>
    %469 = vector.shape_cast %468 : vector<1x48x16xbf16> to vector<48x16xbf16>
    %c3_194 = arith.constant 3 : index
    %c0_195 = arith.constant 0 : index
    %c0_196 = arith.constant 0 : index
    %470 = vector.load %arg5[%c3_194, %c0_195, %c0_196] : memref<4x48x1xf32, #tpu.memory_space<vmem>>, vector<1x48x1xf32>
    %471 = vector.shape_cast %470 : vector<1x48x1xf32> to vector<48x1xf32>
    %c3_197 = arith.constant 3 : index
    %c0_198 = arith.constant 0 : index
    %c0_199 = arith.constant 0 : index
    %472 = vector.load %arg6[%c3_197, %c0_198, %c0_199] : memref<4x16x16xbf16, #tpu.memory_space<vmem>>, vector<1x16x16xbf16>
    %473 = vector.shape_cast %472 : vector<1x16x16xbf16> to vector<16x16xbf16>
    %c3_200 = arith.constant 3 : index
    %c0_201 = arith.constant 0 : index
    %c0_202 = arith.constant 0 : index
    %474 = vector.load %arg7[%c3_200, %c0_201, %c0_202] : memref<4x16x1xf32, #tpu.memory_space<vmem>>, vector<1x16x1xf32>
    %475 = vector.shape_cast %474 : vector<1x16x1xf32> to vector<16x1xf32>
    %c3_203 = arith.constant 3 : index
    %c0_204 = arith.constant 0 : index
    %c0_205 = arith.constant 0 : index
    %476 = vector.load %arg8[%c3_203, %c0_204, %c0_205] : memref<4x128x16xbf16, #tpu.memory_space<vmem>>, vector<1x128x16xbf16>
    %477 = vector.shape_cast %476 : vector<1x128x16xbf16> to vector<128x16xbf16>
    %c3_206 = arith.constant 3 : index
    %c0_207 = arith.constant 0 : index
    %c0_208 = arith.constant 0 : index
    %478 = vector.load %arg9[%c3_206, %c0_207, %c0_208] : memref<4x128x1xf32, #tpu.memory_space<vmem>>, vector<1x128x1xf32>
    %479 = vector.shape_cast %478 : vector<1x128x1xf32> to vector<128x1xf32>
    %c3_209 = arith.constant 3 : index
    %c0_210 = arith.constant 0 : index
    %c0_211 = arith.constant 0 : index
    %480 = vector.load %arg10[%c3_209, %c0_210, %c0_211] : memref<4x16x128xbf16, #tpu.memory_space<vmem>>, vector<1x16x128xbf16>
    %481 = vector.shape_cast %480 : vector<1x16x128xbf16> to vector<16x128xbf16>
    %c3_212 = arith.constant 3 : index
    %c0_213 = arith.constant 0 : index
    %c0_214 = arith.constant 0 : index
    %482 = vector.load %arg11[%c3_212, %c0_213, %c0_214] : memref<4x16x1xf32, #tpu.memory_space<vmem>>, vector<1x16x1xf32>
    %483 = vector.shape_cast %482 : vector<1x16x1xf32> to vector<16x1xf32>
    %cst_215 = arith.constant dense<0.000000e+00> : vector<128xf32>
    %484 = vector.multi_reduction <add>, %440, %cst_215 [0] : vector<16x128xf32> to vector<128xf32>
    %485 = vector.shape_cast %484 : vector<128xf32> to vector<1x128xf32>
    %cst_216 = arith.constant 1.600000e+01 : f32
    %486 = vector.broadcast %cst_216 : f32 to vector<1x128xf32>
    %487 = arith.divf %485, %486 : vector<1x128xf32>
    %488 = vector.broadcast %487 : vector<1x128xf32> to vector<16x128xf32>
    %489 = arith.subf %440, %488 : vector<16x128xf32>
    %490 = arith.mulf %489, %489 : vector<16x128xf32>
    %cst_217 = arith.constant dense<0.000000e+00> : vector<128xf32>
    %491 = vector.multi_reduction <add>, %490, %cst_217 [0] : vector<16x128xf32> to vector<128xf32>
    %492 = vector.shape_cast %491 : vector<128xf32> to vector<1x128xf32>
    %cst_218 = arith.constant 1.600000e+01 : f32
    %493 = vector.broadcast %cst_218 : f32 to vector<1x128xf32>
    %494 = arith.divf %492, %493 : vector<1x128xf32>
    %cst_219 = arith.constant 9.99999974E-6 : f32
    %495 = vector.broadcast %cst_219 : f32 to vector<1x128xf32>
    %496 = arith.addf %494, %495 : vector<1x128xf32>
    %497 = math.rsqrt %496 : vector<1x128xf32>
    %498 = vector.broadcast %497 : vector<1x128xf32> to vector<16x128xf32>
    %499 = arith.mulf %489, %498 : vector<16x128xf32>
    %500 = arith.truncf %499 : vector<16x128xf32> to vector<16x128xbf16>
    %cst_220 = arith.constant dense<0.000000e+00> : vector<48x128xf32>
    %501 = tpu.matmul %469, %500, %cst_220 {dimension_numbers = #tpu.dot_dimension_numbers<[1], [0], [0], [1], [0, 0, 1, 1], [], []>} : vector<48x16xbf16>, vector<16x128xbf16>, vector<48x128xf32> -> vector<48x128xf32>
    %502 = vector.broadcast %471 : vector<48x1xf32> to vector<48x128xf32>
    %503 = arith.addf %501, %502 : vector<48x128xf32>
    %cst_221 = arith.constant dense<0.000000e+00> : vector<128xf32>
    %504 = vector.multi_reduction <add>, %467, %cst_221 [0] : vector<16x128xf32> to vector<128xf32>
    %505 = vector.shape_cast %504 : vector<128xf32> to vector<1x128xf32>
    %cst_222 = arith.constant 1.600000e+01 : f32
    %506 = vector.broadcast %cst_222 : f32 to vector<1x128xf32>
    %507 = arith.divf %505, %506 : vector<1x128xf32>
    %508 = vector.broadcast %507 : vector<1x128xf32> to vector<16x128xf32>
    %509 = arith.subf %467, %508 : vector<16x128xf32>
    %510 = arith.mulf %509, %509 : vector<16x128xf32>
    %cst_223 = arith.constant dense<0.000000e+00> : vector<128xf32>
    %511 = vector.multi_reduction <add>, %510, %cst_223 [0] : vector<16x128xf32> to vector<128xf32>
    %512 = vector.shape_cast %511 : vector<128xf32> to vector<1x128xf32>
    %cst_224 = arith.constant 1.600000e+01 : f32
    %513 = vector.broadcast %cst_224 : f32 to vector<1x128xf32>
    %514 = arith.divf %512, %513 : vector<1x128xf32>
    %cst_225 = arith.constant 9.99999974E-6 : f32
    %515 = vector.broadcast %cst_225 : f32 to vector<1x128xf32>
    %516 = arith.addf %514, %515 : vector<1x128xf32>
    %517 = math.rsqrt %516 : vector<1x128xf32>
    %518 = vector.broadcast %517 : vector<1x128xf32> to vector<16x128xf32>
    %519 = arith.mulf %509, %518 : vector<16x128xf32>
    %520 = arith.truncf %519 : vector<16x128xf32> to vector<16x128xbf16>
    %cst_226 = arith.constant dense<0.000000e+00> : vector<48x128xf32>
    %521 = tpu.matmul %469, %520, %cst_226 {dimension_numbers = #tpu.dot_dimension_numbers<[1], [0], [0], [1], [0, 0, 1, 1], [], []>} : vector<48x16xbf16>, vector<16x128xbf16>, vector<48x128xf32> -> vector<48x128xf32>
    %522 = vector.broadcast %471 : vector<48x1xf32> to vector<48x128xf32>
    %523 = arith.addf %521, %522 : vector<48x128xf32>
    %524 = vector.extract_strided_slice %503 {offsets = [0, 0], sizes = [16, 128], strides = [1, 1]} : vector<48x128xf32> to vector<16x128xf32>
    %525 = vector.extract_strided_slice %523 {offsets = [0, 0], sizes = [16, 128], strides = [1, 1]} : vector<48x128xf32> to vector<16x128xf32>
    %526 = vector.extract_strided_slice %503 {offsets = [16, 0], sizes = [16, 128], strides = [1, 1]} : vector<48x128xf32> to vector<16x128xf32>
    %527 = vector.extract_strided_slice %523 {offsets = [16, 0], sizes = [16, 128], strides = [1, 1]} : vector<48x128xf32> to vector<16x128xf32>
    %528 = vector.extract_strided_slice %503 {offsets = [32, 0], sizes = [16, 128], strides = [1, 1]} : vector<48x128xf32> to vector<16x128xf32>
    %529 = vector.extract_strided_slice %523 {offsets = [32, 0], sizes = [16, 128], strides = [1, 1]} : vector<48x128xf32> to vector<16x128xf32>
    %530 = arith.subf %526, %527 : vector<16x128xf32>
    %531 = arith.subf %528, %529 : vector<16x128xf32>
    %532 = arith.mulf %524, %530 : vector<16x128xf32>
    %533 = arith.truncf %532 : vector<16x128xf32> to vector<16x128xbf16>
    %cst_227 = arith.constant dense<0.000000e+00> : vector<4x128xf32>
    %534 = tpu.matmul %0, %533, %cst_227 {dimension_numbers = #tpu.dot_dimension_numbers<[1], [0], [0], [1], [0, 0, 1, 1], [], []>} : vector<4x16xbf16>, vector<16x128xbf16>, vector<4x128xf32> -> vector<4x128xf32>
    %cst_228 = arith.constant 0.000000e+00 : f32
    %535 = vector.broadcast %cst_228 : f32 to vector<4x128xf32>
    %536 = arith.subf %535, %534 : vector<4x128xf32>
    %537 = math.exp %536 : vector<4x128xf32>
    %cst_229 = arith.constant 1.000000e+00 : f32
    %538 = vector.broadcast %cst_229 : f32 to vector<4x128xf32>
    %539 = arith.addf %538, %537 : vector<4x128xf32>
    %540 = tpu.reciprocal %539 {approx = true} : vector<4x128xf32> -> vector<4x128xf32>
    %541 = arith.truncf %540 : vector<4x128xf32> to vector<4x128xbf16>
    %cst_230 = arith.constant dense<0.000000e+00> : vector<16x128xf32>
    %542 = tpu.matmul %1, %541, %cst_230 {dimension_numbers = #tpu.dot_dimension_numbers<[1], [0], [0], [1], [0, 0, 1, 1], [], []>} : vector<16x4xbf16>, vector<4x128xbf16>, vector<16x128xf32> -> vector<16x128xf32>
    %543 = arith.mulf %542, %531 : vector<16x128xf32>
    %544 = arith.addf %529, %543 : vector<16x128xf32>
    %545 = arith.truncf %544 : vector<16x128xf32> to vector<16x128xbf16>
    %cst_231 = arith.constant dense<0.000000e+00> : vector<16x128xf32>
    %546 = tpu.matmul %473, %545, %cst_231 {dimension_numbers = #tpu.dot_dimension_numbers<[1], [0], [0], [1], [0, 0, 1, 1], [], []>} : vector<16x16xbf16>, vector<16x128xbf16>, vector<16x128xf32> -> vector<16x128xf32>
    %547 = arith.addf %440, %546 : vector<16x128xf32>
    %548 = vector.broadcast %475 : vector<16x1xf32> to vector<16x128xf32>
    %549 = arith.addf %547, %548 : vector<16x128xf32>
    %550 = arith.mulf %525, %530 : vector<16x128xf32>
    %551 = arith.truncf %550 : vector<16x128xf32> to vector<16x128xbf16>
    %cst_232 = arith.constant dense<0.000000e+00> : vector<4x128xf32>
    %552 = tpu.matmul %0, %551, %cst_232 {dimension_numbers = #tpu.dot_dimension_numbers<[1], [0], [0], [1], [0, 0, 1, 1], [], []>} : vector<4x16xbf16>, vector<16x128xbf16>, vector<4x128xf32> -> vector<4x128xf32>
    %cst_233 = arith.constant 0.000000e+00 : f32
    %553 = vector.broadcast %cst_233 : f32 to vector<4x128xf32>
    %554 = arith.subf %553, %552 : vector<4x128xf32>
    %555 = math.exp %554 : vector<4x128xf32>
    %cst_234 = arith.constant 1.000000e+00 : f32
    %556 = vector.broadcast %cst_234 : f32 to vector<4x128xf32>
    %557 = arith.addf %556, %555 : vector<4x128xf32>
    %558 = tpu.reciprocal %557 {approx = true} : vector<4x128xf32> -> vector<4x128xf32>
    %559 = arith.truncf %558 : vector<4x128xf32> to vector<4x128xbf16>
    %cst_235 = arith.constant dense<0.000000e+00> : vector<16x128xf32>
    %560 = tpu.matmul %1, %559, %cst_235 {dimension_numbers = #tpu.dot_dimension_numbers<[1], [0], [0], [1], [0, 0, 1, 1], [], []>} : vector<16x4xbf16>, vector<4x128xbf16>, vector<16x128xf32> -> vector<16x128xf32>
    %561 = arith.mulf %560, %531 : vector<16x128xf32>
    %562 = arith.addf %529, %561 : vector<16x128xf32>
    %563 = arith.truncf %562 : vector<16x128xf32> to vector<16x128xbf16>
    %cst_236 = arith.constant dense<0.000000e+00> : vector<16x128xf32>
    %564 = tpu.matmul %473, %563, %cst_236 {dimension_numbers = #tpu.dot_dimension_numbers<[1], [0], [0], [1], [0, 0, 1, 1], [], []>} : vector<16x16xbf16>, vector<16x128xbf16>, vector<16x128xf32> -> vector<16x128xf32>
    %565 = arith.addf %467, %564 : vector<16x128xf32>
    %566 = vector.broadcast %475 : vector<16x1xf32> to vector<16x128xf32>
    %567 = arith.addf %565, %566 : vector<16x128xf32>
    %cst_237 = arith.constant dense<0.000000e+00> : vector<128xf32>
    %568 = vector.multi_reduction <add>, %549, %cst_237 [0] : vector<16x128xf32> to vector<128xf32>
    %569 = vector.shape_cast %568 : vector<128xf32> to vector<1x128xf32>
    %cst_238 = arith.constant 1.600000e+01 : f32
    %570 = vector.broadcast %cst_238 : f32 to vector<1x128xf32>
    %571 = arith.divf %569, %570 : vector<1x128xf32>
    %572 = vector.broadcast %571 : vector<1x128xf32> to vector<16x128xf32>
    %573 = arith.subf %549, %572 : vector<16x128xf32>
    %574 = arith.mulf %573, %573 : vector<16x128xf32>
    %cst_239 = arith.constant dense<0.000000e+00> : vector<128xf32>
    %575 = vector.multi_reduction <add>, %574, %cst_239 [0] : vector<16x128xf32> to vector<128xf32>
    %576 = vector.shape_cast %575 : vector<128xf32> to vector<1x128xf32>
    %cst_240 = arith.constant 1.600000e+01 : f32
    %577 = vector.broadcast %cst_240 : f32 to vector<1x128xf32>
    %578 = arith.divf %576, %577 : vector<1x128xf32>
    %cst_241 = arith.constant 9.99999974E-6 : f32
    %579 = vector.broadcast %cst_241 : f32 to vector<1x128xf32>
    %580 = arith.addf %578, %579 : vector<1x128xf32>
    %581 = math.rsqrt %580 : vector<1x128xf32>
    %582 = vector.broadcast %581 : vector<1x128xf32> to vector<16x128xf32>
    %583 = arith.mulf %573, %582 : vector<16x128xf32>
    %584 = arith.truncf %583 : vector<16x128xf32> to vector<16x128xbf16>
    %cst_242 = arith.constant dense<0.000000e+00> : vector<128x128xf32>
    %585 = tpu.matmul %477, %584, %cst_242 {dimension_numbers = #tpu.dot_dimension_numbers<[1], [0], [0], [1], [0, 0, 1, 1], [], []>} : vector<128x16xbf16>, vector<16x128xbf16>, vector<128x128xf32> -> vector<128x128xf32>
    %586 = vector.broadcast %479 : vector<128x1xf32> to vector<128x128xf32>
    %587 = arith.addf %585, %586 : vector<128x128xf32>
    %cst_243 = arith.constant 0.000000e+00 : f32
    %588 = vector.broadcast %cst_243 : f32 to vector<128x128xf32>
    %589 = arith.maximumf %587, %588 : vector<128x128xf32>
    %590 = arith.truncf %589 : vector<128x128xf32> to vector<128x128xbf16>
    %cst_244 = arith.constant dense<0.000000e+00> : vector<16x128xf32>
    %591 = tpu.matmul %481, %590, %cst_244 {dimension_numbers = #tpu.dot_dimension_numbers<[1], [0], [0], [1], [0, 0, 1, 1], [], []>} : vector<16x128xbf16>, vector<128x128xbf16>, vector<16x128xf32> -> vector<16x128xf32>
    %592 = arith.addf %549, %591 : vector<16x128xf32>
    %593 = vector.broadcast %483 : vector<16x1xf32> to vector<16x128xf32>
    %594 = arith.addf %592, %593 : vector<16x128xf32>
    %cst_245 = arith.constant dense<0.000000e+00> : vector<128xf32>
    %595 = vector.multi_reduction <add>, %567, %cst_245 [0] : vector<16x128xf32> to vector<128xf32>
    %596 = vector.shape_cast %595 : vector<128xf32> to vector<1x128xf32>
    %cst_246 = arith.constant 1.600000e+01 : f32
    %597 = vector.broadcast %cst_246 : f32 to vector<1x128xf32>
    %598 = arith.divf %596, %597 : vector<1x128xf32>
    %599 = vector.broadcast %598 : vector<1x128xf32> to vector<16x128xf32>
    %600 = arith.subf %567, %599 : vector<16x128xf32>
    %601 = arith.mulf %600, %600 : vector<16x128xf32>
    %cst_247 = arith.constant dense<0.000000e+00> : vector<128xf32>
    %602 = vector.multi_reduction <add>, %601, %cst_247 [0] : vector<16x128xf32> to vector<128xf32>
    %603 = vector.shape_cast %602 : vector<128xf32> to vector<1x128xf32>
    %cst_248 = arith.constant 1.600000e+01 : f32
    %604 = vector.broadcast %cst_248 : f32 to vector<1x128xf32>
    %605 = arith.divf %603, %604 : vector<1x128xf32>
    %cst_249 = arith.constant 9.99999974E-6 : f32
    %606 = vector.broadcast %cst_249 : f32 to vector<1x128xf32>
    %607 = arith.addf %605, %606 : vector<1x128xf32>
    %608 = math.rsqrt %607 : vector<1x128xf32>
    %609 = vector.broadcast %608 : vector<1x128xf32> to vector<16x128xf32>
    %610 = arith.mulf %600, %609 : vector<16x128xf32>
    %611 = arith.truncf %610 : vector<16x128xf32> to vector<16x128xbf16>
    %cst_250 = arith.constant dense<0.000000e+00> : vector<128x128xf32>
    %612 = tpu.matmul %477, %611, %cst_250 {dimension_numbers = #tpu.dot_dimension_numbers<[1], [0], [0], [1], [0, 0, 1, 1], [], []>} : vector<128x16xbf16>, vector<16x128xbf16>, vector<128x128xf32> -> vector<128x128xf32>
    %613 = vector.broadcast %479 : vector<128x1xf32> to vector<128x128xf32>
    %614 = arith.addf %612, %613 : vector<128x128xf32>
    %cst_251 = arith.constant 0.000000e+00 : f32
    %615 = vector.broadcast %cst_251 : f32 to vector<128x128xf32>
    %616 = arith.maximumf %614, %615 : vector<128x128xf32>
    %617 = arith.truncf %616 : vector<128x128xf32> to vector<128x128xbf16>
    %cst_252 = arith.constant dense<0.000000e+00> : vector<16x128xf32>
    %618 = tpu.matmul %481, %617, %cst_252 {dimension_numbers = #tpu.dot_dimension_numbers<[1], [0], [0], [1], [0, 0, 1, 1], [], []>} : vector<16x128xbf16>, vector<128x128xbf16>, vector<16x128xf32> -> vector<16x128xf32>
    %619 = arith.addf %567, %618 : vector<16x128xf32>
    %620 = vector.broadcast %483 : vector<16x1xf32> to vector<16x128xf32>
    %621 = arith.addf %619, %620 : vector<16x128xf32>
    %c0_253 = arith.constant 0 : index
    %c0_254 = arith.constant 0 : index
    %c0_255 = arith.constant 0 : index
    %622 = vector.load %arg12[%c0_253, %c0_254, %c0_255] : memref<2x16x128xf32, #tpu.memory_space<vmem>>, vector<1x16x128xf32>
    %623 = vector.shape_cast %622 : vector<1x16x128xf32> to vector<16x128xf32>
    %624 = vector.shape_cast %594 : vector<16x128xf32> to vector<1x16x128xf32>
    tpu.vector_store %arg12[%c0_253, %c0_254, %c0_255], %624 {strides = array<i32>} : memref<2x16x128xf32, #tpu.memory_space<vmem>>, vector<1x16x128xf32>,
    %c1_256 = arith.constant 1 : index
    %c0_257 = arith.constant 0 : index
    %c0_258 = arith.constant 0 : index
    %625 = vector.load %arg12[%c1_256, %c0_257, %c0_258] : memref<2x16x128xf32, #tpu.memory_space<vmem>>, vector<1x16x128xf32>
    %626 = vector.shape_cast %625 : vector<1x16x128xf32> to vector<16x128xf32>
    %627 = vector.shape_cast %621 : vector<16x128xf32> to vector<1x16x128xf32>
    tpu.vector_store %arg12[%c1_256, %c0_257, %c0_258], %627 {strides = array<i32>} : memref<2x16x128xf32, #tpu.memory_space<vmem>>, vector<1x16x128xf32>,
    return
  }
  func.func @transform_0(%arg0: i32) -> (i32, i32, i32) {
    %c0_i32 = arith.constant 0 : i32
    %c0_i32_0 = arith.constant 0 : i32
    %c0_i32_1 = arith.constant 0 : i32
    return %c0_i32, %c0_i32_0, %arg0 : i32, i32, i32
  }
  func.func @transform_1(%arg0: i32) -> (i32, i32) {
    %c0_i32 = arith.constant 0 : i32
    %c0_i32_0 = arith.constant 0 : i32
    %c0_i32_1 = arith.constant 0 : i32
    return %c0_i32, %c0_i32_0 : i32, i32
  }
  func.func @transform_2(%arg0: i32) -> (i32, i32) {
    %c0_i32 = arith.constant 0 : i32
    %c0_i32_0 = arith.constant 0 : i32
    %c0_i32_1 = arith.constant 0 : i32
    return %c0_i32, %c0_i32_0 : i32, i32
  }
  func.func @transform_3(%arg0: i32) -> (i32, i32, i32) {
    %c0_i32 = arith.constant 0 : i32
    %c0_i32_0 = arith.constant 0 : i32
    %c0_i32_1 = arith.constant 0 : i32
    %c0_i32_2 = arith.constant 0 : i32
    return %c0_i32, %c0_i32_0, %c0_i32_1 : i32, i32, i32
  }
  func.func @transform_4(%arg0: i32) -> (i32, i32, i32) {
    %c0_i32 = arith.constant 0 : i32
    %c0_i32_0 = arith.constant 0 : i32
    %c0_i32_1 = arith.constant 0 : i32
    %c0_i32_2 = arith.constant 0 : i32
    return %c0_i32, %c0_i32_0, %c0_i32_1 : i32, i32, i32
  }
  func.func @transform_5(%arg0: i32) -> (i32, i32, i32) {
    %c0_i32 = arith.constant 0 : i32
    %c0_i32_0 = arith.constant 0 : i32
    %c0_i32_1 = arith.constant 0 : i32
    %c0_i32_2 = arith.constant 0 : i32
    return %c0_i32, %c0_i32_0, %c0_i32_1 : i32, i32, i32
  }
  func.func @transform_6(%arg0: i32) -> (i32, i32, i32) {
    %c0_i32 = arith.constant 0 : i32
    %c0_i32_0 = arith.constant 0 : i32
    %c0_i32_1 = arith.constant 0 : i32
    %c0_i32_2 = arith.constant 0 : i32
    return %c0_i32, %c0_i32_0, %c0_i32_1 : i32, i32, i32
  }
  func.func @transform_7(%arg0: i32) -> (i32, i32, i32) {
    %c0_i32 = arith.constant 0 : i32
    %c0_i32_0 = arith.constant 0 : i32
    %c0_i32_1 = arith.constant 0 : i32
    %c0_i32_2 = arith.constant 0 : i32
    return %c0_i32, %c0_i32_0, %c0_i32_1 : i32, i32, i32
  }
  func.func @transform_8(%arg0: i32) -> (i32, i32, i32) {
    %c0_i32 = arith.constant 0 : i32
    %c0_i32_0 = arith.constant 0 : i32
    %c0_i32_1 = arith.constant 0 : i32
    %c0_i32_2 = arith.constant 0 : i32
    return %c0_i32, %c0_i32_0, %c0_i32_1 : i32, i32, i32
  }
  func.func @transform_9(%arg0: i32) -> (i32, i32, i32) {
    %c0_i32 = arith.constant 0 : i32
    %c0_i32_0 = arith.constant 0 : i32
    %c0_i32_1 = arith.constant 0 : i32
    %c0_i32_2 = arith.constant 0 : i32
    return %c0_i32, %c0_i32_0, %c0_i32_1 : i32, i32, i32
  }
  func.func @transform_10(%arg0: i32) -> (i32, i32, i32) {
    %c0_i32 = arith.constant 0 : i32
    %c0_i32_0 = arith.constant 0 : i32
    %c0_i32_1 = arith.constant 0 : i32
    %c0_i32_2 = arith.constant 0 : i32
    return %c0_i32, %c0_i32_0, %c0_i32_1 : i32, i32, i32
  }
  func.func @transform_11(%arg0: i32) -> (i32, i32, i32) {
    %c0_i32 = arith.constant 0 : i32
    %c0_i32_0 = arith.constant 0 : i32
    %c0_i32_1 = arith.constant 0 : i32
    return %c0_i32, %c0_i32_0, %arg0 : i32, i32, i32
  }
}

</mosaic_0001>

<bundles_post_ra>
// kernel: tpu_custom_call.1
= control target key start
LH: loop header
LB: loop body
LE: loop exit
PB: predicated region body
PF: predicated region fallthrough
CT: control target
= control target key end

     0   :  { %s8164_s0 = inlined_call_operand.vmem [shape: f32[2,16,256], index: 0, kind: input, shape index: {}]   ;;  %s8165_s1 = inlined_call_operand.vmem [shape: bf16[4,16], index: 1, kind: input, shape index: {}]   ;;  %s8166_s2 = inlined_call_operand.vmem [shape: bf16[16,4], index: 2, kind: input, shape index: {}]   ;;  %s8167_s3 = inlined_call_operand.vmem [shape: bf16[4,48,16], index: 3, kind: input, shape index: {}]   ;;  %s8168_s4 = inlined_call_operand.vmem [shape: f32[4,48,1], index: 4, kind: input, shape index: {}]   ;;  %s8169_s5 = inlined_call_operand.vmem [shape: bf16[4,16,16], index: 5, kind: input, shape index: {}]   ;;  %s8170_s6 = inlined_call_operand.vmem [shape: f32[4,16,1], index: 6, kind: input, shape index: {}]   ;;  %s8171_s7 = inlined_call_operand.vmem [shape: bf16[4,128,16], index: 7, kind: input, shape index: {}]   ;;  %s8172_s8 = inlined_call_operand.vmem [shape: f32[4,128,1], index: 8, kind: input, shape index: {}]   ;;  %s8173_s9 = inlined_call_operand.vmem [shape: bf16[4,16,128], index: 9, kind: input, shape index: {}]   ;;  %s8174_s10 = inlined_call_operand.vmem [shape: f32[4,16,1], index: 10, kind: input, shape index: {}]   ;;  %s8175_s11 = inlined_call_operand.hbm [shape: f32[2,16,256], index: 11, kind: output, shape index: {}]  }
   0x1   :  { %8178 = sst [smem:[#allocation6_spill]] %s8164_s0 }
   0x2   :  { %16 = vsyncpa [#allocation4], 0 }
   0x3   :  { %18 = vsyncpa [#allocation4 + $0x1], 0  ;;  %s6466_s17 = smov 0   ;;  %s6468_s18 = smov 0  }
   0x4   :  { %s6470_s19 = smov 0   ;;  %s6472_s20 = smov 0  }
   0x5 LB: > { %s8177_s21 = sadd.s32 4294967295, %s6397_s20   ;;  %s5045_s22 = sadd.s32 4294967294, %s6397_s20   ;;  %s6397_s20 = sphi %s6472_s20, %s8187_s20   ;;  %s6393_s19 = sphi %s6470_s19, %s8186_s19   ;;  %s6389_s18 = sphi %s6468_s18, %s8185_s18   ;;  %s6385_s17 = sphi %s6466_s17, %s8184_s17  }
   0x6   : > { %s6489_s23 = sadd.s32 1, %s6397_s20   ;;  %s31_s24 = sadd.s32 1, %s6393_s19 }
   0x7   : > { %s28_s25 = ssub.s32 %s6397_s20, %s6489_s23  ;;  %p38_p0 = scmp.ne.s32.totalorder %s6393_s19, %s6389_s18 }
   0x8   : > { %p29_p1 = scmp.eq.s32.totalorder %s28_s25, 0  ;;  %p39_p2 = scmp.eq.s32.totalorder %s6397_s20, 0 }
   0x9   : > { %p278_p3 = scmp.eq.s32.totalorder %s8177_s21, 1  ;;  %p283_p4 = scmp.ne.s32.totalorder %s6389_s18, %s6385_s17 }
   0xa   : > { %s6502_s26 = scalar_select %p29_p1, %s6393_s19, %s31_s24  }
   0xb   : > { %p40_p5 = por %p39_p2, %p38_p0  ;;  %p6504_p6 = por %p278_p3, %p38_p0 }
   0xc   : > { %p284_p7 = scmp.eq.s32.totalorder %s5045_s22, 1  ;;  %p5047_p9 = scmp.ge.s32.totalorder %s6397_s20, 2 }
   0xe   : > { %p6508_p8 = por %p284_p7, %p283_p4  ;;  %330 = sbr.rel (%p5047_p9) target bundleno = 33 (0x21), region = 56 }
  0x15   : > { %333 = sbr.rel (!%p40_p5) target bundleno = 33 (0x21), region = 60  ;;  %s335_s29 = sand.u32 (%p40_p5), 1, %s6393_s19  }
  0x16   : > { %s5049_s30 = sshll.u32 (%p40_p5), %s6397_s20, 3  ;;  %s5048_s12 = sshll.u32 (%p40_p5), %s335_s29, 5 }
  0x17   : > { %s8181_s0 = sld [smem:[#allocation6_spill]] (%p40_p5)  ;;  %s337_s16 = scalar_lea.vmem (%p40_p5), [#allocation2], %s5048_s12 }
  0x1d   : > { %s339_s15 = scalar_lea.vmem %s8181_s0, %s5049_s30 }
  0x1e   : > { %v373_v0 = vld [vmem:[%s339_s15] sm:$0xff]  ;;  %v375_v1 = vld [vmem:[%s339_s15 + $0x10] sm:$0xff] }
  0x1f   : > { %v377_v2 = vld [vmem:[%s339_s15 + $0x20] sm:$0xff]  ;;  %374 = vst [vmem:[%s337_s16] sm:$0xff] %v373_v0  ;;  %376 = vst [vmem:[%s337_s16 + $0x8] sm:$0xff] %v375_v1  ;;  %v379_v3 = vld [vmem:[%s339_s15 + $0x30] sm:$0xff] }
  0x20   : > { %378 = vst [vmem:[%s337_s16 + $0x10] sm:$0xff] %v377_v2  ;;  %380 = vst [vmem:[%s337_s16 + $0x18] sm:$0xff] %v379_v3 }
  0x21 PF: > { %p5050_p10 = scmp.ge.s32.totalorder %s6397_s20, 1  ;;  %p385_p11 = scmp.lt.s32.totalorder %s6397_s20, 3 }
  0x23   : > { %p386_p12 = pnand %p5050_p10, %p385_p11 }
  0x24   : > { %v448_v4 = vld [vmem:[%s8168_s4 + $0x10] sm:$0xff] (!%p386_p12)  ;;  %v446_v5 = vld [vmem:[%s8168_s4] sm:$0xff] (!%p386_p12)  ;;  %s8176_s30 = sand.u32 (!%p386_p12), 1, %s6389_s18   ;;  %v6399_v6 = vmov (!%p386_p12), 0   ;;  %v449_v7 = vld [vmem:[%s8168_s4 + $0x18] sm:$0xff] (!%p386_p12)  ;;  %v6400_v9 = vmov (!%p386_p12), 0.0  }
  0x25   : > { %389 = sbr.rel (%p386_p12) target bundleno = 7087 (0x1baf), region = 98  ;;  %6212 = vset.pattern.permute.xlu1 (!%p386_p12), %v6399_v6  ;;  %6211 = vset.pattern.permute.xlu0 (!%p386_p12), %v6399_v6  ;;  %v447_v8 = vld [vmem:[%s8168_s4 + $0x8] sm:$0xff] (!%p386_p12)  ;;  %s6539_s16 = sshll.u32 (!%p386_p12), %s8176_s30, 5  ;;  %vm6401_vm0 = vmmov (!%p386_p12), 0   ;;  %v450_v10 = vld [vmem:[%s8168_s4 + $0x20] sm:$0xff] (!%p386_p12)  ;;  %v474_v29 = vld [vmem:[%s8172_s8 + $0x10] sm:$0xff] (!%p386_p12) }
  0x26   : > { %530 = vperm.xlu0 (!%p386_p12), %6211, %v448_v4   ;;  %520 = vperm.xlu1 (!%p386_p12), %6212, %v446_v5   ;;  %v451_v11 = vld [vmem:[%s8168_s4 + $0x28] sm:$0xff] (!%p386_p12)  ;;  %s6552_s12 = scalar_lea.vmem (!%p386_p12), [#allocation2], %s6539_s16  ;;  %v454_v14 = vld [vmem:[%s8170_s6] sm:$0xff] (!%p386_p12)  ;;  %v475_v30 = vld [vmem:[%s8172_s8 + $0x18] sm:$0xff] (!%p386_p12)  ;;  %vm563_vm1 = vcmask (!%p386_p12), 130048   ;;  %vm777_vm2 = vcmask (!%p386_p12), 1041408  }
  0x27   : > { %5606 = vmatprep.subr.bf16.mxu0 (!%p386_p12), %v6400_v9  ;;  %5620 = vmatprep.subr.bf16.mxu1 (!%p386_p12), %v6400_v9  ;;  %v6555_v12 = vld [vmem:[%s6552_s12] sm:$0xff] (!%p386_p12)  ;;  %v6558_v13 = vld [vmem:[%s6552_s12 + $0x8] sm:$0xff] (!%p386_p12)  ;;  %v5053_v16 = vld [vmem:[%s6552_s12 + $0x10] sm:$0xff] (!%p386_p12)  ;;  %vm773_vm3 = vcmask (!%p386_p12), 31744   ;;  %s8077_s25 = scalar_lea.vmem (!%p386_p12), [#allocation3], %s6539_s16  ;;  %s8182_s29 = sadd.s32 (!%p386_p12), 4294967295, %s6397_s20  }
  0x28   : > { %5608 = vmatprep.mubr.msk.bf16.mxu0 (!%p386_p12), %vm6401_vm0, %v6400_v9  ;;  %5622 = vmatprep.mubr.msk.bf16.mxu1 (!%p386_p12), %vm6401_vm0, %v6400_v9  ;;  %v492_v15 = vadd.f32 (!%p386_p12), %v6558_v13, %v6555_v12  ;;  %v5054_v17 = vld [vmem:[%s6552_s12 + $0x18] sm:$0xff] (!%p386_p12)  ;;  %v455_v18 = vld [vmem:[%s8170_s6 + $0x8] sm:$0xff] (!%p386_p12)  ;;  %v472_v23 = vld [vmem:[%s8172_s8] sm:$0xff] (!%p386_p12)  ;;  %s4977_s16 = sshll.u32 (!%p386_p12), %s8077_s25, 4  ;;  %s8183_s15 = sand.u32 (!%p386_p12), 1, %s6389_s18   ;;  %s8108_s16 = int_to_ptr.vmem [resolvable:$true] %s4977_s16 }
  0x29   : > { %v630_v19 = vadd.f32 (!%p386_p12), %v5054_v17, %v5053_v16  ;;  %v473_v24 = vld [vmem:[%s8172_s8 + $0x8] sm:$0xff] (!%p386_p12)  ;;  %v476_v35 = vld [vmem:[%s8172_s8 + $0x20] sm:$0xff] (!%p386_p12)  ;;  %v478_v42 = vld [vmem:[%s8172_s8 + $0x30] sm:$0xff] (!%p386_p12)  ;;  %s8122_s22 = scalar_lea.sflag (!%p386_p12), [#allocation4], %s8183_s15  ;;  %s6335_s24 = scalar_lea.vmem (!%p386_p12), %s8108_s16, 512 }
  0x2a   : > { %535 = vperm.xlu0 (!%p386_p12), %6211, %v449_v7   ;;  %525 = vperm.xlu1 (!%p386_p12), %6212, %v447_v8   ;;  %v493_v20 = vrot.slane (!%p386_p12), %v492_v15, 4  ;;  %v477_v36 = vld [vmem:[%s8172_s8 + $0x28] sm:$0xff] (!%p386_p12)  ;;  %v479_v43 = vld [vmem:[%s8172_s8 + $0x38] sm:$0xff] (!%p386_p12)  ;;  %v480_v50 = vld [vmem:[%s8172_s8 + $0x40] sm:$0xff] (!%p386_p12)  ;;  %p6336_p13 = scmp.ne.s32.totalorder (!%p386_p12), %s8108_s16, %s6335_s24  ;;  %s6402_s0 = smov (!%p386_p12), [#allocation3]  }
  0x2b   : > { %v631_v21 = vrot.slane (!%p386_p12), %v630_v19, 4  ;;  %v481_v51 = vld [vmem:[%s8172_s8 + $0x48] sm:$0xff] (!%p386_p12)  ;;  %v482_v55 = vld [vmem:[%s8172_s8 + $0x50] sm:$0xff] (!%p386_p12)  ;;  %v483_v57 = vld [vmem:[%s8172_s8 + $0x58] sm:$0xff] (!%p386_p12)  ;;  %s6339_s21 = sshll.u32 (!%p386_p12), %s6402_s0, 4  ;;  %s6340_s21 = int_to_ptr.vmem [resolvable:$false] %s6339_s21 }
  0x2c   : > { %v494_v22 = vadd.f32 %v493_v20, %v492_v15  ;;  %v484_v61 = vld [vmem:[%s8172_s8 + $0x60] sm:$0xff]  ;;  %v485_v63 = vld [vmem:[%s8172_s8 + $0x68] sm:$0xff]  ;;  %v486_v3 = vld [vmem:[%s8172_s8 + $0x70] sm:$0xff]  ;;  %p6337_p0 = pnand %p6336_p13, %p6504_p6  ;;  %p6342_p2 = scmp.lt.s32.totalorder %s8108_s16, %s6340_s21 }
  0x2d   : > { %v632_v25 = vadd.f32 %v631_v21, %v630_v19  ;;  %v487_v5 = vld [vmem:[%s8172_s8 + $0x78] sm:$0xff]  ;;  %v5103_v19 = vld [vmem:[%s8168_s4 + $0x30] sm:$0xff] }
  0x2e   : > { %540 = vperm.xlu0 %6211, %v450_v10   ;;  %545 = vperm.xlu1 %6212, %v451_v11   ;;  %v495_v26 = vrot.slane %v494_v22, 2  ;;  %v490_v11 = vld [vmem:[%s8174_s10] sm:$0xff]  ;;  %v5104_v20 = vld [vmem:[%s8168_s4 + $0x38] sm:$0xff]  ;;  %v5107_v21 = vld [vmem:[%s8168_s4 + $0x50] sm:$0xff]  ;;  %p6338_p1 = pneg %p6337_p0 }
  0x2f   : > { %v633_v27 = vrot.slane %v632_v25, 2 }
  0x30   : > { %v496_v28 = vadd.f32 %v495_v26, %v494_v22 }
  0x31   : > { %v634_v31 = vadd.f32 %v633_v27, %v632_v25 }
  0x32   : > { %880 = vperm.xlu0 %6211, %v454_v14   ;;  %885 = vperm.xlu1 %6212, %v455_v18   ;;  %v497_v32 = vrot.slane %v496_v28, 1  ;;  %v491_v14 = vld [vmem:[%s8174_s10 + $0x8] sm:$0xff] }
  0x33   : > { %v635_v33 = vrot.slane %v634_v31, 1  ;;  %v5106_v18 = vld [vmem:[%s8168_s4 + $0x48] sm:$0xff] }
  0x34   : > { %v498_v34 = vadd.f32 %v497_v32, %v496_v28 }
  0x35   : > { %v636_v37 = vadd.f32 %v635_v33, %v634_v31  ;;  %v5111_v31 = vld [vmem:[%s8170_s6 + $0x10] sm:$0xff]  ;;  %v5112_v33 = vld [vmem:[%s8170_s6 + $0x18] sm:$0xff] }
  0x36   : > { %1060 = vperm.xlu0 %6211, %v472_v23   ;;  %1065 = vperm.xlu1 %6212, %v473_v24   ;;  %v500_v38 = vmul.f32 0.0625, %v498_v34  ;;  %v5108_v23 = vld [vmem:[%s8168_s4 + $0x58] sm:$0xff]  ;;  %v5129_v34 = vld [vmem:[%s8172_s8 + $0x80] sm:$0xff] }
  0x37   : > { %v637_v39 = vmul.f32 0.0625, %v636_v37  ;;  %v5131_v37 = vld [vmem:[%s8172_s8 + $0x90] sm:$0xff] }
  0x38   : > { %v6589_v40 = vsub.f32 %v6555_v12, %v500_v38  ;;  %v6592_v41 = vsub.f32 %v6558_v13, %v500_v38  ;;  %v5132_v38 = vld [vmem:[%s8172_s8 + $0x98] sm:$0xff] }
  0x39   : > { %v638_v44 = vsub.f32 %v5053_v16, %v637_v39  ;;  %v639_v45 = vsub.f32 %v5054_v17, %v637_v39  ;;  %v5105_v17 = vld [vmem:[%s8168_s4 + $0x40] sm:$0xff] }
  0x3a   : > { %1070 = vperm.xlu0 %6211, %v474_v29   ;;  %1075 = vperm.xlu1 %6212, %v475_v30   ;;  %v503_v46 = vmul.f32 %v6589_v40, %v6589_v40  ;;  %v504_v47 = vmul.f32 %v6592_v41, %v6592_v41  ;;  %v6213_v29 = vld [vmem:[%s8167_s3] sm:$0xff]  }
  0x3b   : > { %v640_v48 = vmul.f32 %v638_v44, %v638_v44  ;;  %v641_v49 = vmul.f32 %v639_v45, %v639_v45  ;;  %v5133_v39 = vld [vmem:[%s8172_s8 + $0xa0] sm:$0xff] }
  0x3c   : > { %v505_v52 = vadd.f32 %v504_v47, %v503_v46  ;;  %v5139_v46 = vld [vmem:[%s8172_s8 + $0xd0] sm:$0xff]  ;;  %v5140_v47 = vld [vmem:[%s8172_s8 + $0xd8] sm:$0xff] }
  0x3d   : > { %v642_v53 = vadd.f32 %v641_v49, %v640_v48  ;;  %v5141_v48 = vld [vmem:[%s8172_s8 + $0xe0] sm:$0xff]  ;;  %v5142_v49 = vld [vmem:[%s8172_s8 + $0xe8] sm:$0xff] }
  0x3e   : > { %1080 = vperm.xlu0 %6211, %v476_v35   ;;  %1085 = vperm.xlu1 %6212, %v477_v36   ;;  %v506_v54 = vrot.slane %v505_v52, 4  ;;  %v5130_v35 = vld [vmem:[%s8172_s8 + $0x88] sm:$0xff] }
  0x3f   : > { %v643_v56 = vrot.slane %v642_v53, 4  ;;  %v6214_v36 = vld [vmem:[%s8167_s3 + $0x8] sm:$0xff]  }
  0x40   : > { %v507_v58 = vadd.f32 %v506_v54, %v505_v52  ;;  %v5147_v52 = vld [vmem:[%s8174_s10 + $0x10] sm:$0xff] }
  0x41   : > { %v644_v59 = vadd.f32 %v643_v56, %v642_v53  ;;  %v5148_v53 = vld [vmem:[%s8174_s10 + $0x18] sm:$0xff]  ;;  %v5198_v54 = vld [vmem:[%s8168_s4 + $0x70] sm:$0xff]  ;;  %v5196_v56 = vld [vmem:[%s8168_s4 + $0x60] sm:$0xff] }
  0x42   : > { %1090 = vperm.xlu0 %6211, %v478_v42   ;;  %1095 = vperm.xlu1 %6212, %v479_v43   ;;  %v508_v60 = vrot.slane %v507_v58, 2  ;;  %v5135_v42 = vld [vmem:[%s8172_s8 + $0xb0] sm:$0xff]  ;;  %v5136_v43 = vld [vmem:[%s8172_s8 + $0xb8] sm:$0xff] }
  0x43   : > { %v645_v62 = vrot.slane %v644_v59, 2 }
  0x44   : > { %v509_v0 = vadd.f32 %v508_v60, %v507_v58  ;;  %v5200_v58 = vld [vmem:[%s8168_s4 + $0x80] sm:$0xff] }
  0x45   : > { %v646_v1 = vadd.f32 %v645_v62, %v644_v59  ;;  %v5201_v59 = vld [vmem:[%s8168_s4 + $0x88] sm:$0xff]  ;;  %v5204_v60 = vld [vmem:[%s8170_s6 + $0x20] sm:$0xff] }
  0x46   : > { %1100 = vperm.xlu0 %6211, %v480_v50   ;;  %1105 = vperm.xlu1 %6212, %v481_v51   ;;  %v510_v2 = vrot.slane %v509_v0, 1  ;;  %v5143_v50 = vld [vmem:[%s8172_s8 + $0xf0] sm:$0xff]  ;;  %v5144_v51 = vld [vmem:[%s8172_s8 + $0xf8] sm:$0xff]  ;;  %v5222_v62 = vld [vmem:[%s8172_s8 + $0x100] sm:$0xff] }
  0x47   : > { %v647_v4 = vrot.slane %v646_v1, 1 }
  0x48   : > { %v511_v6 = vadd.f32 %v510_v2, %v509_v0  ;;  %v5224_v0 = vld [vmem:[%s8172_s8 + $0x110] sm:$0xff]  ;;  %v5226_v2 = vld [vmem:[%s8172_s8 + $0x120] sm:$0xff] }
  0x49   : > { %v648_v7 = vadd.f32 %v647_v4, %v646_v1  ;;  %v5225_v1 = vld [vmem:[%s8172_s8 + $0x118] sm:$0xff]  ;;  %v5228_v4 = vld [vmem:[%s8172_s8 + $0x130] sm:$0xff] }
  0x4a   : > { %1110 = vperm.xlu0 %6211, %v482_v55   ;;  %1115 = vperm.xlu1 %6212, %v483_v57   ;;  %v512_v8 = vmul.f32 0.0625, %v511_v6  ;;  %v5199_v55 = vld [vmem:[%s8168_s4 + $0x78] sm:$0xff]  ;;  %v5197_v57 = vld [vmem:[%s8168_s4 + $0x68] sm:$0xff]  ;;  %v5230_v6 = vld [vmem:[%s8172_s8 + $0x140] sm:$0xff] }
  0x4b   : > { %v649_v10 = vmul.f32 0.0625, %v648_v7  ;;  %v5231_v7 = vld [vmem:[%s8172_s8 + $0x148] sm:$0xff] }
  0x4c   : > { %v513_v15 = vadd.f32 1e-05, %v512_v8  ;;  %v5232_v8 = vld [vmem:[%s8172_s8 + $0x150] sm:$0xff] }
  0x4d   : > { %v650_v16 = vadd.f32 1e-05, %v649_v10  ;;  %v5233_v10 = vld [vmem:[%s8172_s8 + $0x158] sm:$0xff] }
  0x4e   : > { %1120 = vperm.xlu0 %6211, %v484_v61   ;;  %1125 = vperm.xlu1 %6212, %v485_v63   ;;  %6266 = vrsqrt.f32 %v513_v15  ;;  %v5205_v61 = vld [vmem:[%s8170_s6 + $0x28] sm:$0xff]  ;;  %v5236_v15 = vld [vmem:[%s8172_s8 + $0x170] sm:$0xff] }
  0x4f   : > { %6268 = vrsqrt.f32 %v650_v16  ;;  %v5223_v63 = vld [vmem:[%s8172_s8 + $0x108] sm:$0xff]  ;;  %v5237_v16 = vld [vmem:[%s8172_s8 + $0x178] sm:$0xff] }
  0x52   : > { %1130 = vperm.xlu0 %6211, %v486_v3   ;;  %1135 = vperm.xlu1 %6212, %v487_v5   ;;  %v5227_v3 = vld [vmem:[%s8172_s8 + $0x128] sm:$0xff]  ;;  %v5229_v5 = vld [vmem:[%s8172_s8 + $0x138] sm:$0xff] }
  0x56   : > { %1374 = vperm.xlu0 %6211, %v490_v11   ;;  %1379 = vperm.xlu1 %6212, %v491_v14   ;;  %v5234_v11 = vld [vmem:[%s8172_s8 + $0x160] sm:$0xff]  ;;  %v5235_v14 = vld [vmem:[%s8172_s8 + $0x168] sm:$0xff] }
  0x58   : > { %v6267_v22 = vpop.eup %6266 }
  0x59   : > { %v6269_v24 = vpop.eup %6268  ;;  %v515_v25 = vmul.f32 %v6267_v22, %v6589_v40  ;;  %v516_v26 = vmul.f32 %v6267_v22, %v6592_v41  ;;  %v5134_v40 = vld [vmem:[%s8172_s8 + $0xa8] sm:$0xff]  ;;  %v6215_v41 = vld [vmem:[%s8167_s3 + $0x10] sm:$0xff]   ;;  %v5290_v22 = vld [vmem:[%s8168_s4 + $0x98] sm:$0xff] }
  0x5a   : > { %1672 = vperm.xlu0 %6211, %v5105_v17   ;;  %1677 = vperm.xlu1 %6212, %v5106_v18   ;;  %v652_v27 = vmul.f32 %v6269_v24, %v638_v44  ;;  %v653_v28 = vmul.f32 %v6269_v24, %v639_v45  ;;  %v5137_v44 = vld [vmem:[%s8172_s8 + $0xc0] sm:$0xff]  ;;  %v5138_v45 = vld [vmem:[%s8172_s8 + $0xc8] sm:$0xff]  ;;  %v5294_v24 = vld [vmem:[%s8168_s4 + $0xb8] sm:$0xff] }
  0x5b   : > { %v517_v30 = vpack.c.bf16 %v516_v26, %v515_v25  ;;  %v5240_v17 = vld [vmem:[%s8174_s10 + $0x20] sm:$0xff]  ;;  %v5241_v18 = vld [vmem:[%s8174_s10 + $0x28] sm:$0xff]  ;;  %v5297_v25 = vld [vmem:[%s8170_s6 + $0x30] sm:$0xff] }
  0x5c   : > { %v654_v32 = vpack.c.bf16 %v653_v28, %v652_v27  ;;  %v5298_v26 = vld [vmem:[%s8170_s6 + $0x38] sm:$0xff]  ;;  %v5315_v27 = vld [vmem:[%s8172_s8 + $0x180] sm:$0xff]  ;;  %v5316_v28 = vld [vmem:[%s8172_s8 + $0x188] sm:$0xff] }
  0x5d   : > { %5607 = vmatpush3.bf16.msra.mxu0 %v517_v30  ;;  %v5318_v30 = vld [vmem:[%s8172_s8 + $0x198] sm:$0xff] }
  0x5e   : > { %1662 = vperm.xlu0 %6211, %v5103_v19   ;;  %1667 = vperm.xlu1 %6212, %v5104_v20   ;;  %v5291_v19 = vld [vmem:[%s8168_s4 + $0xa0] sm:$0xff]  ;;  %v5292_v20 = vld [vmem:[%s8168_s4 + $0xa8] sm:$0xff] }
  0x5f   : > { %5621 = vmatpush3.bf16.msra.mxu1 %v654_v32  ;;  %5634 = vmatprep.subr.bf16.mxu0 %v6400_v9  ;;  %v5320_v32 = vld [vmem:[%s8172_s8 + $0x1a8] sm:$0xff] }
  0x60   : > { %5640 = vmatprep.subr.bf16.mxu1 %v6400_v9  ;;  %5609 = vmatmul.mubr.msk.bf16.vlgmr.msra.gmra.mrb[0].mxu0 %vm563_vm1, %v6213_v29 }
  0x61   : > { %5612 = vmatprep.mubr.msk.bf16.mxu0 %vm6401_vm0, %v6400_v9 }
  0x62   : > { %1682 = vperm.xlu0 %6211, %v5107_v21   ;;  %1687 = vperm.xlu1 %6212, %v5108_v23   ;;  %v5289_v21 = vld [vmem:[%s8168_s4 + $0x90] sm:$0xff] }
  0x63   : > { %5623 = vmatmul.mubr.msk.bf16.vlgmr.msra.gmra.mrb[0].mxu1 %vm563_vm1, %v6213_v29  ;;  %v5293_v23 = vld [vmem:[%s8168_s4 + $0xb0] sm:$0xff] }
  0x64   : > { %5626 = vmatprep.mubr.msk.bf16.mxu1 %vm6401_vm0, %v6400_v9  ;;  %v5317_v29 = vld [vmem:[%s8172_s8 + $0x190] sm:$0xff] }
  0x66   : > { %2008 = vperm.xlu0 %6211, %v5111_v31   ;;  %2013 = vperm.xlu1 %6212, %v5112_v33   ;;  %v5319_v31 = vld [vmem:[%s8172_s8 + $0x1a0] sm:$0xff]  ;;  %v5321_v33 = vld [vmem:[%s8172_s8 + $0x1b0] sm:$0xff] }
  0x68   : > { %5613 = vmatmul.mubr.msk.bf16.gmra.mrb[4].mxu0 %vm563_vm1, %v6214_v36 }
  0x69   : > { %5616 = vmatprep.mubr.msk.bf16.mxu0 %vm6401_vm0, %v6400_v9 }
  0x6a   : > { %2188 = vperm.xlu0 %6211, %v5129_v34   ;;  %2193 = vperm.xlu1 %6212, %v5130_v35   ;;  %v5322_v34 = vld [vmem:[%s8172_s8 + $0x1b8] sm:$0xff]  ;;  %v5323_v35 = vld [vmem:[%s8172_s8 + $0x1c0] sm:$0xff] }
  0x6b   : > { %5627 = vmatmul.mubr.msk.bf16.gmra.mrb[4].mxu1 %vm563_vm1, %v6214_v36  ;;  %v5324_v36 = vld [vmem:[%s8172_s8 + $0x1c8] sm:$0xff] }
  0x6c   : > { %5630 = vmatprep.mubr.msk.bf16.mxu1 %vm6401_vm0, %v6400_v9 }
  0x6e   : > { %2198 = vperm.xlu0 %6211, %v5131_v37   ;;  %2203 = vperm.xlu1 %6212, %v5132_v38   ;;  %v5325_v37 = vld [vmem:[%s8172_s8 + $0x1d0] sm:$0xff]  ;;  %v5326_v38 = vld [vmem:[%s8172_s8 + $0x1d8] sm:$0xff] }
  0x70   : > { %5617 = vmatmul.mubr.msk.bf16.gmra.mrb[8].mxu0 %vm563_vm1, %v6215_v41 }
  0x71   : > { %5636 = vmatprep.mubr.msk.bf16.mxu0 %vm6401_vm0, %v6400_v9 }
  0x72   : > { %2208 = vperm.xlu0 %6211, %v5133_v39   ;;  %2213 = vperm.xlu1 %6212, %v5134_v40  }
  0x73   : > { %5631 = vmatmul.mubr.msk.bf16.gmra.mrb[8].mxu1 %vm563_vm1, %v6215_v41  ;;  %v5327_v41 = vld [vmem:[%s8172_s8 + $0x1e0] sm:$0xff] }
  0x74   : > { %5642 = vmatprep.mubr.msk.bf16.mxu1 %vm6401_vm0, %v6400_v9 }
  0x76   : > { %2218 = vperm.xlu0 %6211, %v5135_v42   ;;  %2223 = vperm.xlu1 %6212, %v5136_v43   ;;  %v5328_v42 = vld [vmem:[%s8172_s8 + $0x1e8] sm:$0xff]  ;;  %v5329_v43 = vld [vmem:[%s8172_s8 + $0x1f0] sm:$0xff] }
  0x7a   : > { %2228 = vperm.xlu0 %6211, %v5137_v44   ;;  %2233 = vperm.xlu1 %6212, %v5138_v45   ;;  %v5330_v45 = vld [vmem:[%s8172_s8 + $0x1f8] sm:$0xff] }
  0x7e   : > { %2238 = vperm.xlu0 %6211, %v5139_v46   ;;  %2243 = vperm.xlu1 %6212, %v5140_v47   ;;  %v5333_v47 = vld [vmem:[%s8174_s10 + $0x30] sm:$0xff] }
  0x82   : > { %2248 = vperm.xlu0 %6211, %v5141_v48   ;;  %2253 = vperm.xlu1 %6212, %v5142_v49   ;;  %v5334_v48 = vld [vmem:[%s8174_s10 + $0x38] sm:$0xff] }
  0x86   : > { %2258 = vperm.xlu0 %6211, %v5143_v50   ;;  %2263 = vperm.xlu1 %6212, %v5144_v51  }
  0x8a   : > { %2502 = vperm.xlu0 %6211, %v5147_v52   ;;  %2507 = vperm.xlu1 %6212, %v5148_v53  }
  0x8e   : > { %2800 = vperm.xlu0 %6211, %v5198_v54   ;;  %2805 = vperm.xlu1 %6212, %v5199_v55  }
  0x92   : > { %2790 = vperm.xlu0 %6211, %v5196_v56   ;;  %2795 = vperm.xlu1 %6212, %v5197_v57  }
  0x96   : > { %2810 = vperm.xlu0 %6211, %v5200_v58   ;;  %2815 = vperm.xlu1 %6212, %v5201_v59  }
  0x9a   : > { %3136 = vperm.xlu0 %6211, %v5204_v60   ;;  %3141 = vperm.xlu1 %6212, %v5205_v61  }
  0x9e   : > { %3316 = vperm.xlu0 %6211, %v5222_v62   ;;  %3321 = vperm.xlu1 %6212, %v5223_v63  }
  0xa2   : > { %3326 = vperm.xlu0 %6211, %v5224_v0   ;;  %3331 = vperm.xlu1 %6212, %v5225_v1  }
  0xa5   : > { %v531_v39 = vpop.permute.xlu0 %530  ;;  %v521_v40 = vpop.permute.xlu1 %520 }
  0xa6   : > { %3336 = vperm.xlu0 %6211, %v5226_v2   ;;  %3341 = vperm.xlu1 %6212, %v5227_v3  }
  0xa9   : > { %v536_v44 = vpop.permute.xlu0 %535  ;;  %v526_v46 = vpop.permute.xlu1 %525 }
  0xaa   : > { %3346 = vperm.xlu0 %6211, %v5228_v4   ;;  %3351 = vperm.xlu1 %6212, %v5229_v5  }
  0xad   : > { %v6899_v49 = vpop.permute.xlu0 %540  ;;  %v6901_v50 = vpop.permute.xlu1 %545 }
  0xae   : > { %3356 = vperm.xlu0 %6211, %v5230_v6   ;;  %3361 = vperm.xlu1 %6212, %v5231_v7  }
  0xb2   : > { %3366 = vperm.xlu0 %6211, %v5232_v8   ;;  %3371 = vperm.xlu1 %6212, %v5233_v10  }
  0xb6   : > { %3376 = vperm.xlu0 %6211, %v5234_v11   ;;  %3381 = vperm.xlu1 %6212, %v5235_v14  }
  0xba   : > { %3386 = vperm.xlu0 %6211, %v5236_v15   ;;  %3391 = vperm.xlu1 %6212, %v5237_v16  }
  0xbe   : > { %3630 = vperm.xlu0 %6211, %v5240_v17   ;;  %3635 = vperm.xlu1 %6212, %v5241_v18  }
  0xc2   : > { %3928 = vperm.xlu0 %6211, %v5291_v19   ;;  %3933 = vperm.xlu1 %6212, %v5292_v20  }
  0xc6   : > { %3918 = vperm.xlu0 %6211, %v5289_v21   ;;  %3923 = vperm.xlu1 %6212, %v5290_v22  }
  0xca   : > { %3938 = vperm.xlu0 %6211, %v5293_v23   ;;  %3943 = vperm.xlu1 %6212, %v5294_v24  }
  0xce   : > { %4264 = vperm.xlu0 %6211, %v5297_v25   ;;  %4269 = vperm.xlu1 %6212, %v5298_v26  }
  0xd2   : > { %4444 = vperm.xlu0 %6211, %v5315_v27   ;;  %4449 = vperm.xlu1 %6212, %v5316_v28   ;;  %v6906_v28 = vld [vmem:[%s8165_s1] sm:$0x3] }
  0xd6   : > { %4454 = vperm.xlu0 %6211, %v5317_v29   ;;  %4459 = vperm.xlu1 %6212, %v5318_v30  }
  0xda   : > { %4464 = vperm.xlu0 %6211, %v5319_v31   ;;  %4469 = vperm.xlu1 %6212, %v5320_v32  }
  0xde   : > { %4474 = vperm.xlu0 %6211, %v5321_v33   ;;  %4479 = vperm.xlu1 %6212, %v5322_v34  }
  0xe2   : > { %4484 = vperm.xlu0 %6211, %v5323_v35   ;;  %4489 = vperm.xlu1 %6212, %v5324_v36  }
  0xe6   : > { %4494 = vperm.xlu0 %6211, %v5325_v37   ;;  %4499 = vperm.xlu1 %6212, %v5326_v38  }
  0xea   : > { %4504 = vperm.xlu0 %6211, %v5327_v41   ;;  %4509 = vperm.xlu1 %6212, %v5328_v42   ;;  %v6917_v42 = vld [vmem:[%s8166_s2] sm:$0xff]  }
  0xee   : > { %4514 = vperm.xlu0 %6211, %v5329_v43   ;;  %4519 = vperm.xlu1 %6212, %v5330_v45  }
  0xf2   : > { %4758 = vperm.xlu0 %6211, %v5333_v47   ;;  %4763 = vperm.xlu1 %6212, %v5334_v48  }
 0x133   : > { %v607_v51 = vpop.f32.mrb[0].mxu0 }
 0x134   : > { %v5610_v53 = vpop.f32.mrb[1].mxu0  ;;  %v608_v5 = vadd.f32 %v607_v51, %v521_v40 }
 0x135   : > { %v610_v55 = vpop.f32.mrb[2].mxu0 }
 0x136   : > { %v689_v52 = vpop.f32.mrb[0].mxu1  ;;  %v5611_v57 = vpop.f32.mrb[3].mxu0  ;;  %v611_v11 = vadd.f32 %v610_v55, %v526_v46 }
 0x137   : > { %v5624_v54 = vpop.f32.mrb[1].mxu1  ;;  %v690_v6 = vadd.f32 %v689_v52, %v521_v40 }
 0x138   : > { %v692_v56 = vpop.f32.mrb[2].mxu1 }
 0x139   : > { %v5625_v58 = vpop.f32.mrb[3].mxu1  ;;  %v693_v14 = vadd.f32 %v692_v56, %v526_v46 }
 0x13b   : > { %v615_v59 = vpop.f32.mrb[4].mxu0 }
 0x13c   : > { %v616_v60 = vadd.f32 %v615_v59, %v531_v39  ;;  %v5614_v62 = vpop.f32.mrb[5].mxu0 }
 0x13d   : > { %v618_v1 = vpop.f32.mrb[6].mxu0 }
 0x13e   : > { %v697_v61 = vpop.f32.mrb[4].mxu1  ;;  %v619_v2 = vadd.f32 %v618_v1, %v536_v44  ;;  %v5615_v4 = vpop.f32.mrb[7].mxu0 }
 0x13f   : > { %v698_v63 = vadd.f32 %v697_v61, %v531_v39  ;;  %v5628_v0 = vpop.f32.mrb[5].mxu1 }
 0x140   : > { %v700_v3 = vpop.f32.mrb[6].mxu1 }
 0x141   : > { %v712_v7 = vsub.f32 %v616_v60, %v698_v63  ;;  %v701_v8 = vadd.f32 %v700_v3, %v536_v44  ;;  %v5629_v10 = vpop.f32.mrb[7].mxu1 }
 0x143   : > { %v716_v15 = vmul.f32 %v712_v7, %v608_v5  ;;  %v890_v16 = vmul.f32 %v712_v7, %v690_v6  ;;  %v713_v17 = vsub.f32 %v619_v2, %v701_v8  ;;  %v623_v20 = vpop.f32.mrb[8].mxu0  ;;  %v6954_v6 = vld [vmem:[%s8171_s7] sm:$0xff]  }
 0x144   : > { %v5618_v22 = vpop.f32.mrb[9].mxu0  ;;  %v624_v43 = vadd.f32 %v623_v20, %v6899_v49 }
 0x145   : > { %v717_v18 = vmul.f32 %v713_v17, %v611_v11  ;;  %v891_v19 = vmul.f32 %v713_v17, %v693_v14  ;;  %v626_v26 = vpop.f32.mrb[10].mxu0  ;;  %v6962_v17 = vpop.permute.xlu1 %885 }
 0x146   : > { %v705_v21 = vpop.f32.mrb[8].mxu1  ;;  %v5619_v29 = vpop.f32.mrb[11].mxu0  ;;  %v627_v45 = vadd.f32 %v626_v26, %v6901_v50 }
 0x147   : > { %v718_v23 = vpack.c.bf16 %v717_v18, %v716_v15  ;;  %v892_v24 = vpack.c.bf16 %v891_v19, %v890_v16  ;;  %v5632_v25 = vpop.f32.mrb[9].mxu1  ;;  %v6931_v44 = vadd.f32 %v705_v21, %v6899_v49  ;;  %v6960_v16 = vpop.permute.xlu0 %880 }
 0x148   : > { %v708_v27 = vpop.f32.mrb[10].mxu1 }
 0x149   : > { %5635 = vmatpush3.bf16.msra.mxu0 %v718_v23  ;;  %v5633_v30 = vpop.f32.mrb[11].mxu1  ;;  %v6935_v46 = vadd.f32 %v708_v27, %v6901_v50  ;;  %v714_v47 = vsub.f32 %v624_v43, %v6931_v44  ;;  %v6217_v50 = vld [vmem:[%s8169_s5] sm:$0xff]  }
 0x14a   : > { %5646 = vmatprep.subr.bf16.mxu0 %v6400_v9 }
 0x14b   : > { %v715_v53 = vsub.f32 %v627_v45, %v6935_v46 }
 0x14c   : > { %5637 = vmatmul.mubr.msk.bf16.vlgmr.msra.gmra.mrb[12].mxu0 %vm563_vm1, %v6906_v28 }
 0x14d   : > { %5648 = vmatprep.mubr.msk.bf16.mxu0 %vm6401_vm0, %v6400_v9 }
 0x21f   : > { %v756_v31 = vpop.f32.mrb[12].mxu0 }
 0x220   : > { %v762_v32 = vsub.f32 0.0, %v756_v31  ;;  %v5638_v33 = vpop.f32.mrb[13].mxu0 }
 0x221   : > { %v759_v34 = vpop.f32.mrb[14].mxu0 }
 0x222   : > { %v763_v35 = vmul.f32 1.442695, %v762_v32  ;;  %v5639_v36 = vpop.f32.mrb[15].mxu0 }
 0x224   : > { %6270 = vpow2.f32 %v763_v35 }
 0x22e   : > { %v6271_v37 = vpop.eup %6270 }
 0x22f   : > { %v765_v38 = vadd.f32 1.0, %v6271_v37 }
 0x231   : > { %6272 = vrcp.f32 %v765_v38 }
 0x23b   : > { %v6273_v39 = vpop.eup %6272 }
 0x23c   : > { %v767_v40 = vpack.c.bf16 %v6273_v39, %v6273_v39 }
 0x23e   : > { %v779_v41 = vsel %vm777_vm2, %v767_v40, 0 }
 0x23f   : > { %5641 = vmatpush3.bf16.msra.mxu1 %v779_v41 }
 0x240   : > { %5652 = vmatprep.subr.bf16.mxu1 %v6400_v9 }
 0x242   : > { %5643 = vmatmul.mubr.msk.bf16.vlgmr.msra.gmra.mrb[12].mxu1 %vm773_vm3, %v6917_v42 }
 0x243   : > { %5653 = vmatpush3.bf16.msra.mxu1 %v892_v24  ;;  %5654 = vmatprep.mubr.msk.bf16.mxu1 %vm6401_vm0, %v6400_v9 }
 0x244   : > { %5664 = vmatprep.subr.bf16.mxu1 %v6400_v9 }
 0x24a   : > { %5655 = vmatmul.mubr.msk.bf16.vlgmr.msra.gmra.mrb[16].mxu1 %vm563_vm1, %v6906_v28 }
 0x24b   : > { %5666 = vmatprep.mubr.msk.bf16.mxu1 %vm6401_vm0, %v6400_v9 }
 0x315   : > { %v815_v48 = vpop.f32.mrb[12].mxu1 }
 0x316   : > { %v822_v51 = vmul.f32 %v815_v48, %v714_v47  ;;  %v5644_v52 = vpop.f32.mrb[13].mxu1 }
 0x317   : > { %v818_v54 = vpop.f32.mrb[14].mxu1 }
 0x318   : > { %v823_v55 = vmul.f32 %v818_v54, %v715_v53  ;;  %v5645_v56 = vpop.f32.mrb[15].mxu1  ;;  %v824_v57 = vadd.f32 %v822_v51, %v6931_v44 }
 0x31a   : > { %v825_v49 = vadd.f32 %v823_v55, %v6935_v46 }
 0x31c   : > { %v826_v58 = vpack.c.bf16 %v825_v49, %v824_v57  ;;  %v6988_v57 = vld [vmem:[%s8171_s7 + $0x10] sm:$0xff]   ;;  %v6997_v49 = vld [vmem:[%s8171_s7 + $0x18] sm:$0xff]  }
 0x31d   : > { %v927_v59 = vpop.f32.mrb[16].mxu1 }
 0x31e   : > { %v933_v60 = vsub.f32 0.0, %v927_v59  ;;  %5647 = vmatpush3.bf16.msra.mxu0 %v826_v58  ;;  %v5656_v61 = vpop.f32.mrb[17].mxu1  ;;  %v7002_v58 = vld [vmem:[%s8171_s7 + $0x20] sm:$0xff]   ;;  %v7011_v59 = vld [vmem:[%s8171_s7 + $0x28] sm:$0xff]  }
 0x31f   : > { %v930_v62 = vpop.f32.mrb[18].mxu1  ;;  %5658 = vmatprep.subr.bf16.mxu0 %v6400_v9 }
 0x320   : > { %v934_v63 = vmul.f32 1.442695, %v933_v60  ;;  %v5657_v0 = vpop.f32.mrb[19].mxu1  ;;  %v7025_v60 = vld [vmem:[%s8171_s7 + $0x38] sm:$0xff]   ;;  %v6330_v62 = vld [vmem:[%s6552_s12 + $0x10] sm:$0xff] }
 0x321   : > { %5649 = vmatmul.mubr.msk.bf16.vlgmr.msra.gmra.mrb[16].mxu0 %vm563_vm1, %v6217_v50 }
 0x322   : > { %6274 = vpow2.f32 %v934_v63  ;;  %5660 = vmatprep.mubr.msk.bf16.mxu0 %vm6401_vm0, %v6400_v9 }
 0x32c   : > { %v6275_v1 = vpop.eup %6274 }
 0x32d   : > { %v936_v2 = vadd.f32 1.0, %v6275_v1 }
 0x32f   : > { %6276 = vrcp.f32 %v936_v2  ;;  %v7032_v2 = vpop.permute.xlu0 %1060 }
 0x339   : > { %v6277_v3 = vpop.eup %6276 }
 0x33a   : > { %v938_v4 = vpack.c.bf16 %v6277_v3, %v6277_v3  ;;  %v6331_v3 = vld [vmem:[%s6552_s12 + $0x18] sm:$0xff]  ;;  %s5379_s12 = sshll.u32 %s8182_s29, 7  ;;  %s6341_s29 = scalar_lea.vmem %s6340_s21, 1024 }
 0x33b   : > { %s8115_s14 = scalar_lea.hbm %s8175_s11, %s5379_s12  ;;  %p6343_p3 = scmp.lt.s32.totalorder %s6341_s29, %s6335_s24 }
 0x33c   : > { %v940_v5 = vsel %vm777_vm2, %v938_v4, 0 }
 0x33d   : > { %5659 = vmatpush3.bf16.msra.mxu0 %v940_v5  ;;  %p6344_p4 = por %p6343_p3, %p6342_p2 }
 0x33f   : > { %p6345_p5 = pnand %p6344_p4, %p6338_p1 }
 0x340   : > { %5661 = vmatmul.mubr.msk.bf16.vlgmr.msra.gmra.mrb[20].mxu0 %vm773_vm3, %v6917_v42 }
 0x341   : > { %5672 = vmatprep.mubr.msk.bf16.mxu0 %vm563_vm1, %v6954_v6 }
 0x3f4   : > { %v869_v7 = vpop.f32.mrb[16].mxu0 }
 0x3f5   : > { %v876_v8 = vadd.f32 %v869_v7, %v6555_v12  ;;  %v5650_v10 = vpop.f32.mrb[17].mxu0  ;;  %v7035_v7 = vpop.permute.xlu1 %1065 }
 0x3f6   : > { %v872_v11 = vpop.f32.mrb[18].mxu0 }
 0x3f7   : > { %v877_v14 = vadd.f32 %v872_v11, %v6558_v13  ;;  %v5651_v15 = vpop.f32.mrb[19].mxu0  ;;  %v6965_v18 = vadd.f32 %v6960_v16, %v876_v8  ;;  %v7045_v11 = vpop.permute.xlu0 %1070 }
 0x3f9   : > { %v6968_v19 = vadd.f32 %v6962_v17, %v877_v14  ;;  %v7047_v15 = vpop.permute.xlu1 %1075 }
 0x3fb   : > { %v1033_v20 = vadd.f32 %v6968_v19, %v6965_v18 }
 0x3fd   : > { %v1034_v21 = vrot.slane %v1033_v20, 4 }
 0x3ff   : > { %v1035_v12 = vadd.f32 %v1034_v21, %v1033_v20 }
 0x401   : > { %v1036_v22 = vrot.slane %v1035_v12, 2 }
 0x403   : > { %v1037_v23 = vadd.f32 %v1036_v22, %v1035_v12  ;;  %v7049_v12 = vpop.permute.xlu0 %1080 }
 0x405   : > { %v1038_v24 = vrot.slane %v1037_v23, 1 }
 0x407   : > { %v1039_v13 = vadd.f32 %v1038_v24, %v1037_v23  ;;  %v7051_v23 = vpop.permute.xlu1 %1085 }
 0x409   : > { %v1040_v25 = vmul.f32 0.0625, %v1039_v13  ;;  %v7053_v13 = vpop.permute.xlu0 %1090 }
 0x40b   : > { %v1042_v26 = vsub.f32 %v6968_v19, %v1040_v25  ;;  %v1041_v27 = vsub.f32 %v6965_v18, %v1040_v25 }
 0x40d   : > { %v1044_v29 = vmul.f32 %v1042_v26, %v1042_v26  ;;  %v1043_v30 = vmul.f32 %v1041_v27, %v1041_v27 }
 0x40f   : > { %v1045_v31 = vadd.f32 %v1044_v29, %v1043_v30  ;;  %v7056_v29 = vpop.permute.xlu1 %1095 }
 0x411   : > { %v1046_v32 = vrot.slane %v1045_v31, 4 }
 0x413   : > { %v976_v33 = vpop.f32.mrb[20].mxu0  ;;  %v1047_v34 = vadd.f32 %v1046_v32, %v1045_v31 }
 0x414   : > { %v983_v35 = vmul.f32 %v976_v33, %v714_v47  ;;  %v5662_v36 = vpop.f32.mrb[21].mxu0 }
 0x415   : > { %v979_v37 = vpop.f32.mrb[22].mxu0  ;;  %v1048_v38 = vrot.slane %v1047_v34, 2 }
 0x416   : > { %v984_v39 = vmul.f32 %v979_v37, %v715_v53  ;;  %v5663_v40 = vpop.f32.mrb[23].mxu0  ;;  %v985_v43 = vadd.f32 %v983_v35, %v6931_v44 }
 0x417   : > { %v1049_v41 = vadd.f32 %v1048_v38, %v1047_v34 }
 0x418   : > { %v986_v45 = vadd.f32 %v984_v39, %v6935_v46  ;;  %v6983_v46 = vld [vmem:[%s8171_s7 + $0x8] sm:$0xff]  }
 0x419   : > { %v1050_v48 = vrot.slane %v1049_v41, 1 }
 0x41a   : > { %v987_v51 = vpack.c.bf16 %v986_v45, %v985_v43 }
 0x41b   : > { %v1051_v52 = vadd.f32 %v1050_v48, %v1049_v41  ;;  %v7071_v41 = vpop.permute.xlu0 %1100 }
 0x41c   : > { %5665 = vmatpush3.bf16.msra.mxu1 %v987_v51 }
 0x41d   : > { %v1052_v54 = vmul.f32 0.0625, %v1051_v52  ;;  %5688 = vmatprep.subr.bf16.mxu1 %v6400_v9  ;;  %v7073_v52 = vpop.permute.xlu1 %1105 }
 0x41f   : > { %5667 = vmatmul.mubr.msk.bf16.vlgmr.msra.gmra.mrb[20].mxu1 %vm563_vm1, %v6217_v50  ;;  %v1053_v47 = vadd.f32 1e-05, %v1052_v54  ;;  %v7016_v50 = vld [vmem:[%s8171_s7 + $0x30] sm:$0xff]  }
 0x420   : > { %5704 = vmatprep.mubr.msk.bf16.mxu1 %vm6401_vm0, %v6400_v9 }
 0x421   : > { %6278 = vrsqrt.f32 %v1053_v47 }
 0x42b   : > { %v6279_v53 = vpop.eup %6278 }
 0x42c   : > { %v1055_v55 = vmul.f32 %v6279_v53, %v1041_v27  ;;  %v1056_v56 = vmul.f32 %v6279_v53, %v1042_v26 }
 0x42e   : > { %v1057_v44 = vpack.c.bf16 %v1056_v56, %v1055_v55 }
 0x430   : > { %5670 = vmatprep.subr.bf16.mxu0 %v1057_v44 }
 0x431   : > { %5671 = vmatpush3.bf16.msra.mxu0 %v1057_v44 }
 0x434   : > { %5673 = vmatmul.mubr.msk.bf16.vlgmr.msra.gmra.mrb[24].mxu0 %vm563_vm1, %v6983_v46 }
 0x435   : > { %5676 = vmatprep.mubr.msk.bf16.mxu0 %vm563_vm1, %v6988_v57 }
 0x43c   : > { %5677 = vmatmul.mubr.msk.bf16.gmra.mrb[28].mxu0 %vm563_vm1, %v6997_v49 }
 0x43d   : > { %5680 = vmatprep.mubr.msk.bf16.mxu0 %vm563_vm1, %v7002_v58 }
 0x444   : > { %5681 = vmatmul.mubr.msk.bf16.gmra.mrb[32].mxu0 %vm563_vm1, %v7011_v59 }
 0x445   : > { %5684 = vmatprep.mubr.msk.bf16.mxu0 %vm563_vm1, %v7016_v50 }
 0x44c   : > { %5685 = vmatmul.mubr.msk.bf16.gmra.mrb[36].mxu0 %vm563_vm1, %v7025_v60 }
 0x44d   : > { %5710 = vmatprep.mubr.msk.bf16.mxu0 %vm563_vm1, %v6954_v6 }
 0x4f2   : > { %v1022_v61 = vpop.f32.mrb[20].mxu1 }
 0x4f3   : > { %v1029_v63 = vadd.f32 %v6330_v62, %v1022_v61  ;;  %v5668_v0 = vpop.f32.mrb[21].mxu1 }
 0x4f4   : > { %v1025_v1 = vpop.f32.mrb[22].mxu1 }
 0x4f5   : > { %v1030_v4 = vadd.f32 %v6331_v3, %v1025_v1  ;;  %v5669_v5 = vpop.f32.mrb[23].mxu1  ;;  %v7038_v8 = vadd.f32 %v1029_v63, %v6960_v16  ;;  %v7079_v1 = vpop.permute.xlu0 %1110 }
 0x4f7   : > { %v7041_v10 = vadd.f32 %v1030_v4, %v6962_v17 }
 0x4f9   : > { %v1384_v6 = vadd.f32 %v7041_v10, %v7038_v8 }
 0x4fb   : > { %v1385_v14 = vrot.slane %v1384_v6, 4 }
 0x4fd   : > { %v1386_v20 = vadd.f32 %v1385_v14, %v1384_v6  ;;  %v7082_v14 = vpop.permute.xlu1 %1115 }
 0x4ff   : > { %v1387_v21 = vrot.slane %v1386_v20, 2 }
 0x501   : > { %v1388_v22 = vadd.f32 %v1387_v21, %v1386_v20 }
 0x503   : > { %v1389_v16 = vrot.slane %v1388_v22, 1 }
 0x505   : > { %v1390_v24 = vadd.f32 %v1389_v16, %v1388_v22 }
 0x507   : > { %v1391_v17 = vmul.f32 0.0625, %v1390_v24  ;;  %v5674_v25 = vpop.f32.mrb[24].mxu0 }
 0x508   : > { %v1245_v26 = vadd.f32 %v5674_v25, %v7045_v11  ;;  %v1236_v27 = vpop.f32.mrb[25].mxu0 }
 0x509   : > { %v7059_v30 = vsub.f32 %v7041_v10, %v1391_v17  ;;  %v1237_v31 = vadd.f32 %v1236_v27, %v7032_v2  ;;  %v5675_v32 = vpop.f32.mrb[26].mxu0  ;;  %v7063_v33 = vsub.f32 %v7038_v8, %v1391_v17 }
 0x50a   : > { %v1248_v34 = vadd.f32 %v5675_v32, %v7047_v15  ;;  %v1239_v35 = vpop.f32.mrb[27].mxu0  ;;  %v1301_v39 = vmax.f32 %v1245_v26, 0.0 }
 0x50b   : > { %v1395_v36 = vmul.f32 %v7059_v30, %v7059_v30  ;;  %v1240_v37 = vadd.f32 %v1239_v35, %v7035_v7  ;;  %v1394_v38 = vmul.f32 %v7063_v33, %v7063_v33  ;;  %v1299_v43 = vmax.f32 %v1237_v31, 0.0  ;;  %v7086_v31 = vpop.permute.xlu0 %1120 }
 0x50c   : > { %v1302_v40 = vmax.f32 %v1248_v34, 0.0 }
 0x50d   : > { %v1300_v45 = vmax.f32 %v1240_v37, 0.0  ;;  %v1396_v48 = vadd.f32 %v1395_v36, %v1394_v38  ;;  %v7091_v38 = vpop.permute.xlu1 %1125 }
 0x50e   : > { %v1316_v51 = vpack.c.bf16 %v1302_v40, %v1301_v39 }
 0x50f   : > { %v1315_v54 = vpack.c.bf16 %v1300_v45, %v1299_v43  ;;  %v5678_v47 = vpop.f32.mrb[28].mxu0  ;;  %v1397_v53 = vrot.slane %v1396_v48, 4 }
 0x510   : > { %v1261_v55 = vadd.f32 %v5678_v47, %v7053_v13  ;;  %v1252_v56 = vpop.f32.mrb[29].mxu0 }
 0x511   : > { %v1253_v44 = vadd.f32 %v1252_v56, %v7049_v12  ;;  %v5679_v61 = vpop.f32.mrb[30].mxu0  ;;  %5689 = vmatpush3.bf16.msra.mxu1 %v1315_v54  ;;  %v1398_v62 = vadd.f32 %v1397_v53, %v1396_v48  ;;  %v7095_v53 = vpop.permute.xlu0 %1130 }
 0x512   : > { %v1264_v63 = vadd.f32 %v5679_v61, %v7056_v29  ;;  %v1255_v0 = vpop.f32.mrb[31].mxu0  ;;  %5690 = vmatprep.subr.bf16.mxu1 %v6400_v9  ;;  %v1305_v5 = vmax.f32 %v1261_v55, 0.0 }
 0x513   : > { %v1256_v3 = vadd.f32 %v1255_v0, %v7051_v23  ;;  %v1399_v4 = vrot.slane %v1398_v62, 2  ;;  %v1303_v20 = vmax.f32 %v1253_v44, 0.0 }
 0x514   : > { %v1306_v6 = vmax.f32 %v1264_v63, 0.0 }
 0x515   : > { %v1304_v21 = vmax.f32 %v1256_v3, 0.0  ;;  %5691 = vmatpush3.bf16.msra.mxu1 %v1316_v51  ;;  %v1400_v22 = vadd.f32 %v1399_v4, %v1398_v62  ;;  %v7098_v62 = vpop.permute.xlu1 %1135 }
 0x516   : > { %v1318_v16 = vpack.c.bf16 %v1306_v6, %v1305_v5  ;;  %5692 = vmatprep.subr.bf16.mxu1 %v6400_v9 }
 0x517   : > { %v1317_v24 = vpack.c.bf16 %v1304_v21, %v1303_v20  ;;  %v5682_v17 = vpop.f32.mrb[32].mxu0  ;;  %v1401_v25 = vrot.slane %v1400_v22, 1 }
 0x518   : > { %v1277_v26 = vadd.f32 %v5682_v17, %v7079_v1  ;;  %v1268_v27 = vpop.f32.mrb[33].mxu0 }
 0x519   : > { %v1269_v32 = vadd.f32 %v1268_v27, %v7071_v41  ;;  %v5683_v34 = vpop.f32.mrb[34].mxu0  ;;  %5693 = vmatpush3.bf16.msra.mxu1 %v1317_v24  ;;  %v1402_v35 = vadd.f32 %v1401_v25, %v1400_v22 }
 0x51a   : > { %v1280_v36 = vadd.f32 %v5683_v34, %v7082_v14  ;;  %v1271_v37 = vpop.f32.mrb[35].mxu0  ;;  %5694 = vmatprep.subr.bf16.mxu1 %v6400_v9  ;;  %v1309_v43 = vmax.f32 %v1277_v26, 0.0 }
 0x51b   : > { %v1272_v39 = vadd.f32 %v1271_v37, %v7073_v52  ;;  %v1403_v40 = vmul.f32 0.0625, %v1402_v35  ;;  %v1307_v48 = vmax.f32 %v1269_v32, 0.0  ;;  %v7111_v32 = vld [vmem:[%s8173_s9] sm:$0xff]  }
 0x51c   : > { %v1310_v45 = vmax.f32 %v1280_v36, 0.0  ;;  %v7139_v36 = vpop.permute.xlu1 %1379 }
 0x51d   : > { %v1308_v51 = vmax.f32 %v1272_v39, 0.0  ;;  %5695 = vmatpush3.bf16.msra.mxu1 %v1318_v16  ;;  %v1404_v54 = vadd.f32 1e-05, %v1403_v40 }
 0x51e   : > { %v1320_v47 = vpack.c.bf16 %v1310_v45, %v1309_v43  ;;  %5696 = vmatprep.subr.bf16.mxu1 %v6400_v9 }
 0x51f   : > { %v1319_v55 = vpack.c.bf16 %v1308_v51, %v1307_v48  ;;  %v5686_v56 = vpop.f32.mrb[36].mxu0  ;;  %6280 = vrsqrt.f32 %v1404_v54 }
 0x520   : > { %v1293_v44 = vadd.f32 %v5686_v56, %v7095_v53  ;;  %v1284_v61 = vpop.f32.mrb[37].mxu0 }
 0x521   : > { %v1285_v63 = vadd.f32 %v1284_v61, %v7086_v31  ;;  %v5687_v0 = vpop.f32.mrb[38].mxu0  ;;  %5697 = vmatpush3.bf16.msra.mxu1 %v1319_v55 }
 0x522   : > { %v1296_v3 = vadd.f32 %v5687_v0, %v7098_v62  ;;  %v1287_v4 = vpop.f32.mrb[39].mxu0  ;;  %5698 = vmatprep.subr.bf16.mxu1 %v6400_v9  ;;  %v1313_v6 = vmax.f32 %v1293_v44, 0.0 }
 0x523   : > { %v1288_v5 = vadd.f32 %v1287_v4, %v7091_v38  ;;  %v1311_v21 = vmax.f32 %v1285_v63, 0.0 }
 0x524   : > { %v1314_v20 = vmax.f32 %v1296_v3, 0.0 }
 0x525   : > { %v1312_v22 = vmax.f32 %v1288_v5, 0.0  ;;  %5699 = vmatpush3.bf16.msra.mxu1 %v1320_v47 }
 0x526   : > { %v1322_v16 = vpack.c.bf16 %v1314_v20, %v1313_v6  ;;  %5700 = vmatprep.subr.bf16.mxu1 %v6400_v9 }
 0x527   : > { %v1321_v24 = vpack.c.bf16 %v1312_v22, %v1311_v21 }
 0x529   : > { %v6281_v17 = vpop.eup %6280  ;;  %5701 = vmatpush3.bf16.msra.mxu1 %v1321_v24 }
 0x52a   : > { %5702 = vmatprep.subr.bf16.mxu1 %v6400_v9  ;;  %v1406_v25 = vmul.f32 %v6281_v17, %v7063_v33  ;;  %v1407_v26 = vmul.f32 %v6281_v17, %v7059_v30 }
 0x52c   : > { %v1408_v27 = vpack.c.bf16 %v1407_v26, %v1406_v25 }
 0x52d   : > { %5703 = vmatpush3.bf16.msra.mxu1 %v1322_v16 }
 0x52e   : > { %5708 = vmatprep.subr.bf16.mxu0 %v1408_v27  ;;  %5726 = vmatprep.subr.bf16.mxu1 %v6400_v9 }
 0x52f   : > { %5709 = vmatpush3.bf16.msra.mxu0 %v1408_v27 }
 0x530   : > { %5705 = vmatmul.mubr.bf16.vlgmr.msra.gmra.mrb[24].mxu1 %v7111_v32  ;;  %5746 = vmatprep.subr.bf16.mxu0 %v6400_v9 }
 0x531   : > { %5742 = vmatprep.mubr.msk.bf16.mxu1 %vm6401_vm0, %v6400_v9 }
 0x532   : > { %5711 = vmatmul.mubr.msk.bf16.vlgmr.msra.gmra.mrb[40].mxu0 %vm563_vm1, %v6983_v46 }
 0x533   : > { %5714 = vmatprep.mubr.msk.bf16.mxu0 %vm563_vm1, %v6988_v57  ;;  %v7134_v57 = vpop.permute.xlu0 %1374 }
 0x53a   : > { %5715 = vmatmul.mubr.msk.bf16.gmra.mrb[44].mxu0 %vm563_vm1, %v6997_v49 }
 0x53b   : > { %5718 = vmatprep.mubr.msk.bf16.mxu0 %vm563_vm1, %v7002_v58 }
 0x542   : > { %5719 = vmatmul.mubr.msk.bf16.gmra.mrb[48].mxu0 %vm563_vm1, %v7011_v59 }
 0x543   : > { %5722 = vmatprep.mubr.msk.bf16.mxu0 %vm563_vm1, %v7016_v50 }
 0x54a   : > { %5723 = vmatmul.mubr.msk.bf16.gmra.mrb[52].mxu0 %vm563_vm1, %v7025_v60 }
 0x54b   : > { %5748 = vmatprep.mubr.msk.bf16.mxu0 %vm6401_vm0, %v6400_v9 }
 0x603   : > { %v1363_v46 = vpop.f32.mrb[24].mxu1 }
 0x604   : > { %v1370_v49 = vadd.f32 %v1363_v46, %v6965_v18  ;;  %v5706_v30 = vpop.f32.mrb[25].mxu1 }
 0x605   : > { %v1366_v33 = vpop.f32.mrb[26].mxu1  ;;  %v5712_v58 = vpop.f32.mrb[40].mxu0 }
 0x606   : > { %v1371_v34 = vadd.f32 %v1366_v33, %v6968_v19  ;;  %v1452_v59 = vadd.f32 %v5712_v58, %v7045_v11  ;;  %v1443_v35 = vpop.f32.mrb[41].mxu0  ;;  %v5707_v50 = vpop.f32.mrb[27].mxu1  ;;  %v7143_v39 = vadd.f32 %v7134_v57, %v1370_v49 }
 0x607   : > { %v1444_v60 = vadd.f32 %v1443_v35, %v7032_v2  ;;  %v5713_v37 = vpop.f32.mrb[42].mxu0 }
 0x608   : > { %v7146_v40 = vadd.f32 %v7139_v36, %v1371_v34  ;;  %v1455_v18 = vadd.f32 %v5713_v37, %v7047_v15  ;;  %v1446_v43 = vpop.f32.mrb[43].mxu0  ;;  %v1508_v45 = vmax.f32 %v1452_v59, 0.0 }
 0x609   : > { %v1447_v19 = vadd.f32 %v1446_v43, %v7035_v7  ;;  %v1506_v51 = vmax.f32 %v1444_v60, 0.0 }
 0x60a   : > { %v1635_v11 = vadd.f32 %v7146_v40, %v7143_v39  ;;  %v1509_v48 = vmax.f32 %v1455_v18, 0.0 }
 0x60b   : > { %v1507_v54 = vmax.f32 %v1447_v19, 0.0 }
 0x60c   : > { %v1636_v2 = vrot.slane %v1635_v11, 4  ;;  %v1523_v47 = vpack.c.bf16 %v1509_v48, %v1508_v45 }
 0x60d   : > { %v1522_v55 = vpack.c.bf16 %v1507_v54, %v1506_v51  ;;  %v5716_v56 = vpop.f32.mrb[44].mxu0 }
 0x60e   : > { %v1637_v44 = vadd.f32 %v1636_v2, %v1635_v11  ;;  %v1468_v61 = vadd.f32 %v5716_v56, %v7053_v13  ;;  %v1459_v63 = vpop.f32.mrb[45].mxu0 }
 0x60f   : > { %v1460_v15 = vadd.f32 %v1459_v63, %v7049_v12  ;;  %v5717_v0 = vpop.f32.mrb[46].mxu0  ;;  %5727 = vmatpush3.bf16.msra.mxu1 %v1522_v55 }
 0x610   : > { %v1638_v7 = vrot.slane %v1637_v44, 2  ;;  %v1471_v3 = vadd.f32 %v5717_v0, %v7056_v29  ;;  %v1462_v4 = vpop.f32.mrb[47].mxu0  ;;  %5728 = vmatprep.subr.bf16.mxu1 %v6400_v9  ;;  %v1512_v20 = vmax.f32 %v1468_v61, 0.0 }
 0x611   : > { %v1463_v5 = vadd.f32 %v1462_v4, %v7051_v23  ;;  %v1510_v22 = vmax.f32 %v1460_v15, 0.0 }
 0x612   : > { %v1639_v6 = vadd.f32 %v1638_v7, %v1637_v44  ;;  %v1513_v21 = vmax.f32 %v1471_v3, 0.0 }
 0x613   : > { %v1511_v16 = vmax.f32 %v1463_v5, 0.0  ;;  %5729 = vmatpush3.bf16.msra.mxu1 %v1523_v47 }
 0x614   : > { %v1640_v13 = vrot.slane %v1639_v6, 1  ;;  %v1525_v24 = vpack.c.bf16 %v1513_v21, %v1512_v20  ;;  %5730 = vmatprep.subr.bf16.mxu1 %v6400_v9  ;;  %v6227_v20 = vld [vmem:[%s8167_s3 + $0x18] sm:$0xff]   ;;  %v6229_v21 = vld [vmem:[%s8167_s3 + $0x28] sm:$0xff]  }
 0x615   : > { %v1524_v12 = vpack.c.bf16 %v1511_v16, %v1510_v22  ;;  %v5720_v17 = vpop.f32.mrb[48].mxu0 }
 0x616   : > { %v1641_v25 = vadd.f32 %v1640_v13, %v1639_v6  ;;  %v1484_v29 = vadd.f32 %v5720_v17, %v7079_v1  ;;  %v1475_v26 = vpop.f32.mrb[49].mxu0 }
 0x617   : > { %v1476_v27 = vadd.f32 %v1475_v26, %v7071_v41  ;;  %v5721_v46 = vpop.f32.mrb[50].mxu0  ;;  %5731 = vmatpush3.bf16.msra.mxu1 %v1524_v12 }
 0x618   : > { %v1642_v23 = vmul.f32 0.0625, %v1641_v25  ;;  %v1487_v49 = vadd.f32 %v5721_v46, %v7082_v14  ;;  %v1478_v30 = vpop.f32.mrb[51].mxu0  ;;  %5732 = vmatprep.subr.bf16.mxu1 %v6400_v9  ;;  %v1516_v59 = vmax.f32 %v1484_v29, 0.0 }
 0x619   : > { %v1479_v33 = vadd.f32 %v1478_v30, %v7073_v52  ;;  %v1514_v1 = vmax.f32 %v1476_v27, 0.0 }
 0x61a   : > { %v1643_v58 = vsub.f32 %v7143_v39, %v1642_v23  ;;  %v1644_v34 = vsub.f32 %v7146_v40, %v1642_v23  ;;  %v1517_v35 = vmax.f32 %v1487_v49, 0.0 }
 0x61b   : > { %v1515_v50 = vmax.f32 %v1479_v33, 0.0  ;;  %5733 = vmatpush3.bf16.msra.mxu1 %v1525_v24 }
 0x61c   : > { %v1645_v41 = vmul.f32 %v1643_v58, %v1643_v58  ;;  %v1646_v60 = vmul.f32 %v1644_v34, %v1644_v34  ;;  %v1527_v37 = vpack.c.bf16 %v1517_v35, %v1516_v59  ;;  %5734 = vmatprep.subr.bf16.mxu1 %v6400_v9 }
 0x61d   : > { %v1526_v14 = vpack.c.bf16 %v1515_v50, %v1514_v1  ;;  %v5724_v18 = vpop.f32.mrb[52].mxu0 }
 0x61e   : > { %v1647_v43 = vadd.f32 %v1646_v60, %v1645_v41  ;;  %v1500_v19 = vadd.f32 %v5724_v18, %v7095_v53  ;;  %v1491_v52 = vpop.f32.mrb[53].mxu0 }
 0x61f   : > { %v1492_v11 = vadd.f32 %v1491_v52, %v7086_v31  ;;  %v5725_v45 = vpop.f32.mrb[54].mxu0  ;;  %5735 = vmatpush3.bf16.msra.mxu1 %v1526_v14 }
 0x620   : > { %v1648_v48 = vrot.slane %v1647_v43, 4  ;;  %v1503_v51 = vadd.f32 %v5725_v45, %v7098_v62  ;;  %v1494_v54 = vpop.f32.mrb[55].mxu0  ;;  %5736 = vmatprep.subr.bf16.mxu1 %v6400_v9  ;;  %v1520_v55 = vmax.f32 %v1500_v19, 0.0 }
 0x621   : > { %v1495_v2 = vadd.f32 %v1494_v54, %v7091_v38  ;;  %v1518_v44 = vmax.f32 %v1492_v11, 0.0 }
 0x622   : > { %v1649_v47 = vadd.f32 %v1648_v48, %v1647_v43  ;;  %v1521_v56 = vmax.f32 %v1503_v51, 0.0 }
 0x623   : > { %v1519_v61 = vmax.f32 %v1495_v2, 0.0  ;;  %5737 = vmatpush3.bf16.msra.mxu1 %v1527_v37 }
 0x624   : > { %v1650_v53 = vrot.slane %v1649_v47, 2  ;;  %v1529_v63 = vpack.c.bf16 %v1521_v56, %v1520_v55  ;;  %5738 = vmatprep.subr.bf16.mxu1 %v6400_v9 }
 0x625   : > { %v1528_v31 = vpack.c.bf16 %v1519_v61, %v1518_v44 }
 0x626   : > { %v1651_v15 = vadd.f32 %v1650_v53, %v1649_v47 }
 0x627   : > { %5739 = vmatpush3.bf16.msra.mxu1 %v1528_v31 }
 0x628   : > { %v1652_v0 = vrot.slane %v1651_v15, 1  ;;  %5740 = vmatprep.subr.bf16.mxu1 %v6400_v9 }
 0x62a   : > { %v1653_v62 = vadd.f32 %v1652_v0, %v1651_v15  ;;  %v1673_v0 = vpop.permute.xlu0 %1672 }
 0x62b   : > { %5741 = vmatpush3.bf16.msra.mxu1 %v1529_v63 }
 0x62c   : > { %v1654_v7 = vmul.f32 0.0625, %v1653_v62  ;;  %5760 = vmatprep.subr.bf16.mxu1 %v6400_v9 }
 0x62e   : > { %v1655_v38 = vadd.f32 1e-05, %v1654_v7  ;;  %5743 = vmatmul.mubr.bf16.vlgmr.msra.gmra.mrb[28].mxu1 %v7111_v32  ;;  %v6228_v32 = vld [vmem:[%s8167_s3 + $0x20] sm:$0xff]   ;;  %v1678_v7 = vpop.permute.xlu1 %1677 }
 0x62f   : > { %5762 = vmatprep.mubr.msk.bf16.mxu1 %vm6401_vm0, %v6400_v9 }
 0x630   : > { %6282 = vrsqrt.f32 %v1655_v38 }
 0x63a   : > { %v6283_v3 = vpop.eup %6282 }
 0x63b   : > { %v1658_v4 = vmul.f32 %v6283_v3, %v1644_v34  ;;  %v1657_v5 = vmul.f32 %v6283_v3, %v1643_v58  ;;  %v1663_v3 = vpop.permute.xlu0 %1662 }
 0x63d   : > { %v1659_v6 = vpack.c.bf16 %v1658_v4, %v1657_v5 }
 0x63f   : > { %5747 = vmatpush3.bf16.msra.mxu0 %v1659_v6 }
 0x640   : > { %5774 = vmatprep.subr.bf16.mxu0 %v6400_v9 }
 0x642   : > { %5749 = vmatmul.mubr.msk.bf16.vlgmr.msra.gmra.mrb[56].mxu0 %vm563_vm1, %v6227_v20 }
 0x643   : > { %5752 = vmatprep.mubr.msk.bf16.mxu0 %vm6401_vm0, %v6400_v9 }
 0x64a   : > { %5753 = vmatmul.mubr.msk.bf16.gmra.mrb[60].mxu0 %vm563_vm1, %v6228_v32 }
 0x64b   : > { %5756 = vmatprep.mubr.msk.bf16.mxu0 %vm6401_vm0, %v6400_v9 }
 0x652   : > { %5757 = vmatmul.mubr.msk.bf16.gmra.mrb[64].mxu0 %vm563_vm1, %v6229_v21 }
 0x653   : > { %5776 = vmatprep.mubr.msk.bf16.mxu0 %vm6401_vm0, %v6400_v9 }
 0x701   : > { %v1564_v22 = vpop.f32.mrb[28].mxu1 }
 0x702   : > { %v1571_v16 = vadd.f32 %v1564_v22, %v7038_v8  ;;  %v5744_v13 = vpop.f32.mrb[29].mxu1  ;;  %v1668_v22 = vpop.permute.xlu1 %1667 }
 0x703   : > { %v1567_v24 = vpop.f32.mrb[30].mxu1 }
 0x704   : > { %v1572_v12 = vadd.f32 %v1567_v24, %v7041_v10  ;;  %v5745_v17 = vpop.f32.mrb[31].mxu1  ;;  %v7199_v25 = vadd.f32 %v1571_v16, %v7134_v57 }
 0x706   : > { %v7202_v29 = vadd.f32 %v1572_v12, %v7139_v36 }
 0x708   : > { %v1771_v26 = vadd.f32 %v7202_v29, %v7199_v25 }
 0x70a   : > { %v1772_v27 = vrot.slane %v1771_v26, 4 }
 0x70c   : > { %v1773_v46 = vadd.f32 %v1772_v27, %v1771_v26 }
 0x70e   : > { %v1774_v23 = vrot.slane %v1773_v46, 2 }
 0x710   : > { %v1775_v49 = vadd.f32 %v1774_v23, %v1773_v46 }
 0x712   : > { %v1776_v30 = vrot.slane %v1775_v49, 1 }
 0x714   : > { %v1777_v8 = vadd.f32 %v1776_v30, %v1775_v49 }
 0x715   : > { %v1748_v33 = vpop.f32.mrb[56].mxu0 }
 0x716   : > { %v1778_v58 = vmul.f32 0.0625, %v1777_v8  ;;  %v5750_v34 = vpop.f32.mrb[57].mxu0 }
 0x717   : > { %v1751_v10 = vpop.f32.mrb[58].mxu0 }
 0x718   : > { %v1779_v59 = vsub.f32 %v7199_v25, %v1778_v58  ;;  %v1780_v57 = vsub.f32 %v7202_v29, %v1778_v58  ;;  %v5751_v35 = vpop.f32.mrb[59].mxu0  ;;  %v1752_v17 = vadd.f32 %v1751_v10, %v1668_v22 }
 0x71a   : > { %v1781_v36 = vmul.f32 %v1779_v59, %v1779_v59  ;;  %v1782_v1 = vmul.f32 %v1780_v57, %v1780_v57 }
 0x71c   : > { %v1783_v50 = vadd.f32 %v1782_v1, %v1781_v36 }
 0x71d   : > { %v1756_v41 = vpop.f32.mrb[60].mxu0 }
 0x71e   : > { %v1784_v60 = vrot.slane %v1783_v50, 4  ;;  %v5754_v37 = vpop.f32.mrb[61].mxu0  ;;  %v1757_v4 = vadd.f32 %v1756_v41, %v1673_v0 }
 0x71f   : > { %v1759_v14 = vpop.f32.mrb[62].mxu0 }
 0x720   : > { %v1785_v18 = vadd.f32 %v1784_v60, %v1783_v50  ;;  %v5755_v43 = vpop.f32.mrb[63].mxu0  ;;  %v1760_v16 = vadd.f32 %v1759_v14, %v1678_v7 }
 0x722   : > { %v1786_v19 = vrot.slane %v1785_v18, 2 }
 0x724   : > { %v1787_v52 = vadd.f32 %v1786_v19, %v1785_v18  ;;  %v1683_v19 = vpop.permute.xlu0 %1682 }
 0x725   : > { %v7208_v11 = vpop.f32.mrb[64].mxu0 }
 0x726   : > { %v1788_v45 = vrot.slane %v1787_v52, 1  ;;  %v5758_v48 = vpop.f32.mrb[65].mxu0 }
 0x727   : > { %v7210_v51 = vpop.f32.mrb[66].mxu0  ;;  %v1765_v48 = vadd.f32 %v7208_v11, %v1683_v19 }
 0x728   : > { %v1789_v54 = vadd.f32 %v1788_v45, %v1787_v52  ;;  %v5759_v2 = vpop.f32.mrb[67].mxu0  ;;  %v1688_v45 = vpop.permute.xlu1 %1687 }
 0x72a   : > { %v1790_v47 = vmul.f32 0.0625, %v1789_v54 }
 0x72c   : > { %v1791_v55 = vadd.f32 1e-05, %v1790_v47 }
 0x72e   : > { %6284 = vrsqrt.f32 %v1791_v55 }
 0x738   : > { %v6285_v56 = vpop.eup %6284 }
 0x739   : > { %v1794_v44 = vmul.f32 %v6285_v56, %v1780_v57  ;;  %v1793_v61 = vmul.f32 %v6285_v56, %v1779_v59 }
 0x73b   : > { %v1795_v53 = vpack.c.bf16 %v1794_v44, %v1793_v61 }
 0x73d   : > { %5761 = vmatpush3.bf16.msra.mxu1 %v1795_v53 }
 0x73e   : > { %5780 = vmatprep.subr.bf16.mxu1 %v6400_v9 }
 0x740   : > { %5763 = vmatmul.mubr.msk.bf16.vlgmr.msra.gmra.mrb[32].mxu1 %vm563_vm1, %v6227_v20  ;;  %v1749_v20 = vadd.f32 %v1748_v33, %v1663_v3 }
 0x741   : > { %5766 = vmatprep.mubr.msk.bf16.mxu1 %vm6401_vm0, %v6400_v9 }
 0x748   : > { %5767 = vmatmul.mubr.msk.bf16.gmra.mrb[36].mxu1 %vm563_vm1, %v6228_v32 }
 0x749   : > { %5770 = vmatprep.mubr.msk.bf16.mxu1 %vm6401_vm0, %v6400_v9 }
 0x750   : > { %5771 = vmatmul.mubr.msk.bf16.gmra.mrb[40].mxu1 %vm563_vm1, %v6229_v21 }
 0x751   : > { %5782 = vmatprep.mubr.msk.bf16.mxu1 %vm6401_vm0, %v6400_v9 }
 0x813   : > { %v1830_v63 = vpop.f32.mrb[32].mxu1 }
 0x814   : > { %v5764_v31 = vpop.f32.mrb[33].mxu1  ;;  %v1831_v13 = vadd.f32 %v1830_v63, %v1663_v3 }
 0x815   : > { %v1833_v15 = vpop.f32.mrb[34].mxu1 }
 0x816   : > { %v5765_v62 = vpop.f32.mrb[35].mxu1  ;;  %v1834_v26 = vadd.f32 %v1833_v15, %v1668_v22  ;;  %v7262_v22 = vld [vmem:[%s8166_s2] sm:$0xff]  }
 0x81b   : > { %v1838_v38 = vpop.f32.mrb[36].mxu1 }
 0x81c   : > { %v1839_v5 = vadd.f32 %v1838_v38, %v1673_v0  ;;  %v5768_v6 = vpop.f32.mrb[37].mxu1 }
 0x81d   : > { %v1841_v32 = vpop.f32.mrb[38].mxu1 }
 0x81e   : > { %v1853_v21 = vsub.f32 %v1757_v4, %v1839_v5  ;;  %v1842_v24 = vadd.f32 %v1841_v32, %v1678_v7  ;;  %v5769_v12 = vpop.f32.mrb[39].mxu1 }
 0x820   : > { %v1857_v27 = vmul.f32 %v1853_v21, %v1749_v20  ;;  %v2018_v46 = vmul.f32 %v1853_v21, %v1831_v13  ;;  %v1854_v23 = vsub.f32 %v1760_v16, %v1842_v24  ;;  %v7269_v16 = vld [vmem:[%s8171_s7 + $0x40] sm:$0xff]  }
 0x822   : > { %v1858_v49 = vmul.f32 %v1854_v23, %v1752_v17  ;;  %v2019_v30 = vmul.f32 %v1854_v23, %v1834_v26 }
 0x823   : > { %v1846_v8 = vpop.f32.mrb[40].mxu1 }
 0x824   : > { %v1859_v58 = vpack.c.bf16 %v1858_v49, %v1857_v27  ;;  %v2020_v34 = vpack.c.bf16 %v2019_v30, %v2018_v46  ;;  %v5772_v59 = vpop.f32.mrb[41].mxu1  ;;  %v7238_v52 = vadd.f32 %v1846_v8, %v1683_v19  ;;  %v7275_v27 = vpop.permute.xlu0 %2008 }
 0x825   : > { %v1849_v57 = vpop.f32.mrb[42].mxu1  ;;  %v7277_v46 = vpop.permute.xlu1 %2013 }
 0x826   : > { %5775 = vmatpush3.bf16.msra.mxu0 %v1859_v58  ;;  %v5773_v33 = vpop.f32.mrb[43].mxu1  ;;  %v7241_v54 = vadd.f32 %v1849_v57, %v1688_v45  ;;  %v1855_v2 = vsub.f32 %v1765_v48, %v7238_v52 }
 0x827   : > { %5786 = vmatprep.subr.bf16.mxu0 %v6400_v9 }
 0x829   : > { %5777 = vmatmul.mubr.msk.bf16.vlgmr.msra.gmra.mrb[68].mxu0 %vm563_vm1, %v6906_v28 }
 0x82a   : > { %5788 = vmatprep.mubr.msk.bf16.mxu0 %vm6401_vm0, %v6400_v9 }
 0x8fc   : > { %v1894_v10 = vpop.f32.mrb[68].mxu0 }
 0x8fd   : > { %v1900_v35 = vsub.f32 0.0, %v1894_v10  ;;  %v5778_v36 = vpop.f32.mrb[69].mxu0 }
 0x8fe   : > { %v1897_v1 = vpop.f32.mrb[70].mxu0 }
 0x8ff   : > { %v1901_v50 = vmul.f32 1.442695, %v1900_v35  ;;  %v5779_v41 = vpop.f32.mrb[71].mxu0 }
 0x901   : > { %6286 = vpow2.f32 %v1901_v50 }
 0x90b   : > { %v6287_v60 = vpop.eup %6286 }
 0x90c   : > { %v1903_v37 = vadd.f32 1.0, %v6287_v60 }
 0x90e   : > { %6288 = vrcp.f32 %v1903_v37 }
 0x918   : > { %v6289_v14 = vpop.eup %6288 }
 0x919   : > { %v1905_v18 = vpack.c.bf16 %v6289_v14, %v6289_v14 }
 0x91b   : > { %v1907_v43 = vsel %vm777_vm2, %v1905_v18, 0 }
 0x91c   : > { %5781 = vmatpush3.bf16.msra.mxu1 %v1907_v43 }
 0x91d   : > { %5792 = vmatprep.subr.bf16.mxu1 %v6400_v9 }
 0x91f   : > { %5783 = vmatmul.mubr.msk.bf16.vlgmr.msra.gmra.mrb[44].mxu1 %vm773_vm3, %v6917_v42  ;;  %v1768_v42 = vadd.f32 %v7210_v51, %v1688_v45  ;;  %v7251_v51 = vld [vmem:[%s8169_s5 + $0x8] sm:$0xff]  }
 0x920   : > { %5793 = vmatpush3.bf16.msra.mxu1 %v2020_v34  ;;  %5794 = vmatprep.mubr.msk.bf16.mxu1 %vm6401_vm0, %v6400_v9 }
 0x921   : > { %5804 = vmatprep.subr.bf16.mxu1 %v6400_v9 }
 0x927   : > { %5795 = vmatmul.mubr.msk.bf16.vlgmr.msra.gmra.mrb[48].mxu1 %vm563_vm1, %v6906_v28  ;;  %v1856_v28 = vsub.f32 %v1768_v42, %v7241_v54 }
 0x928   : > { %5806 = vmatprep.mubr.msk.bf16.mxu1 %vm6401_vm0, %v6400_v9 }
 0x9f2   : > { %v1943_v47 = vpop.f32.mrb[44].mxu1 }
 0x9f3   : > { %v1950_v55 = vmul.f32 %v1943_v47, %v1855_v2  ;;  %v5784_v56 = vpop.f32.mrb[45].mxu1 }
 0x9f4   : > { %v1946_v44 = vpop.f32.mrb[46].mxu1 }
 0x9f5   : > { %v1951_v61 = vmul.f32 %v1946_v44, %v1856_v28  ;;  %v5785_v53 = vpop.f32.mrb[47].mxu1  ;;  %v1952_v63 = vadd.f32 %v1950_v55, %v7238_v52 }
 0x9f7   : > { %v1953_v31 = vadd.f32 %v1951_v61, %v7241_v54 }
 0x9f9   : > { %v1954_v15 = vpack.c.bf16 %v1953_v31, %v1952_v63  ;;  %v7304_v31 = vld [vmem:[%s8171_s7 + $0x50] sm:$0xff]  }
 0x9fa   : > { %v2055_v11 = vpop.f32.mrb[48].mxu1 }
 0x9fb   : > { %v2061_v0 = vsub.f32 0.0, %v2055_v11  ;;  %5787 = vmatpush3.bf16.msra.mxu0 %v1954_v15  ;;  %v5796_v62 = vpop.f32.mrb[49].mxu1  ;;  %v7313_v15 = vld [vmem:[%s8171_s7 + $0x58] sm:$0xff]   ;;  %v7318_v11 = vld [vmem:[%s8171_s7 + $0x60] sm:$0xff]  }
 0x9fc   : > { %v2058_v7 = vpop.f32.mrb[50].mxu1  ;;  %5798 = vmatprep.subr.bf16.mxu0 %v6400_v9  ;;  %v7341_v62 = vld [vmem:[%s8171_s7 + $0x78] sm:$0xff]  }
 0x9fd   : > { %v2062_v38 = vmul.f32 1.442695, %v2061_v0  ;;  %v5797_v3 = vpop.f32.mrb[51].mxu1  ;;  %v7332_v0 = vld [vmem:[%s8171_s7 + $0x70] sm:$0xff]  }
 0x9fe   : > { %5789 = vmatmul.mubr.msk.bf16.vlgmr.msra.gmra.mrb[72].mxu0 %vm563_vm1, %v7251_v51 }
 0x9ff   : > { %6290 = vpow2.f32 %v2062_v38  ;;  %5800 = vmatprep.mubr.msk.bf16.mxu0 %vm6401_vm0, %v6400_v9 }
 0xa09   : > { %v6291_v4 = vpop.eup %6290 }
 0xa0a   : > { %v2064_v5 = vadd.f32 1.0, %v6291_v4 }
 0xa0c   : > { %6292 = vrcp.f32 %v2064_v5  ;;  %v7348_v5 = vpop.permute.xlu0 %2188 }
 0xa16   : > { %v6293_v6 = vpop.eup %6292 }
 0xa17   : > { %v2066_v20 = vpack.c.bf16 %v6293_v6, %v6293_v6 }
 0xa19   : > { %v2068_v32 = vsel %vm777_vm2, %v2066_v20, 0 }
 0xa1a   : > { %5799 = vmatpush3.bf16.msra.mxu0 %v2068_v32  ;;  %v7351_v32 = vpop.permute.xlu1 %2193 }
 0xa1d   : > { %5801 = vmatmul.mubr.msk.bf16.vlgmr.msra.gmra.mrb[76].mxu0 %vm773_vm3, %v7262_v22 }
 0xa1e   : > { %5812 = vmatprep.mubr.msk.bf16.mxu0 %vm563_vm1, %v7269_v16 }
 0xad1   : > { %v1997_v13 = vpop.f32.mrb[72].mxu0 }
 0xad2   : > { %v2004_v21 = vadd.f32 %v1997_v13, %v7143_v39  ;;  %v5790_v24 = vpop.f32.mrb[73].mxu0 }
 0xad3   : > { %v2000_v12 = vpop.f32.mrb[74].mxu0  ;;  %v7361_v24 = vpop.permute.xlu0 %2198 }
 0xad4   : > { %v2005_v17 = vadd.f32 %v2000_v12, %v7146_v40  ;;  %v5791_v26 = vpop.f32.mrb[75].mxu0  ;;  %v7280_v23 = vadd.f32 %v7275_v27, %v2004_v21  ;;  %v7363_v12 = vpop.permute.xlu1 %2203 }
 0xad6   : > { %v7283_v49 = vadd.f32 %v7277_v46, %v2005_v17 }
 0xad8   : > { %v2161_v30 = vadd.f32 %v7283_v49, %v7280_v23 }
 0xada   : > { %v2162_v8 = vrot.slane %v2161_v30, 4 }
 0xadc   : > { %v2163_v39 = vadd.f32 %v2162_v8, %v2161_v30  ;;  %v7367_v8 = vpop.permute.xlu1 %2213 }
 0xade   : > { %v2164_v58 = vrot.slane %v2163_v39, 2 }
 0xae0   : > { %v2165_v34 = vadd.f32 %v2164_v58, %v2163_v39 }
 0xae2   : > { %v2166_v59 = vrot.slane %v2165_v34, 1 }
 0xae4   : > { %v2167_v40 = vadd.f32 %v2166_v59, %v2165_v34 }
 0xae6   : > { %v2168_v57 = vmul.f32 0.0625, %v2167_v40 }
 0xae8   : > { %v2170_v33 = vsub.f32 %v7283_v49, %v2168_v57  ;;  %v2169_v10 = vsub.f32 %v7280_v23, %v2168_v57  ;;  %v7372_v57 = vpop.permute.xlu1 %2223 }
 0xaea   : > { %v2172_v35 = vmul.f32 %v2170_v33, %v2170_v33  ;;  %v2171_v36 = vmul.f32 %v2169_v10, %v2169_v10 }
 0xaec   : > { %v2173_v1 = vadd.f32 %v2172_v35, %v2171_v36 }
 0xaee   : > { %v2174_v50 = vrot.slane %v2173_v1, 4 }
 0xaf0   : > { %v2104_v41 = vpop.f32.mrb[76].mxu0  ;;  %v2175_v60 = vadd.f32 %v2174_v50, %v2173_v1 }
 0xaf1   : > { %v2111_v37 = vmul.f32 %v2104_v41, %v1855_v2  ;;  %v5802_v14 = vpop.f32.mrb[77].mxu0 }
 0xaf2   : > { %v2107_v18 = vpop.f32.mrb[78].mxu0  ;;  %v2176_v43 = vrot.slane %v2175_v60, 2 }
 0xaf3   : > { %v2112_v19 = vmul.f32 %v2107_v18, %v1856_v28  ;;  %v5803_v45 = vpop.f32.mrb[79].mxu0  ;;  %v2113_v42 = vadd.f32 %v2111_v37, %v7238_v52 }
 0xaf4   : > { %v2177_v48 = vadd.f32 %v2176_v43, %v2175_v60 }
 0xaf5   : > { %v2114_v47 = vadd.f32 %v2112_v19, %v7241_v54  ;;  %v7299_v54 = vld [vmem:[%s8171_s7 + $0x48] sm:$0xff]  }
 0xaf6   : > { %v2178_v55 = vrot.slane %v2177_v48, 1 }
 0xaf7   : > { %v2115_v56 = vpack.c.bf16 %v2114_v47, %v2113_v42  ;;  %v7389_v47 = vpop.permute.xlu1 %2233 }
 0xaf8   : > { %v2179_v44 = vadd.f32 %v2178_v55, %v2177_v48 }
 0xaf9   : > { %5805 = vmatpush3.bf16.msra.mxu1 %v2115_v56 }
 0xafa   : > { %v2180_v61 = vmul.f32 0.0625, %v2179_v44  ;;  %5828 = vmatprep.subr.bf16.mxu1 %v6400_v9 }
 0xafc   : > { %5807 = vmatmul.mubr.msk.bf16.vlgmr.msra.gmra.mrb[52].mxu1 %vm563_vm1, %v7251_v51  ;;  %v2181_v2 = vadd.f32 1e-05, %v2180_v61  ;;  %v7327_v51 = vld [vmem:[%s8171_s7 + $0x68] sm:$0xff]  }
 0xafd   : > { %5844 = vmatprep.mubr.msk.bf16.mxu1 %vm6401_vm0, %v6400_v9 }
 0xafe   : > { %6294 = vrsqrt.f32 %v2181_v2 }
 0xb08   : > { %v6295_v28 = vpop.eup %6294 }
 0xb09   : > { %v2183_v53 = vmul.f32 %v6295_v28, %v2169_v10  ;;  %v2184_v52 = vmul.f32 %v6295_v28, %v2170_v33 }
 0xb0b   : > { %v2185_v63 = vpack.c.bf16 %v2184_v52, %v2183_v53 }
 0xb0d   : > { %5810 = vmatprep.subr.bf16.mxu0 %v2185_v63 }
 0xb0e   : > { %5811 = vmatpush3.bf16.msra.mxu0 %v2185_v63 }
 0xb11   : > { %5813 = vmatmul.mubr.msk.bf16.vlgmr.msra.gmra.mrb[80].mxu0 %vm563_vm1, %v7299_v54 }
 0xb12   : > { %5816 = vmatprep.mubr.msk.bf16.mxu0 %vm563_vm1, %v7304_v31 }
 0xb19   : > { %5817 = vmatmul.mubr.msk.bf16.gmra.mrb[84].mxu0 %vm563_vm1, %v7313_v15 }
 0xb1a   : > { %5820 = vmatprep.mubr.msk.bf16.mxu0 %vm563_vm1, %v7318_v11 }
 0xb21   : > { %5821 = vmatmul.mubr.msk.bf16.gmra.mrb[88].mxu0 %vm563_vm1, %v7327_v51 }
 0xb22   : > { %5824 = vmatprep.mubr.msk.bf16.mxu0 %vm563_vm1, %v7332_v0 }
 0xb29   : > { %5825 = vmatmul.mubr.msk.bf16.gmra.mrb[92].mxu0 %vm563_vm1, %v7341_v62 }
 0xb2a   : > { %5850 = vmatprep.mubr.msk.bf16.mxu0 %vm563_vm1, %v7269_v16 }
 0xbcf   : > { %v2150_v7 = vpop.f32.mrb[52].mxu1 }
 0xbd0   : > { %v2157_v38 = vadd.f32 %v2150_v7, %v7199_v25  ;;  %v5808_v3 = vpop.f32.mrb[53].mxu1 }
 0xbd1   : > { %v2153_v4 = vpop.f32.mrb[54].mxu1 }
 0xbd2   : > { %v2158_v6 = vadd.f32 %v2153_v4, %v7202_v29  ;;  %v5809_v20 = vpop.f32.mrb[55].mxu1  ;;  %v7354_v13 = vadd.f32 %v2157_v38, %v7275_v27  ;;  %v7365_v29 = vpop.permute.xlu0 %2208 }
 0xbd4   : > { %v7357_v21 = vadd.f32 %v2158_v6, %v7277_v46 }
 0xbd6   : > { %v2512_v16 = vadd.f32 %v7357_v21, %v7354_v13  ;;  %v7369_v58 = vpop.permute.xlu0 %2218 }
 0xbd8   : > { %v2513_v25 = vrot.slane %v2512_v16, 4 }
 0xbda   : > { %v2514_v17 = vadd.f32 %v2513_v25, %v2512_v16  ;;  %v7387_v43 = vpop.permute.xlu0 %2228  ;;  %v7398_v16 = vpop.permute.xlu1 %2243 }
 0xbdc   : > { %v2515_v26 = vrot.slane %v2514_v17, 2 }
 0xbde   : > { %v2516_v30 = vadd.f32 %v2515_v26, %v2514_v17  ;;  %v7395_v38 = vpop.permute.xlu0 %2238 }
 0xbe0   : > { %v2517_v27 = vrot.slane %v2516_v30, 1 }
 0xbe2   : > { %v2518_v39 = vadd.f32 %v2517_v27, %v2516_v30 }
 0xbe4   : > { %v2519_v46 = vmul.f32 0.0625, %v2518_v39  ;;  %v5814_v34 = vpop.f32.mrb[80].mxu0 }
 0xbe5   : > { %v2373_v59 = vadd.f32 %v5814_v34, %v7361_v24  ;;  %v2364_v40 = vpop.f32.mrb[81].mxu0 }
 0xbe6   : > { %v7375_v33 = vsub.f32 %v7357_v21, %v2519_v46  ;;  %v2365_v10 = vadd.f32 %v2364_v40, %v7348_v5  ;;  %v5815_v35 = vpop.f32.mrb[82].mxu0  ;;  %v7379_v36 = vsub.f32 %v7354_v13, %v2519_v46  ;;  %v7402_v40 = vpop.permute.xlu0 %2248 }
 0xbe7   : > { %v2376_v1 = vadd.f32 %v5815_v35, %v7363_v12  ;;  %v2367_v50 = vpop.f32.mrb[83].mxu0  ;;  %v2429_v14 = vmax.f32 %v2373_v59, 0.0 }
 0xbe8   : > { %v2523_v41 = vmul.f32 %v7375_v33, %v7375_v33  ;;  %v2368_v60 = vadd.f32 %v2367_v50, %v7351_v32  ;;  %v2522_v37 = vmul.f32 %v7379_v36, %v7379_v36  ;;  %v2427_v19 = vmax.f32 %v2365_v10, 0.0 }
 0xbe9   : > { %v2430_v18 = vmax.f32 %v2376_v1, 0.0 }
 0xbea   : > { %v2428_v45 = vmax.f32 %v2368_v60, 0.0  ;;  %v2524_v48 = vadd.f32 %v2523_v41, %v2522_v37  ;;  %v7407_v60 = vpop.permute.xlu1 %2253 }
 0xbeb   : > { %v2444_v42 = vpack.c.bf16 %v2430_v18, %v2429_v14 }
 0xbec   : > { %v2443_v55 = vpack.c.bf16 %v2428_v45, %v2427_v19  ;;  %v5818_v56 = vpop.f32.mrb[84].mxu0  ;;  %v2525_v44 = vrot.slane %v2524_v48, 4 }
 0xbed   : > { %v2389_v61 = vadd.f32 %v5818_v56, %v7369_v58  ;;  %v2380_v2 = vpop.f32.mrb[85].mxu0  ;;  %v7411_v56 = vpop.permute.xlu0 %2258 }
 0xbee   : > { %v2381_v28 = vadd.f32 %v2380_v2, %v7365_v29  ;;  %v5819_v53 = vpop.f32.mrb[86].mxu0  ;;  %5829 = vmatpush3.bf16.msra.mxu1 %v2443_v55  ;;  %v2526_v52 = vadd.f32 %v2525_v44, %v2524_v48 }
 0xbef   : > { %v2392_v63 = vadd.f32 %v5819_v53, %v7372_v57  ;;  %v2383_v7 = vpop.f32.mrb[87].mxu0  ;;  %5830 = vmatprep.subr.bf16.mxu1 %v6400_v9  ;;  %v2433_v6 = vmax.f32 %v2389_v61, 0.0  ;;  %v7414_v53 = vpop.permute.xlu1 %2263 }
 0xbf0   : > { %v2384_v3 = vadd.f32 %v2383_v7, %v7367_v8  ;;  %v2527_v4 = vrot.slane %v2526_v52, 2  ;;  %v2431_v25 = vmax.f32 %v2381_v28, 0.0 }
 0xbf1   : > { %v2434_v20 = vmax.f32 %v2392_v63, 0.0 }
 0xbf2   : > { %v2432_v17 = vmax.f32 %v2384_v3, 0.0  ;;  %5831 = vmatpush3.bf16.msra.mxu1 %v2444_v42  ;;  %v2528_v26 = vadd.f32 %v2527_v4, %v2526_v52 }
 0xbf3   : > { %v2446_v30 = vpack.c.bf16 %v2434_v20, %v2433_v6  ;;  %5832 = vmatprep.subr.bf16.mxu1 %v6400_v9 }
 0xbf4   : > { %v2445_v27 = vpack.c.bf16 %v2432_v17, %v2431_v25  ;;  %v5822_v39 = vpop.f32.mrb[88].mxu0  ;;  %v2529_v46 = vrot.slane %v2528_v26, 1 }
 0xbf5   : > { %v2405_v34 = vadd.f32 %v5822_v39, %v7395_v38  ;;  %v2396_v59 = vpop.f32.mrb[89].mxu0 }
 0xbf6   : > { %v2397_v10 = vadd.f32 %v2396_v59, %v7387_v43  ;;  %v5823_v35 = vpop.f32.mrb[90].mxu0  ;;  %5833 = vmatpush3.bf16.msra.mxu1 %v2445_v27  ;;  %v2530_v1 = vadd.f32 %v2529_v46, %v2528_v26  ;;  %v7427_v59 = vld [vmem:[%s8173_s9 + $0x8] sm:$0xff]  }
 0xbf7   : > { %v2408_v50 = vadd.f32 %v5823_v35, %v7398_v16  ;;  %v2399_v41 = vpop.f32.mrb[91].mxu0  ;;  %5834 = vmatprep.subr.bf16.mxu1 %v6400_v9  ;;  %v2437_v18 = vmax.f32 %v2405_v34, 0.0 }
 0xbf8   : > { %v2400_v37 = vadd.f32 %v2399_v41, %v7389_v47  ;;  %v2531_v14 = vmul.f32 0.0625, %v2530_v1  ;;  %v2435_v45 = vmax.f32 %v2397_v10, 0.0  ;;  %v7455_v1 = vpop.permute.xlu1 %2507 }
 0xbf9   : > { %v2438_v19 = vmax.f32 %v2408_v50, 0.0 }
 0xbfa   : > { %v2436_v48 = vmax.f32 %v2400_v37, 0.0  ;;  %5835 = vmatpush3.bf16.msra.mxu1 %v2446_v30  ;;  %v2532_v42 = vadd.f32 1e-05, %v2531_v14 }
 0xbfb   : > { %v2448_v55 = vpack.c.bf16 %v2438_v19, %v2437_v18  ;;  %5836 = vmatprep.subr.bf16.mxu1 %v6400_v9 }
 0xbfc   : > { %v2447_v44 = vpack.c.bf16 %v2436_v48, %v2435_v45  ;;  %v5826_v61 = vpop.f32.mrb[92].mxu0  ;;  %6296 = vrsqrt.f32 %v2532_v42 }
 0xbfd   : > { %v2421_v2 = vadd.f32 %v5826_v61, %v7411_v56  ;;  %v2412_v28 = vpop.f32.mrb[93].mxu0 }
 0xbfe   : > { %v2413_v52 = vadd.f32 %v2412_v28, %v7402_v40  ;;  %v5827_v63 = vpop.f32.mrb[94].mxu0  ;;  %5837 = vmatpush3.bf16.msra.mxu1 %v2447_v44 }
 0xbff   : > { %v2424_v7 = vadd.f32 %v5827_v63, %v7414_v53  ;;  %v2415_v3 = vpop.f32.mrb[95].mxu0  ;;  %5838 = vmatprep.subr.bf16.mxu1 %v6400_v9  ;;  %v2441_v6 = vmax.f32 %v2421_v2, 0.0 }
 0xc00   : > { %v2416_v4 = vadd.f32 %v2415_v3, %v7407_v60  ;;  %v2439_v25 = vmax.f32 %v2413_v52, 0.0 }
 0xc01   : > { %v2442_v20 = vmax.f32 %v2424_v7, 0.0 }
 0xc02   : > { %v2440_v17 = vmax.f32 %v2416_v4, 0.0  ;;  %5839 = vmatpush3.bf16.msra.mxu1 %v2448_v55 }
 0xc03   : > { %v2450_v26 = vpack.c.bf16 %v2442_v20, %v2441_v6  ;;  %5840 = vmatprep.subr.bf16.mxu1 %v6400_v9 }
 0xc04   : > { %v2449_v30 = vpack.c.bf16 %v2440_v17, %v2439_v25 }
 0xc06   : > { %v6297_v27 = vpop.eup %6296  ;;  %5841 = vmatpush3.bf16.msra.mxu1 %v2449_v30 }
 0xc07   : > { %5842 = vmatprep.subr.bf16.mxu1 %v6400_v9  ;;  %v2534_v39 = vmul.f32 %v6297_v27, %v7379_v36  ;;  %v2535_v46 = vmul.f32 %v6297_v27, %v7375_v33 }
 0xc09   : > { %v2536_v34 = vpack.c.bf16 %v2535_v46, %v2534_v39 }
 0xc0a   : > { %5843 = vmatpush3.bf16.msra.mxu1 %v2450_v26 }
 0xc0b   : > { %5848 = vmatprep.subr.bf16.mxu0 %v2536_v34  ;;  %5866 = vmatprep.subr.bf16.mxu1 %v6400_v9 }
 0xc0c   : > { %5849 = vmatpush3.bf16.msra.mxu0 %v2536_v34 }
 0xc0d   : > { %5845 = vmatmul.mubr.bf16.vlgmr.msra.gmra.mrb[56].mxu1 %v7427_v59  ;;  %5886 = vmatprep.subr.bf16.mxu0 %v6400_v9 }
 0xc0e   : > { %5882 = vmatprep.mubr.msk.bf16.mxu1 %vm6401_vm0, %v6400_v9 }
 0xc0f   : > { %5851 = vmatmul.mubr.msk.bf16.vlgmr.msra.gmra.mrb[96].mxu0 %vm563_vm1, %v7299_v54 }
 0xc10   : > { %5854 = vmatprep.mubr.msk.bf16.mxu0 %vm563_vm1, %v7304_v31  ;;  %v7450_v31 = vpop.permute.xlu0 %2502 }
 0xc17   : > { %5855 = vmatmul.mubr.msk.bf16.gmra.mrb[100].mxu0 %vm563_vm1, %v7313_v15 }
 0xc18   : > { %5858 = vmatprep.mubr.msk.bf16.mxu0 %vm563_vm1, %v7318_v11 }
 0xc1f   : > { %5859 = vmatmul.mubr.msk.bf16.gmra.mrb[104].mxu0 %vm563_vm1, %v7327_v51 }
 0xc20   : > { %5862 = vmatprep.mubr.msk.bf16.mxu0 %vm563_vm1, %v7332_v0 }
 0xc27   : > { %5863 = vmatmul.mubr.msk.bf16.gmra.mrb[108].mxu0 %vm563_vm1, %v7341_v62 }
 0xc28   : > { %5888 = vmatprep.mubr.msk.bf16.mxu0 %vm6401_vm0, %v6400_v9 }
 0xce0   : > { %v2491_v54 = vpop.f32.mrb[56].mxu1 }
 0xce1   : > { %v2498_v15 = vadd.f32 %v2491_v54, %v7280_v23  ;;  %v5846_v33 = vpop.f32.mrb[57].mxu1 }
 0xce2   : > { %v2494_v36 = vpop.f32.mrb[58].mxu1  ;;  %v5852_v11 = vpop.f32.mrb[96].mxu0 }
 0xce3   : > { %v2499_v10 = vadd.f32 %v2494_v36, %v7283_v49  ;;  %v2580_v51 = vadd.f32 %v5852_v11, %v7361_v24  ;;  %v2571_v35 = vpop.f32.mrb[97].mxu0  ;;  %v5847_v0 = vpop.f32.mrb[59].mxu1  ;;  %v7459_v41 = vadd.f32 %v7450_v31, %v2498_v15 }
 0xce4   : > { %v2572_v62 = vadd.f32 %v2571_v35, %v7348_v5  ;;  %v5853_v50 = vpop.f32.mrb[98].mxu0 }
 0xce5   : > { %v7462_v37 = vadd.f32 %v7455_v1, %v2499_v10  ;;  %v2583_v23 = vadd.f32 %v5853_v50, %v7363_v12  ;;  %v2574_v14 = vpop.f32.mrb[99].mxu0  ;;  %v2636_v18 = vmax.f32 %v2580_v51, 0.0 }
 0xce6   : > { %v2575_v49 = vadd.f32 %v2574_v14, %v7351_v32  ;;  %v2634_v45 = vmax.f32 %v2572_v62, 0.0 }
 0xce7   : > { %v2763_v24 = vadd.f32 %v7462_v37, %v7459_v41  ;;  %v2637_v19 = vmax.f32 %v2583_v23, 0.0 }
 0xce8   : > { %v2635_v48 = vmax.f32 %v2575_v49, 0.0 }
 0xce9   : > { %v2764_v5 = vrot.slane %v2763_v24, 4  ;;  %v2651_v42 = vpack.c.bf16 %v2637_v19, %v2636_v18 }
 0xcea   : > { %v2650_v55 = vpack.c.bf16 %v2635_v48, %v2634_v45  ;;  %v5856_v44 = vpop.f32.mrb[100].mxu0 }
 0xceb   : > { %v2765_v61 = vadd.f32 %v2764_v5, %v2763_v24  ;;  %v2596_v2 = vadd.f32 %v5856_v44, %v7369_v58  ;;  %v2587_v28 = vpop.f32.mrb[101].mxu0 }
 0xcec   : > { %v2588_v12 = vadd.f32 %v2587_v28, %v7365_v29  ;;  %v5857_v52 = vpop.f32.mrb[102].mxu0  ;;  %5867 = vmatpush3.bf16.msra.mxu1 %v2650_v55 }
 0xced   : > { %v2766_v32 = vrot.slane %v2765_v61, 2  ;;  %v2599_v63 = vadd.f32 %v5857_v52, %v7372_v57  ;;  %v2590_v7 = vpop.f32.mrb[103].mxu0  ;;  %5868 = vmatprep.subr.bf16.mxu1 %v6400_v9  ;;  %v2640_v6 = vmax.f32 %v2596_v2, 0.0 }
 0xcee   : > { %v2591_v3 = vadd.f32 %v2590_v7, %v7367_v8  ;;  %v2638_v25 = vmax.f32 %v2588_v12, 0.0 }
 0xcef   : > { %v2767_v4 = vadd.f32 %v2766_v32, %v2765_v61  ;;  %v2641_v20 = vmax.f32 %v2599_v63, 0.0 }
 0xcf0   : > { %v2639_v17 = vmax.f32 %v2591_v3, 0.0  ;;  %5869 = vmatpush3.bf16.msra.mxu1 %v2651_v42 }
 0xcf1   : > { %v2768_v58 = vrot.slane %v2767_v4, 1  ;;  %v2653_v26 = vpack.c.bf16 %v2641_v20, %v2640_v6  ;;  %5870 = vmatprep.subr.bf16.mxu1 %v6400_v9  ;;  %v6242_v6 = vld [vmem:[%s8167_s3 + $0x40] sm:$0xff]  }
 0xcf2   : > { %v2652_v29 = vpack.c.bf16 %v2639_v17, %v2638_v25  ;;  %v5860_v30 = vpop.f32.mrb[104].mxu0 }
 0xcf3   : > { %v2769_v27 = vadd.f32 %v2768_v58, %v2767_v4  ;;  %v2612_v57 = vadd.f32 %v5860_v30, %v7395_v38  ;;  %v2603_v39 = vpop.f32.mrb[105].mxu0  ;;  %v6240_v4 = vld [vmem:[%s8167_s3 + $0x30] sm:$0xff]  }
 0xcf4   : > { %v2604_v46 = vadd.f32 %v2603_v39, %v7387_v43  ;;  %v5861_v34 = vpop.f32.mrb[106].mxu0  ;;  %5871 = vmatpush3.bf16.msra.mxu1 %v2652_v29 }
 0xcf5   : > { %v2770_v8 = vmul.f32 0.0625, %v2769_v27  ;;  %v2615_v54 = vadd.f32 %v5861_v34, %v7398_v16  ;;  %v2606_v15 = vpop.f32.mrb[107].mxu0  ;;  %5872 = vmatprep.subr.bf16.mxu1 %v6400_v9  ;;  %v2644_v10 = vmax.f32 %v2612_v57, 0.0 }
 0xcf6   : > { %v2607_v33 = vadd.f32 %v2606_v15, %v7389_v47  ;;  %v2642_v38 = vmax.f32 %v2604_v46, 0.0 }
 0xcf7   : > { %v2771_v36 = vsub.f32 %v7459_v41, %v2770_v8  ;;  %v2772_v11 = vsub.f32 %v7462_v37, %v2770_v8  ;;  %v2645_v51 = vmax.f32 %v2615_v54, 0.0 }
 0xcf8   : > { %v2643_v35 = vmax.f32 %v2607_v33, 0.0  ;;  %5873 = vmatpush3.bf16.msra.mxu1 %v2653_v26 }
 0xcf9   : > { %v2773_v43 = vmul.f32 %v2771_v36, %v2771_v36  ;;  %v2774_v0 = vmul.f32 %v2772_v11, %v2772_v11  ;;  %v2655_v62 = vpack.c.bf16 %v2645_v51, %v2644_v10  ;;  %5874 = vmatprep.subr.bf16.mxu1 %v6400_v9 }
 0xcfa   : > { %v2654_v16 = vpack.c.bf16 %v2643_v35, %v2642_v38  ;;  %v5864_v50 = vpop.f32.mrb[108].mxu0 }
 0xcfb   : > { %v2775_v23 = vadd.f32 %v2774_v0, %v2773_v43  ;;  %v2628_v14 = vadd.f32 %v5864_v50, %v7411_v56  ;;  %v2619_v47 = vpop.f32.mrb[109].mxu0 }
 0xcfc   : > { %v2620_v49 = vadd.f32 %v2619_v47, %v7402_v40  ;;  %v5865_v24 = vpop.f32.mrb[110].mxu0  ;;  %5875 = vmatpush3.bf16.msra.mxu1 %v2654_v16 }
 0xcfd   : > { %v2776_v18 = vrot.slane %v2775_v23, 4  ;;  %v2631_v19 = vadd.f32 %v5865_v24, %v7414_v53  ;;  %v2622_v45 = vpop.f32.mrb[111].mxu0  ;;  %5876 = vmatprep.subr.bf16.mxu1 %v6400_v9  ;;  %v2648_v42 = vmax.f32 %v2628_v14, 0.0 }
 0xcfe   : > { %v2623_v48 = vadd.f32 %v2622_v45, %v7407_v60  ;;  %v2646_v44 = vmax.f32 %v2620_v49, 0.0 }
 0xcff   : > { %v2777_v5 = vadd.f32 %v2776_v18, %v2775_v23  ;;  %v2649_v55 = vmax.f32 %v2631_v19, 0.0 }
 0xd00   : > { %v2647_v61 = vmax.f32 %v2623_v48, 0.0  ;;  %5877 = vmatpush3.bf16.msra.mxu1 %v2655_v62 }
 0xd01   : > { %v2778_v56 = vrot.slane %v2777_v5, 2  ;;  %v2657_v2 = vpack.c.bf16 %v2649_v55, %v2648_v42  ;;  %5878 = vmatprep.subr.bf16.mxu1 %v6400_v9 }
 0xd02   : > { %v2656_v40 = vpack.c.bf16 %v2647_v61, %v2646_v44 }
 0xd03   : > { %v2779_v28 = vadd.f32 %v2778_v56, %v2777_v5 }
 0xd04   : > { %5879 = vmatpush3.bf16.msra.mxu1 %v2656_v40 }
 0xd05   : > { %v2780_v12 = vrot.slane %v2779_v28, 1  ;;  %5880 = vmatprep.subr.bf16.mxu1 %v6400_v9 }
 0xd07   : > { %v2781_v53 = vadd.f32 %v2780_v12, %v2779_v28  ;;  %v2801_v28 = vpop.permute.xlu0 %2800 }
 0xd08   : > { %5881 = vmatpush3.bf16.msra.mxu1 %v2657_v2 }
 0xd09   : > { %v2782_v52 = vmul.f32 0.0625, %v2781_v53  ;;  %5900 = vmatprep.subr.bf16.mxu1 %v6400_v9  ;;  %v2806_v53 = vpop.permute.xlu1 %2805 }
 0xd0b   : > { %v2783_v60 = vadd.f32 1e-05, %v2782_v52  ;;  %5883 = vmatmul.mubr.bf16.vlgmr.msra.gmra.mrb[60].mxu1 %v7427_v59  ;;  %v6241_v59 = vld [vmem:[%s8167_s3 + $0x38] sm:$0xff]  }
 0xd0c   : > { %5902 = vmatprep.mubr.msk.bf16.mxu1 %vm6401_vm0, %v6400_v9 }
 0xd0d   : > { %6298 = vrsqrt.f32 %v2783_v60  ;;  %v2791_v60 = vpop.permute.xlu0 %2790 }
 0xd17   : > { %v6299_v32 = vpop.eup %6298 }
 0xd18   : > { %v2786_v63 = vmul.f32 %v6299_v32, %v2772_v11  ;;  %v2785_v7 = vmul.f32 %v6299_v32, %v2771_v36 }
 0xd1a   : > { %v2787_v3 = vpack.c.bf16 %v2786_v63, %v2785_v7 }
 0xd1c   : > { %5887 = vmatpush3.bf16.msra.mxu0 %v2787_v3 }
 0xd1d   : > { %5914 = vmatprep.subr.bf16.mxu0 %v6400_v9 }
 0xd1f   : > { %5889 = vmatmul.mubr.msk.bf16.vlgmr.msra.gmra.mrb[112].mxu0 %vm563_vm1, %v6240_v4 }
 0xd20   : > { %5892 = vmatprep.mubr.msk.bf16.mxu0 %vm6401_vm0, %v6400_v9 }
 0xd27   : > { %5893 = vmatmul.mubr.msk.bf16.gmra.mrb[116].mxu0 %vm563_vm1, %v6241_v59 }
 0xd28   : > { %5896 = vmatprep.mubr.msk.bf16.mxu0 %vm6401_vm0, %v6400_v9 }
 0xd2f   : > { %5897 = vmatmul.mubr.msk.bf16.gmra.mrb[120].mxu0 %vm563_vm1, %v6242_v6 }
 0xd30   : > { %5916 = vmatprep.mubr.msk.bf16.mxu0 %vm6401_vm0, %v6400_v9 }
 0xdde   : > { %v2692_v20 = vpop.f32.mrb[60].mxu1 }
 0xddf   : > { %v2699_v25 = vadd.f32 %v2692_v20, %v7354_v13  ;;  %v5884_v17 = vpop.f32.mrb[61].mxu1 }
 0xde0   : > { %v2695_v58 = vpop.f32.mrb[62].mxu1 }
 0xde1   : > { %v2700_v26 = vadd.f32 %v2695_v58, %v7357_v21  ;;  %v5885_v29 = vpop.f32.mrb[63].mxu1  ;;  %v7515_v30 = vadd.f32 %v2699_v25, %v7450_v31 }
 0xde3   : > { %v7518_v27 = vadd.f32 %v2700_v26, %v7455_v1 }
 0xde5   : > { %v2899_v57 = vadd.f32 %v7518_v27, %v7515_v30 }
 0xde7   : > { %v2900_v39 = vrot.slane %v2899_v57, 4 }
 0xde9   : > { %v2901_v46 = vadd.f32 %v2900_v39, %v2899_v57 }
 0xdeb   : > { %v2902_v34 = vrot.slane %v2901_v46, 2 }
 0xded   : > { %v2903_v8 = vadd.f32 %v2902_v34, %v2901_v46 }
 0xdef   : > { %v2904_v54 = vrot.slane %v2903_v8, 1 }
 0xdf1   : > { %v2905_v13 = vadd.f32 %v2904_v54, %v2903_v8 }
 0xdf2   : > { %v2876_v15 = vpop.f32.mrb[112].mxu0 }
 0xdf3   : > { %v2906_v33 = vmul.f32 0.0625, %v2905_v13  ;;  %v5890_v36 = vpop.f32.mrb[113].mxu0  ;;  %v2877_v3 = vadd.f32 %v2876_v15, %v2791_v60 }
 0xdf4   : > { %v2879_v21 = vpop.f32.mrb[114].mxu0 }
 0xdf5   : > { %v2907_v11 = vsub.f32 %v7515_v30, %v2906_v33  ;;  %v2908_v31 = vsub.f32 %v7518_v27, %v2906_v33  ;;  %v5891_v10 = vpop.f32.mrb[115].mxu0 }
 0xdf7   : > { %v2909_v1 = vmul.f32 %v2907_v11, %v2907_v11  ;;  %v2910_v51 = vmul.f32 %v2908_v31, %v2908_v31 }
 0xdf9   : > { %v2911_v38 = vadd.f32 %v2910_v51, %v2909_v1 }
 0xdfa   : > { %v2884_v35 = vpop.f32.mrb[116].mxu0 }
 0xdfb   : > { %v2912_v43 = vrot.slane %v2911_v38, 4  ;;  %v5894_v0 = vpop.f32.mrb[117].mxu0  ;;  %v2885_v32 = vadd.f32 %v2884_v35, %v2801_v28 }
 0xdfc   : > { %v2887_v62 = vpop.f32.mrb[118].mxu0 }
 0xdfd   : > { %v2913_v16 = vadd.f32 %v2912_v43, %v2911_v38  ;;  %v5895_v50 = vpop.f32.mrb[119].mxu0  ;;  %v2888_v20 = vadd.f32 %v2887_v62, %v2806_v53 }
 0xdff   : > { %v2914_v23 = vrot.slane %v2913_v16, 2 }
 0xe01   : > { %v2915_v14 = vadd.f32 %v2914_v23, %v2913_v16  ;;  %v2811_v23 = vpop.permute.xlu0 %2810 }
 0xe02   : > { %v7524_v47 = vpop.f32.mrb[120].mxu0 }
 0xe03   : > { %v2916_v49 = vrot.slane %v2915_v14, 1  ;;  %v5898_v24 = vpop.f32.mrb[121].mxu0 }
 0xe04   : > { %v7526_v18 = vpop.f32.mrb[122].mxu0  ;;  %v2893_v24 = vadd.f32 %v7524_v47, %v2811_v23 }
 0xe05   : > { %v2917_v19 = vadd.f32 %v2916_v49, %v2915_v14  ;;  %v5899_v45 = vpop.f32.mrb[123].mxu0 }
 0xe07   : > { %v2918_v48 = vmul.f32 0.0625, %v2917_v19 }
 0xe09   : > { %v2919_v5 = vadd.f32 1e-05, %v2918_v48 }
 0xe0b   : > { %6300 = vrsqrt.f32 %v2919_v5 }
 0xe15   : > { %v6301_v42 = vpop.eup %6300 }
 0xe16   : > { %v2922_v55 = vmul.f32 %v6301_v42, %v2908_v31  ;;  %v2921_v44 = vmul.f32 %v6301_v42, %v2907_v11  ;;  %v7542_v31 = vld [vmem:[%s8165_s1] sm:$0x3] }
 0xe18   : > { %v2923_v61 = vpack.c.bf16 %v2922_v55, %v2921_v44 }
 0xe1a   : > { %5901 = vmatpush3.bf16.msra.mxu1 %v2923_v61 }
 0xe1b   : > { %5920 = vmatprep.subr.bf16.mxu1 %v6400_v9 }
 0xe1d   : > { %5903 = vmatmul.mubr.msk.bf16.vlgmr.msra.gmra.mrb[64].mxu1 %vm563_vm1, %v6240_v4 }
 0xe1e   : > { %5906 = vmatprep.mubr.msk.bf16.mxu1 %vm6401_vm0, %v6400_v9 }
 0xe25   : > { %5907 = vmatmul.mubr.msk.bf16.gmra.mrb[68].mxu1 %vm563_vm1, %v6241_v59  ;;  %v2796_v59 = vpop.permute.xlu1 %2795 }
 0xe26   : > { %5910 = vmatprep.mubr.msk.bf16.mxu1 %vm6401_vm0, %v6400_v9  ;;  %v2880_v26 = vadd.f32 %v2879_v21, %v2796_v59 }
 0xe29   : > { %v2816_v49 = vpop.permute.xlu1 %2815 }
 0xe2a   : > { %v2896_v45 = vadd.f32 %v7526_v18, %v2816_v49  ;;  %v6243_v18 = vld [vmem:[%s8169_s5 + $0x10] sm:$0xff]  }
 0xe2d   : > { %5911 = vmatmul.mubr.msk.bf16.gmra.mrb[72].mxu1 %vm563_vm1, %v6242_v6 }
 0xe2e   : > { %5922 = vmatprep.mubr.msk.bf16.mxu1 %vm6401_vm0, %v6400_v9 }
 0xef0   : > { %v2958_v56 = vpop.f32.mrb[64].mxu1 }
 0xef1   : > { %v5904_v2 = vpop.f32.mrb[65].mxu1  ;;  %v2959_v25 = vadd.f32 %v2958_v56, %v2791_v60 }
 0xef2   : > { %v2961_v40 = vpop.f32.mrb[66].mxu1 }
 0xef3   : > { %v5905_v12 = vpop.f32.mrb[67].mxu1  ;;  %v2962_v29 = vadd.f32 %v2961_v40, %v2796_v59 }
 0xef8   : > { %v2966_v52 = vpop.f32.mrb[68].mxu1 }
 0xef9   : > { %v2967_v63 = vadd.f32 %v2966_v52, %v2801_v28  ;;  %v5908_v7 = vpop.f32.mrb[69].mxu1 }
 0xefa   : > { %v2969_v4 = vpop.f32.mrb[70].mxu1 }
 0xefb   : > { %v2981_v6 = vsub.f32 %v2885_v32, %v2967_v63  ;;  %v2970_v17 = vadd.f32 %v2969_v4, %v2806_v53  ;;  %v5909_v58 = vpop.f32.mrb[71].mxu1 }
 0xefd   : > { %v2985_v57 = vmul.f32 %v2981_v6, %v2877_v3  ;;  %v3146_v39 = vmul.f32 %v2981_v6, %v2959_v25  ;;  %v2982_v46 = vsub.f32 %v2888_v20, %v2970_v17  ;;  %v7582_v25 = vld [vmem:[%s8171_s7 + $0x80] sm:$0xff]  }
 0xeff   : > { %v2986_v34 = vmul.f32 %v2982_v46, %v2880_v26  ;;  %v3147_v8 = vmul.f32 %v2982_v46, %v2962_v29  ;;  %v7590_v46 = vpop.permute.xlu1 %3141 }
 0xf00   : > { %v2974_v54 = vpop.f32.mrb[72].mxu1 }
 0xf01   : > { %v2987_v13 = vpack.c.bf16 %v2986_v34, %v2985_v57  ;;  %v3148_v33 = vpack.c.bf16 %v3147_v8, %v3146_v39  ;;  %v5912_v36 = vpop.f32.mrb[73].mxu1  ;;  %v7559_v14 = vadd.f32 %v2974_v54, %v2811_v23  ;;  %v7588_v39 = vpop.permute.xlu0 %3136 }
 0xf02   : > { %v2977_v11 = vpop.f32.mrb[74].mxu1 }
 0xf03   : > { %5915 = vmatpush3.bf16.msra.mxu0 %v2987_v13  ;;  %v5913_v15 = vpop.f32.mrb[75].mxu1  ;;  %v7562_v19 = vadd.f32 %v2977_v11, %v2816_v49  ;;  %v2983_v48 = vsub.f32 %v2893_v24, %v7559_v14 }
 0xf04   : > { %5926 = vmatprep.subr.bf16.mxu0 %v6400_v9 }
 0xf05   : > { %v2984_v44 = vsub.f32 %v2896_v45, %v7562_v19 }
 0xf06   : > { %5917 = vmatmul.mubr.msk.bf16.vlgmr.msra.gmra.mrb[124].mxu0 %vm563_vm1, %v7542_v31 }
 0xf07   : > { %5928 = vmatprep.mubr.msk.bf16.mxu0 %vm6401_vm0, %v6400_v9 }
 0xfd9   : > { %v3022_v21 = vpop.f32.mrb[124].mxu0 }
 0xfda   : > { %v3028_v10 = vsub.f32 0.0, %v3022_v21  ;;  %v5918_v1 = vpop.f32.mrb[125].mxu0 }
 0xfdb   : > { %v3025_v51 = vpop.f32.mrb[126].mxu0 }
 0xfdc   : > { %v3029_v38 = vmul.f32 1.442695, %v3028_v10  ;;  %v5919_v35 = vpop.f32.mrb[127].mxu0 }
 0xfde   : > { %6302 = vpow2.f32 %v3029_v38 }
 0xfe8   : > { %v6303_v43 = vpop.eup %6302 }
 0xfe9   : > { %v3031_v0 = vadd.f32 1.0, %v6303_v43 }
 0xfeb   : > { %6304 = vrcp.f32 %v3031_v0 }
 0xff5   : > { %v6305_v62 = vpop.eup %6304 }
 0xff6   : > { %v3033_v16 = vpack.c.bf16 %v6305_v62, %v6305_v62 }
 0xff8   : > { %v3035_v50 = vsel %vm777_vm2, %v3033_v16, 0 }
 0xff9   : > { %5921 = vmatpush3.bf16.msra.mxu1 %v3035_v50 }
 0xffa   : > { %5932 = vmatprep.subr.bf16.mxu1 %v6400_v9 }
 0xffc   : > { %5923 = vmatmul.mubr.msk.bf16.vlgmr.msra.gmra.mrb[76].mxu1 %vm773_vm3, %v7262_v22 }
 0xffd   : > { %5933 = vmatpush3.bf16.msra.mxu1 %v3148_v33  ;;  %5934 = vmatprep.mubr.msk.bf16.mxu1 %vm6401_vm0, %v6400_v9 }
 0xffe   : > { %5944 = vmatprep.subr.bf16.mxu1 %v6400_v9 }
0x1004   : > { %5935 = vmatmul.mubr.msk.bf16.vlgmr.msra.gmra.mrb[80].mxu1 %vm563_vm1, %v7542_v31 }
0x1005   : > { %5946 = vmatprep.mubr.msk.bf16.mxu1 %vm6401_vm0, %v6400_v9 }
0x10cf   : > { %v3071_v5 = vpop.f32.mrb[76].mxu1 }
0x10d0   : > { %v3078_v42 = vmul.f32 %v3071_v5, %v2983_v48  ;;  %v5924_v55 = vpop.f32.mrb[77].mxu1 }
0x10d1   : > { %v3074_v61 = vpop.f32.mrb[78].mxu1 }
0x10d2   : > { %v3079_v56 = vmul.f32 %v3074_v61, %v2984_v44  ;;  %v5925_v2 = vpop.f32.mrb[79].mxu1  ;;  %v3080_v40 = vadd.f32 %v3078_v42, %v7559_v14 }
0x10d4   : > { %v3081_v28 = vadd.f32 %v3079_v56, %v7562_v19 }
0x10d6   : > { %v3082_v12 = vpack.c.bf16 %v3081_v28, %v3080_v40  ;;  %v7616_v28 = vld [vmem:[%s8171_s7 + $0x90] sm:$0xff]  }
0x10d7   : > { %v3183_v47 = vpop.f32.mrb[80].mxu1 }
0x10d8   : > { %v3189_v53 = vsub.f32 0.0, %v3183_v47  ;;  %5927 = vmatpush3.bf16.msra.mxu0 %v3082_v12  ;;  %v5936_v52 = vpop.f32.mrb[81].mxu1  ;;  %v7625_v12 = vld [vmem:[%s8171_s7 + $0x98] sm:$0xff]   ;;  %v7630_v47 = vld [vmem:[%s8171_s7 + $0xa0] sm:$0xff]  }
0x10d9   : > { %v3186_v60 = vpop.f32.mrb[82].mxu1  ;;  %5938 = vmatprep.subr.bf16.mxu0 %v6400_v9  ;;  %v7653_v52 = vld [vmem:[%s8171_s7 + $0xb8] sm:$0xff]  }
0x10da   : > { %v3190_v32 = vmul.f32 1.442695, %v3189_v53  ;;  %v5937_v63 = vpop.f32.mrb[83].mxu1  ;;  %v7644_v53 = vld [vmem:[%s8171_s7 + $0xb0] sm:$0xff]  }
0x10db   : > { %5929 = vmatmul.mubr.msk.bf16.vlgmr.msra.gmra.mrb[128].mxu0 %vm563_vm1, %v6243_v18 }
0x10dc   : > { %6306 = vpow2.f32 %v3190_v32  ;;  %5940 = vmatprep.mubr.msk.bf16.mxu0 %vm6401_vm0, %v6400_v9 }
0x10e6   : > { %v6307_v7 = vpop.eup %6306 }
0x10e7   : > { %v3192_v3 = vadd.f32 1.0, %v6307_v7 }
0x10e9   : > { %6308 = vrcp.f32 %v3192_v3  ;;  %v7660_v3 = vpop.permute.xlu0 %3316 }
0x10f3   : > { %v6309_v4 = vpop.eup %6308 }
0x10f4   : > { %v3194_v59 = vpack.c.bf16 %v6309_v4, %v6309_v4 }
0x10f6   : > { %v3196_v20 = vsel %vm777_vm2, %v3194_v59, 0 }
0x10f7   : > { %5939 = vmatpush3.bf16.msra.mxu0 %v3196_v20  ;;  %v7663_v20 = vpop.permute.xlu1 %3321 }
0x10fa   : > { %5941 = vmatmul.mubr.msk.bf16.vlgmr.msra.gmra.mrb[132].mxu0 %vm773_vm3, %v7262_v22 }
0x10fb   : > { %5952 = vmatprep.mubr.msk.bf16.mxu0 %vm563_vm1, %v7582_v25 }
0x11ae   : > { %v3125_v6 = vpop.f32.mrb[128].mxu0 }
0x11af   : > { %v3132_v17 = vadd.f32 %v3125_v6, %v7459_v41  ;;  %v5930_v58 = vpop.f32.mrb[129].mxu0 }
0x11b0   : > { %v3128_v26 = vpop.f32.mrb[130].mxu0  ;;  %v7673_v58 = vpop.permute.xlu0 %3326 }
0x11b1   : > { %v3133_v29 = vadd.f32 %v3128_v26, %v7462_v37  ;;  %v5931_v57 = vpop.f32.mrb[131].mxu0  ;;  %v7593_v22 = vadd.f32 %v7588_v39, %v3132_v17  ;;  %v7675_v26 = vpop.permute.xlu1 %3331 }
0x11b3   : > { %v7596_v34 = vadd.f32 %v7590_v46, %v3133_v29 }
0x11b5   : > { %v3289_v8 = vadd.f32 %v7596_v34, %v7593_v22 }
0x11b7   : > { %v3290_v54 = vrot.slane %v3289_v8, 4 }
0x11b9   : > { %v3291_v41 = vadd.f32 %v3290_v54, %v3289_v8  ;;  %v7679_v54 = vpop.permute.xlu1 %3341 }
0x11bb   : > { %v3292_v13 = vrot.slane %v3291_v41, 2 }
0x11bd   : > { %v3293_v33 = vadd.f32 %v3292_v13, %v3291_v41 }
0x11bf   : > { %v3294_v36 = vrot.slane %v3293_v33, 1 }
0x11c1   : > { %v3295_v37 = vadd.f32 %v3294_v36, %v3293_v33 }
0x11c3   : > { %v3296_v11 = vmul.f32 0.0625, %v3295_v37 }
0x11c5   : > { %v3298_v15 = vsub.f32 %v7596_v34, %v3296_v11  ;;  %v3297_v21 = vsub.f32 %v7593_v22, %v3296_v11  ;;  %v7684_v11 = vpop.permute.xlu1 %3351 }
0x11c7   : > { %v3300_v10 = vmul.f32 %v3298_v15, %v3298_v15  ;;  %v3299_v1 = vmul.f32 %v3297_v21, %v3297_v21 }
0x11c9   : > { %v3301_v51 = vadd.f32 %v3300_v10, %v3299_v1 }
0x11cb   : > { %v3302_v38 = vrot.slane %v3301_v51, 4 }
0x11cd   : > { %v3232_v35 = vpop.f32.mrb[132].mxu0  ;;  %v3303_v43 = vadd.f32 %v3302_v38, %v3301_v51 }
0x11ce   : > { %v3239_v0 = vmul.f32 %v3232_v35, %v2983_v48  ;;  %v5942_v62 = vpop.f32.mrb[133].mxu0 }
0x11cf   : > { %v3235_v16 = vpop.f32.mrb[134].mxu0  ;;  %v3304_v50 = vrot.slane %v3303_v43, 2 }
0x11d0   : > { %v3240_v23 = vmul.f32 %v3235_v16, %v2984_v44  ;;  %v5943_v49 = vpop.f32.mrb[135].mxu0  ;;  %v3241_v45 = vadd.f32 %v3239_v0, %v7559_v14 }
0x11d1   : > { %v3305_v24 = vadd.f32 %v3304_v50, %v3303_v43 }
0x11d2   : > { %v3242_v5 = vadd.f32 %v3240_v23, %v7562_v19  ;;  %v7611_v19 = vld [vmem:[%s8171_s7 + $0x88] sm:$0xff]  }
0x11d3   : > { %v3306_v42 = vrot.slane %v3305_v24, 1 }
0x11d4   : > { %v3243_v55 = vpack.c.bf16 %v3242_v5, %v3241_v45  ;;  %v7701_v5 = vpop.permute.xlu1 %3361 }
0x11d5   : > { %v3307_v61 = vadd.f32 %v3306_v42, %v3305_v24 }
0x11d6   : > { %5945 = vmatpush3.bf16.msra.mxu1 %v3243_v55 }
0x11d7   : > { %v3308_v56 = vmul.f32 0.0625, %v3307_v61  ;;  %5968 = vmatprep.subr.bf16.mxu1 %v6400_v9 }
0x11d9   : > { %5947 = vmatmul.mubr.msk.bf16.vlgmr.msra.gmra.mrb[84].mxu1 %vm563_vm1, %v6243_v18  ;;  %v3309_v48 = vadd.f32 1e-05, %v3308_v56  ;;  %v7639_v18 = vld [vmem:[%s8171_s7 + $0xa8] sm:$0xff]  }
0x11da   : > { %5984 = vmatprep.mubr.msk.bf16.mxu1 %vm6401_vm0, %v6400_v9 }
0x11db   : > { %6310 = vrsqrt.f32 %v3309_v48 }
0x11e5   : > { %v6311_v44 = vpop.eup %6310 }
0x11e6   : > { %v3311_v2 = vmul.f32 %v6311_v44, %v3297_v21  ;;  %v3312_v40 = vmul.f32 %v6311_v44, %v3298_v15 }
0x11e8   : > { %v3313_v14 = vpack.c.bf16 %v3312_v40, %v3311_v2 }
0x11ea   : > { %5950 = vmatprep.subr.bf16.mxu0 %v3313_v14 }
0x11eb   : > { %5951 = vmatpush3.bf16.msra.mxu0 %v3313_v14 }
0x11ee   : > { %5953 = vmatmul.mubr.msk.bf16.vlgmr.msra.gmra.mrb[136].mxu0 %vm563_vm1, %v7611_v19 }
0x11ef   : > { %5956 = vmatprep.mubr.msk.bf16.mxu0 %vm563_vm1, %v7616_v28 }
0x11f6   : > { %5957 = vmatmul.mubr.msk.bf16.gmra.mrb[140].mxu0 %vm563_vm1, %v7625_v12 }
0x11f7   : > { %5960 = vmatprep.mubr.msk.bf16.mxu0 %vm563_vm1, %v7630_v47 }
0x11fe   : > { %5961 = vmatmul.mubr.msk.bf16.gmra.mrb[144].mxu0 %vm563_vm1, %v7639_v18 }
0x11ff   : > { %5964 = vmatprep.mubr.msk.bf16.mxu0 %vm563_vm1, %v7644_v53 }
0x1206   : > { %5965 = vmatmul.mubr.msk.bf16.gmra.mrb[148].mxu0 %vm563_vm1, %v7653_v52 }
0x1207   : > { %5990 = vmatprep.mubr.msk.bf16.mxu0 %vm563_vm1, %v7582_v25 }
0x12ac   : > { %v3278_v60 = vpop.f32.mrb[84].mxu1 }
0x12ad   : > { %v3285_v32 = vadd.f32 %v3278_v60, %v7515_v30  ;;  %v5948_v63 = vpop.f32.mrb[85].mxu1 }
0x12ae   : > { %v3281_v7 = vpop.f32.mrb[86].mxu1 }
0x12af   : > { %v3286_v4 = vadd.f32 %v3281_v7, %v7518_v27  ;;  %v5949_v59 = vpop.f32.mrb[87].mxu1  ;;  %v7666_v6 = vadd.f32 %v3285_v32, %v7588_v39  ;;  %v7677_v27 = vpop.permute.xlu0 %3336 }
0x12b1   : > { %v7669_v17 = vadd.f32 %v3286_v4, %v7590_v46 }
0x12b3   : > { %v3640_v25 = vadd.f32 %v7669_v17, %v7666_v6  ;;  %v7681_v13 = vpop.permute.xlu0 %3346 }
0x12b5   : > { %v3641_v30 = vrot.slane %v3640_v25, 4 }
0x12b7   : > { %v3642_v29 = vadd.f32 %v3641_v30, %v3640_v25  ;;  %v7699_v50 = vpop.permute.xlu0 %3356  ;;  %v7710_v25 = vpop.permute.xlu1 %3371 }
0x12b9   : > { %v3643_v57 = vrot.slane %v3642_v29, 2 }
0x12bb   : > { %v3644_v8 = vadd.f32 %v3643_v57, %v3642_v29  ;;  %v7707_v32 = vpop.permute.xlu0 %3366 }
0x12bd   : > { %v3645_v39 = vrot.slane %v3644_v8, 1 }
0x12bf   : > { %v3646_v41 = vadd.f32 %v3645_v39, %v3644_v8 }
0x12c1   : > { %v3647_v46 = vmul.f32 0.0625, %v3646_v41  ;;  %v5954_v33 = vpop.f32.mrb[136].mxu0 }
0x12c2   : > { %v3501_v36 = vadd.f32 %v5954_v33, %v7673_v58  ;;  %v3492_v37 = vpop.f32.mrb[137].mxu0 }
0x12c3   : > { %v7687_v15 = vsub.f32 %v7669_v17, %v3647_v46  ;;  %v3493_v21 = vadd.f32 %v3492_v37, %v7660_v3  ;;  %v5955_v10 = vpop.f32.mrb[138].mxu0  ;;  %v7691_v1 = vsub.f32 %v7666_v6, %v3647_v46  ;;  %v7714_v37 = vpop.permute.xlu0 %3376 }
0x12c4   : > { %v3504_v51 = vadd.f32 %v5955_v10, %v7675_v26  ;;  %v3495_v38 = vpop.f32.mrb[139].mxu0  ;;  %v3557_v62 = vmax.f32 %v3501_v36, 0.0 }
0x12c5   : > { %v3651_v35 = vmul.f32 %v7687_v15, %v7687_v15  ;;  %v3496_v43 = vadd.f32 %v3495_v38, %v7663_v20  ;;  %v3650_v0 = vmul.f32 %v7691_v1, %v7691_v1  ;;  %v3555_v23 = vmax.f32 %v3493_v21, 0.0 }
0x12c6   : > { %v3558_v16 = vmax.f32 %v3504_v51, 0.0 }
0x12c7   : > { %v3556_v49 = vmax.f32 %v3496_v43, 0.0  ;;  %v3652_v24 = vadd.f32 %v3651_v35, %v3650_v0  ;;  %v7719_v43 = vpop.permute.xlu1 %3381 }
0x12c8   : > { %v3572_v45 = vpack.c.bf16 %v3558_v16, %v3557_v62 }
0x12c9   : > { %v3571_v42 = vpack.c.bf16 %v3556_v49, %v3555_v23  ;;  %v5958_v55 = vpop.f32.mrb[140].mxu0  ;;  %v3653_v61 = vrot.slane %v3652_v24, 4 }
0x12ca   : > { %v3517_v56 = vadd.f32 %v5958_v55, %v7681_v13  ;;  %v3508_v48 = vpop.f32.mrb[141].mxu0  ;;  %v7723_v55 = vpop.permute.xlu0 %3386 }
0x12cb   : > { %v3509_v44 = vadd.f32 %v3508_v48, %v7677_v27  ;;  %v5959_v2 = vpop.f32.mrb[142].mxu0  ;;  %5969 = vmatpush3.bf16.msra.mxu1 %v3571_v42  ;;  %v3654_v40 = vadd.f32 %v3653_v61, %v3652_v24 }
0x12cc   : > { %v3520_v14 = vadd.f32 %v5959_v2, %v7684_v11  ;;  %v3511_v60 = vpop.f32.mrb[143].mxu0  ;;  %5970 = vmatprep.subr.bf16.mxu1 %v6400_v9  ;;  %v3561_v4 = vmax.f32 %v3517_v56, 0.0  ;;  %v7726_v2 = vpop.permute.xlu1 %3391 }
0x12cd   : > { %v3512_v63 = vadd.f32 %v3511_v60, %v7679_v54  ;;  %v3655_v7 = vrot.slane %v3654_v40, 2  ;;  %v3559_v30 = vmax.f32 %v3509_v44, 0.0 }
0x12ce   : > { %v3562_v59 = vmax.f32 %v3520_v14, 0.0 }
0x12cf   : > { %v3560_v29 = vmax.f32 %v3512_v63, 0.0  ;;  %5971 = vmatpush3.bf16.msra.mxu1 %v3572_v45  ;;  %v3656_v57 = vadd.f32 %v3655_v7, %v3654_v40 }
0x12d0   : > { %v3574_v8 = vpack.c.bf16 %v3562_v59, %v3561_v4  ;;  %5972 = vmatprep.subr.bf16.mxu1 %v6400_v9 }
0x12d1   : > { %v3573_v39 = vpack.c.bf16 %v3560_v29, %v3559_v30  ;;  %v5962_v41 = vpop.f32.mrb[144].mxu0  ;;  %v3657_v46 = vrot.slane %v3656_v57, 1 }
0x12d2   : > { %v3533_v33 = vadd.f32 %v5962_v41, %v7707_v32  ;;  %v3524_v36 = vpop.f32.mrb[145].mxu0 }
0x12d3   : > { %v3525_v21 = vadd.f32 %v3524_v36, %v7699_v50  ;;  %v5963_v10 = vpop.f32.mrb[146].mxu0  ;;  %5973 = vmatpush3.bf16.msra.mxu1 %v3573_v39  ;;  %v3658_v51 = vadd.f32 %v3657_v46, %v3656_v57  ;;  %v7739_v36 = vld [vmem:[%s8173_s9 + $0x10] sm:$0xff]  }
0x12d4   : > { %v3536_v38 = vadd.f32 %v5963_v10, %v7710_v25  ;;  %v3527_v35 = vpop.f32.mrb[147].mxu0  ;;  %5974 = vmatprep.subr.bf16.mxu1 %v6400_v9  ;;  %v3565_v16 = vmax.f32 %v3533_v33, 0.0 }
0x12d5   : > { %v3528_v0 = vadd.f32 %v3527_v35, %v7701_v5  ;;  %v3659_v62 = vmul.f32 0.0625, %v3658_v51  ;;  %v3563_v49 = vmax.f32 %v3525_v21, 0.0  ;;  %v7767_v51 = vpop.permute.xlu1 %3635 }
0x12d6   : > { %v3566_v23 = vmax.f32 %v3536_v38, 0.0 }
0x12d7   : > { %v3564_v24 = vmax.f32 %v3528_v0, 0.0  ;;  %5975 = vmatpush3.bf16.msra.mxu1 %v3574_v8  ;;  %v3660_v45 = vadd.f32 1e-05, %v3659_v62 }
0x12d8   : > { %v3576_v42 = vpack.c.bf16 %v3566_v23, %v3565_v16  ;;  %5976 = vmatprep.subr.bf16.mxu1 %v6400_v9 }
0x12d9   : > { %v3575_v61 = vpack.c.bf16 %v3564_v24, %v3563_v49  ;;  %v5966_v56 = vpop.f32.mrb[148].mxu0  ;;  %6312 = vrsqrt.f32 %v3660_v45 }
0x12da   : > { %v3549_v48 = vadd.f32 %v5966_v56, %v7723_v55  ;;  %v3540_v44 = vpop.f32.mrb[149].mxu0 }
0x12db   : > { %v3541_v40 = vadd.f32 %v3540_v44, %v7714_v37  ;;  %v5967_v14 = vpop.f32.mrb[150].mxu0  ;;  %5977 = vmatpush3.bf16.msra.mxu1 %v3575_v61 }
0x12dc   : > { %v3552_v60 = vadd.f32 %v5967_v14, %v7726_v2  ;;  %v3543_v63 = vpop.f32.mrb[151].mxu0  ;;  %5978 = vmatprep.subr.bf16.mxu1 %v6400_v9  ;;  %v3569_v4 = vmax.f32 %v3549_v48, 0.0 }
0x12dd   : > { %v3544_v7 = vadd.f32 %v3543_v63, %v7719_v43  ;;  %v3567_v30 = vmax.f32 %v3541_v40, 0.0 }
0x12de   : > { %v3570_v59 = vmax.f32 %v3552_v60, 0.0 }
0x12df   : > { %v3568_v29 = vmax.f32 %v3544_v7, 0.0  ;;  %5979 = vmatpush3.bf16.msra.mxu1 %v3576_v42 }
0x12e0   : > { %v3578_v57 = vpack.c.bf16 %v3570_v59, %v3569_v4  ;;  %5980 = vmatprep.subr.bf16.mxu1 %v6400_v9 }
0x12e1   : > { %v3577_v8 = vpack.c.bf16 %v3568_v29, %v3567_v30 }
0x12e3   : > { %v6313_v39 = vpop.eup %6312  ;;  %5981 = vmatpush3.bf16.msra.mxu1 %v3577_v8 }
0x12e4   : > { %5982 = vmatprep.subr.bf16.mxu1 %v6400_v9  ;;  %v3662_v41 = vmul.f32 %v6313_v39, %v7691_v1  ;;  %v3663_v46 = vmul.f32 %v6313_v39, %v7687_v15 }
0x12e6   : > { %v3664_v33 = vpack.c.bf16 %v3663_v46, %v3662_v41 }
0x12e7   : > { %5983 = vmatpush3.bf16.msra.mxu1 %v3578_v57 }
0x12e8   : > { %5988 = vmatprep.subr.bf16.mxu0 %v3664_v33  ;;  %6006 = vmatprep.subr.bf16.mxu1 %v6400_v9 }
0x12e9   : > { %5989 = vmatpush3.bf16.msra.mxu0 %v3664_v33 }
0x12ea   : > { %5985 = vmatmul.mubr.bf16.vlgmr.msra.gmra.mrb[88].mxu1 %v7739_v36  ;;  %6026 = vmatprep.subr.bf16.mxu0 %v6400_v9 }
0x12eb   : > { %6022 = vmatprep.mubr.msk.bf16.mxu1 %vm6401_vm0, %v6400_v9 }
0x12ec   : > { %5991 = vmatmul.mubr.msk.bf16.vlgmr.msra.gmra.mrb[152].mxu0 %vm563_vm1, %v7611_v19 }
0x12ed   : > { %5994 = vmatprep.mubr.msk.bf16.mxu0 %vm563_vm1, %v7616_v28  ;;  %v7762_v28 = vpop.permute.xlu0 %3630 }
0x12f4   : > { %5995 = vmatmul.mubr.msk.bf16.gmra.mrb[156].mxu0 %vm563_vm1, %v7625_v12 }
0x12f5   : > { %5998 = vmatprep.mubr.msk.bf16.mxu0 %vm563_vm1, %v7630_v47 }
0x12fc   : > { %5999 = vmatmul.mubr.msk.bf16.gmra.mrb[160].mxu0 %vm563_vm1, %v7639_v18 }
0x12fd   : > { %6002 = vmatprep.mubr.msk.bf16.mxu0 %vm563_vm1, %v7644_v53 }
0x1304   : > { %6003 = vmatmul.mubr.msk.bf16.gmra.mrb[164].mxu0 %vm563_vm1, %v7653_v52 }
0x1305   : > { %6028 = vmatprep.mubr.msk.bf16.mxu0 %vm6401_vm0, %v6400_v9 }
0x13bd   : > { %v3619_v19 = vpop.f32.mrb[88].mxu1 }
0x13be   : > { %v3626_v12 = vadd.f32 %v3619_v19, %v7593_v22  ;;  %v5986_v15 = vpop.f32.mrb[89].mxu1 }
0x13bf   : > { %v3622_v1 = vpop.f32.mrb[90].mxu1  ;;  %v5992_v47 = vpop.f32.mrb[152].mxu0 }
0x13c0   : > { %v3627_v21 = vadd.f32 %v3622_v1, %v7596_v34  ;;  %v3708_v18 = vadd.f32 %v5992_v47, %v7673_v58  ;;  %v3699_v10 = vpop.f32.mrb[153].mxu0  ;;  %v5987_v53 = vpop.f32.mrb[91].mxu1  ;;  %v7771_v35 = vadd.f32 %v7762_v28, %v3626_v12 }
0x13c1   : > { %v3700_v52 = vadd.f32 %v3699_v10, %v7660_v3  ;;  %v5993_v38 = vpop.f32.mrb[154].mxu0 }
0x13c2   : > { %v7774_v0 = vadd.f32 %v7767_v51, %v3627_v21  ;;  %v3711_v22 = vadd.f32 %v5993_v38, %v7675_v26  ;;  %v3702_v62 = vpop.f32.mrb[155].mxu0  ;;  %v3764_v16 = vmax.f32 %v3708_v18, 0.0 }
0x13c3   : > { %v3703_v34 = vadd.f32 %v3702_v62, %v7663_v20  ;;  %v3762_v49 = vmax.f32 %v3700_v52, 0.0 }
0x13c4   : > { %v3891_v58 = vadd.f32 %v7774_v0, %v7771_v35  ;;  %v3765_v23 = vmax.f32 %v3711_v22, 0.0 }
0x13c5   : > { %v3763_v24 = vmax.f32 %v3703_v34, 0.0 }
0x13c6   : > { %v3892_v3 = vrot.slane %v3891_v58, 4  ;;  %v3779_v45 = vpack.c.bf16 %v3765_v23, %v3764_v16 }
0x13c7   : > { %v3778_v42 = vpack.c.bf16 %v3763_v24, %v3762_v49  ;;  %v5996_v61 = vpop.f32.mrb[156].mxu0 }
0x13c8   : > { %v3893_v56 = vadd.f32 %v3892_v3, %v3891_v58  ;;  %v3724_v48 = vadd.f32 %v5996_v61, %v7681_v13  ;;  %v3715_v44 = vpop.f32.mrb[157].mxu0 }
0x13c9   : > { %v3716_v26 = vadd.f32 %v3715_v44, %v7677_v27  ;;  %v5997_v40 = vpop.f32.mrb[158].mxu0  ;;  %6007 = vmatpush3.bf16.msra.mxu1 %v3778_v42 }
0x13ca   : > { %v3894_v20 = vrot.slane %v3893_v56, 2  ;;  %v3727_v14 = vadd.f32 %v5997_v40, %v7684_v11  ;;  %v3718_v60 = vpop.f32.mrb[159].mxu0  ;;  %6008 = vmatprep.subr.bf16.mxu1 %v6400_v9  ;;  %v3768_v4 = vmax.f32 %v3724_v48, 0.0 }
0x13cb   : > { %v3719_v63 = vadd.f32 %v3718_v60, %v7679_v54  ;;  %v3766_v30 = vmax.f32 %v3716_v26, 0.0 }
0x13cc   : > { %v3895_v7 = vadd.f32 %v3894_v20, %v3893_v56  ;;  %v3769_v59 = vmax.f32 %v3727_v14, 0.0 }
0x13cd   : > { %v3767_v29 = vmax.f32 %v3719_v63, 0.0  ;;  %6009 = vmatpush3.bf16.msra.mxu1 %v3779_v45 }
0x13ce   : > { %v3896_v13 = vrot.slane %v3895_v7, 1  ;;  %v3781_v57 = vpack.c.bf16 %v3769_v59, %v3768_v4  ;;  %6010 = vmatprep.subr.bf16.mxu1 %v6400_v9  ;;  %v6255_v4 = vld [vmem:[%s8167_s3 + $0x58] sm:$0xff]  }
0x13cf   : > { %v3780_v27 = vpack.c.bf16 %v3767_v29, %v3766_v30  ;;  %v6000_v8 = vpop.f32.mrb[160].mxu0 }
0x13d0   : > { %v3897_v39 = vadd.f32 %v3896_v13, %v3895_v7  ;;  %v3740_v11 = vadd.f32 %v6000_v8, %v7707_v32  ;;  %v3731_v41 = vpop.f32.mrb[161].mxu0  ;;  %v6253_v7 = vld [vmem:[%s8167_s3 + $0x48] sm:$0xff]  }
0x13d1   : > { %v3732_v46 = vadd.f32 %v3731_v41, %v7699_v50  ;;  %v6001_v33 = vpop.f32.mrb[162].mxu0  ;;  %6011 = vmatpush3.bf16.msra.mxu1 %v3780_v27 }
0x13d2   : > { %v3898_v54 = vmul.f32 0.0625, %v3897_v39  ;;  %v3743_v19 = vadd.f32 %v6001_v33, %v7710_v25  ;;  %v3734_v12 = vpop.f32.mrb[163].mxu0  ;;  %6012 = vmatprep.subr.bf16.mxu1 %v6400_v9  ;;  %v3772_v21 = vmax.f32 %v3740_v11, 0.0 }
0x13d3   : > { %v3735_v15 = vadd.f32 %v3734_v12, %v7701_v5  ;;  %v3770_v32 = vmax.f32 %v3732_v46, 0.0 }
0x13d4   : > { %v3899_v1 = vsub.f32 %v7771_v35, %v3898_v54  ;;  %v3900_v47 = vsub.f32 %v7774_v0, %v3898_v54  ;;  %v3773_v18 = vmax.f32 %v3743_v19, 0.0 }
0x13d5   : > { %v3771_v10 = vmax.f32 %v3735_v15, 0.0  ;;  %6013 = vmatpush3.bf16.msra.mxu1 %v3781_v57 }
0x13d6   : > { %v3901_v50 = vmul.f32 %v3899_v1, %v3899_v1  ;;  %v3902_v53 = vmul.f32 %v3900_v47, %v3900_v47  ;;  %v3783_v52 = vpack.c.bf16 %v3773_v18, %v3772_v21  ;;  %6014 = vmatprep.subr.bf16.mxu1 %v6400_v9 }
0x13d7   : > { %v3782_v25 = vpack.c.bf16 %v3771_v10, %v3770_v32  ;;  %v6004_v38 = vpop.f32.mrb[164].mxu0 }
0x13d8   : > { %v3903_v22 = vadd.f32 %v3902_v53, %v3901_v50  ;;  %v3756_v62 = vadd.f32 %v6004_v38, %v7723_v55  ;;  %v3747_v5 = vpop.f32.mrb[165].mxu0 }
0x13d9   : > { %v3748_v34 = vadd.f32 %v3747_v5, %v7714_v37  ;;  %v6005_v58 = vpop.f32.mrb[166].mxu0  ;;  %6015 = vmatpush3.bf16.msra.mxu1 %v3782_v25 }
0x13da   : > { %v3904_v16 = vrot.slane %v3903_v22, 4  ;;  %v3759_v23 = vadd.f32 %v6005_v58, %v7726_v2  ;;  %v3750_v49 = vpop.f32.mrb[167].mxu0  ;;  %6016 = vmatprep.subr.bf16.mxu1 %v6400_v9  ;;  %v3776_v45 = vmax.f32 %v3756_v62, 0.0 }
0x13db   : > { %v3751_v24 = vadd.f32 %v3750_v49, %v7719_v43  ;;  %v3774_v61 = vmax.f32 %v3748_v34, 0.0 }
0x13dc   : > { %v3905_v3 = vadd.f32 %v3904_v16, %v3903_v22  ;;  %v3777_v42 = vmax.f32 %v3759_v23, 0.0 }
0x13dd   : > { %v3775_v56 = vmax.f32 %v3751_v24, 0.0  ;;  %6017 = vmatpush3.bf16.msra.mxu1 %v3783_v52 }
0x13de   : > { %v3906_v55 = vrot.slane %v3905_v3, 2  ;;  %v3785_v48 = vpack.c.bf16 %v3777_v42, %v3776_v45  ;;  %6018 = vmatprep.subr.bf16.mxu1 %v6400_v9 }
0x13df   : > { %v3784_v37 = vpack.c.bf16 %v3775_v56, %v3774_v61 }
0x13e0   : > { %v3907_v44 = vadd.f32 %v3906_v55, %v3905_v3 }
0x13e1   : > { %6019 = vmatpush3.bf16.msra.mxu1 %v3784_v37 }
0x13e2   : > { %v3908_v26 = vrot.slane %v3907_v44, 1  ;;  %6020 = vmatprep.subr.bf16.mxu1 %v6400_v9 }
0x13e4   : > { %v3909_v2 = vadd.f32 %v3908_v26, %v3907_v44  ;;  %v3929_v44 = vpop.permute.xlu0 %3928 }
0x13e5   : > { %6021 = vmatpush3.bf16.msra.mxu1 %v3785_v48 }
0x13e6   : > { %v3910_v40 = vmul.f32 0.0625, %v3909_v2  ;;  %6040 = vmatprep.subr.bf16.mxu1 %v6400_v9  ;;  %v3934_v2 = vpop.permute.xlu1 %3933 }
0x13e8   : > { %v3911_v43 = vadd.f32 1e-05, %v3910_v40  ;;  %6023 = vmatmul.mubr.bf16.vlgmr.msra.gmra.mrb[92].mxu1 %v7739_v36  ;;  %v6254_v36 = vld [vmem:[%s8167_s3 + $0x50] sm:$0xff]  }
0x13e9   : > { %6042 = vmatprep.mubr.msk.bf16.mxu1 %vm6401_vm0, %v6400_v9 }
0x13ea   : > { %6314 = vrsqrt.f32 %v3911_v43  ;;  %v3919_v43 = vpop.permute.xlu0 %3918 }
0x13f4   : > { %v6315_v20 = vpop.eup %6314 }
0x13f5   : > { %v3914_v14 = vmul.f32 %v6315_v20, %v3900_v47  ;;  %v3913_v60 = vmul.f32 %v6315_v20, %v3899_v1 }
0x13f7   : > { %v3915_v63 = vpack.c.bf16 %v3914_v14, %v3913_v60 }
0x13f9   : > { %6027 = vmatpush3.bf16.msra.mxu0 %v3915_v63 }
0x13fa   : > { %6054 = vmatprep.subr.bf16.mxu0 %v6400_v9 }
0x13fc   : > { %6029 = vmatmul.mubr.msk.bf16.vlgmr.msra.gmra.mrb[168].mxu0 %vm563_vm1, %v6253_v7 }
0x13fd   : > { %6032 = vmatprep.mubr.msk.bf16.mxu0 %vm6401_vm0, %v6400_v9 }
0x1404   : > { %6033 = vmatmul.mubr.msk.bf16.gmra.mrb[172].mxu0 %vm563_vm1, %v6254_v36 }
0x1405   : > { %6036 = vmatprep.mubr.msk.bf16.mxu0 %vm6401_vm0, %v6400_v9 }
0x140c   : > { %6037 = vmatmul.mubr.msk.bf16.gmra.mrb[176].mxu0 %vm563_vm1, %v6255_v4 }
0x140d   : > { %6056 = vmatprep.mubr.msk.bf16.mxu0 %vm6401_vm0, %v6400_v9 }
0x14bb   : > { %v3820_v59 = vpop.f32.mrb[92].mxu1 }
0x14bc   : > { %v3827_v30 = vadd.f32 %v3820_v59, %v7666_v6  ;;  %v6024_v29 = vpop.f32.mrb[93].mxu1 }
0x14bd   : > { %v3823_v13 = vpop.f32.mrb[94].mxu1 }
0x14be   : > { %v3828_v57 = vadd.f32 %v3823_v13, %v7669_v17  ;;  %v6025_v27 = vpop.f32.mrb[95].mxu1  ;;  %v7827_v8 = vadd.f32 %v3827_v30, %v7762_v28 }
0x14c0   : > { %v7830_v39 = vadd.f32 %v3828_v57, %v7767_v51 }
0x14c2   : > { %v4027_v11 = vadd.f32 %v7830_v39, %v7827_v8 }
0x14c4   : > { %v4028_v41 = vrot.slane %v4027_v11, 4 }
0x14c6   : > { %v4029_v46 = vadd.f32 %v4028_v41, %v4027_v11 }
0x14c8   : > { %v4030_v33 = vrot.slane %v4029_v46, 2 }
0x14ca   : > { %v4031_v54 = vadd.f32 %v4030_v33, %v4029_v46 }
0x14cc   : > { %v4032_v19 = vrot.slane %v4031_v54, 1 }
0x14ce   : > { %v4033_v6 = vadd.f32 %v4032_v19, %v4031_v54 }
0x14cf   : > { %v4004_v12 = vpop.f32.mrb[168].mxu0 }
0x14d0   : > { %v4034_v15 = vmul.f32 0.0625, %v4033_v6  ;;  %v6030_v1 = vpop.f32.mrb[169].mxu0  ;;  %v4005_v63 = vadd.f32 %v4004_v12, %v3919_v43 }
0x14d1   : > { %v4007_v17 = vpop.f32.mrb[170].mxu0 }
0x14d2   : > { %v4035_v47 = vsub.f32 %v7827_v8, %v4034_v15  ;;  %v4036_v28 = vsub.f32 %v7830_v39, %v4034_v15  ;;  %v6031_v21 = vpop.f32.mrb[171].mxu0 }
0x14d4   : > { %v4037_v51 = vmul.f32 %v4035_v47, %v4035_v47  ;;  %v4038_v18 = vmul.f32 %v4036_v28, %v4036_v28 }
0x14d6   : > { %v4039_v32 = vadd.f32 %v4038_v18, %v4037_v51 }
0x14d7   : > { %v4012_v10 = vpop.f32.mrb[172].mxu0 }
0x14d8   : > { %v4040_v50 = vrot.slane %v4039_v32, 4  ;;  %v6034_v53 = vpop.f32.mrb[173].mxu0  ;;  %v4013_v20 = vadd.f32 %v4012_v10, %v3929_v44 }
0x14d9   : > { %v4015_v52 = vpop.f32.mrb[174].mxu0 }
0x14da   : > { %v4041_v25 = vadd.f32 %v4040_v50, %v4039_v32  ;;  %v6035_v38 = vpop.f32.mrb[175].mxu0  ;;  %v4016_v59 = vadd.f32 %v4015_v52, %v3934_v2 }
0x14db   : > { %v6334_v38 = vld [vmem:[%s8166_s2] sm:$0xff]  }
0x14dc   : > { %v4042_v22 = vrot.slane %v4041_v25, 2 }
0x14de   : > { %v4043_v62 = vadd.f32 %v4042_v22, %v4041_v25  ;;  %v3939_v22 = vpop.permute.xlu0 %3938 }
0x14df   : > { %v7836_v5 = vpop.f32.mrb[176].mxu0 }
0x14e0   : > { %v4044_v34 = vrot.slane %v4043_v62, 1  ;;  %v6038_v58 = vpop.f32.mrb[177].mxu0 }
0x14e1   : > { %v7838_v16 = vpop.f32.mrb[178].mxu0  ;;  %v4021_v58 = vadd.f32 %v7836_v5, %v3939_v22 }
0x14e2   : > { %v4045_v23 = vadd.f32 %v4044_v34, %v4043_v62  ;;  %v6039_v49 = vpop.f32.mrb[179].mxu0 }
0x14e4   : > { %v4046_v24 = vmul.f32 0.0625, %v4045_v23 }
0x14e6   : > { %v4047_v3 = vadd.f32 1e-05, %v4046_v24 }
0x14e8   : > { %6316 = vrsqrt.f32 %v4047_v3 }
0x14f2   : > { %v6317_v45 = vpop.eup %6316 }
0x14f3   : > { %v4050_v42 = vmul.f32 %v6317_v45, %v4036_v28  ;;  %v4049_v61 = vmul.f32 %v6317_v45, %v4035_v47 }
0x14f5   : > { %v4051_v56 = vpack.c.bf16 %v4050_v42, %v4049_v61 }
0x14f7   : > { %6041 = vmatpush3.bf16.msra.mxu1 %v4051_v56 }
0x14f8   : > { %6060 = vmatprep.subr.bf16.mxu1 %v6400_v9 }
0x14fa   : > { %6043 = vmatmul.mubr.msk.bf16.vlgmr.msra.gmra.mrb[96].mxu1 %vm563_vm1, %v6253_v7 }
0x14fb   : > { %6046 = vmatprep.mubr.msk.bf16.mxu1 %vm6401_vm0, %v6400_v9 }
0x1502   : > { %6047 = vmatmul.mubr.msk.bf16.gmra.mrb[100].mxu1 %vm563_vm1, %v6254_v36  ;;  %v3924_v36 = vpop.permute.xlu1 %3923 }
0x1503   : > { %6050 = vmatprep.mubr.msk.bf16.mxu1 %vm6401_vm0, %v6400_v9  ;;  %v4008_v57 = vadd.f32 %v4007_v17, %v3924_v36 }
0x1506   : > { %v3944_v34 = vpop.permute.xlu1 %3943 }
0x1507   : > { %v4024_v49 = vadd.f32 %v7838_v16, %v3944_v34  ;;  %v6256_v16 = vld [vmem:[%s8169_s5 + $0x18] sm:$0xff]  }
0x150a   : > { %6051 = vmatmul.mubr.msk.bf16.gmra.mrb[104].mxu1 %vm563_vm1, %v6255_v4 }
0x150b   : > { %6062 = vmatprep.mubr.msk.bf16.mxu1 %vm6401_vm0, %v6400_v9 }
0x15cd   : > { %v4086_v55 = vpop.f32.mrb[96].mxu1 }
0x15ce   : > { %v6044_v48 = vpop.f32.mrb[97].mxu1  ;;  %v4087_v30 = vadd.f32 %v4086_v55, %v3919_v43 }
0x15cf   : > { %v4089_v37 = vpop.f32.mrb[98].mxu1 }
0x15d0   : > { %v6045_v26 = vpop.f32.mrb[99].mxu1  ;;  %v4090_v27 = vadd.f32 %v4089_v37, %v3924_v36 }
0x15d5   : > { %v4094_v40 = vpop.f32.mrb[100].mxu1 }
0x15d6   : > { %v4095_v14 = vadd.f32 %v4094_v40, %v3929_v44  ;;  %v6048_v60 = vpop.f32.mrb[101].mxu1 }
0x15d7   : > { %v4097_v7 = vpop.f32.mrb[102].mxu1 }
0x15d8   : > { %v4109_v4 = vsub.f32 %v4013_v20, %v4095_v14  ;;  %v4098_v29 = vadd.f32 %v4097_v7, %v3934_v2  ;;  %v6049_v13 = vpop.f32.mrb[103].mxu1 }
0x15da   : > { %v4113_v11 = vmul.f32 %v4109_v4, %v4005_v63  ;;  %v4274_v41 = vmul.f32 %v4109_v4, %v4087_v30  ;;  %v4110_v46 = vsub.f32 %v4016_v59, %v4098_v29  ;;  %v7890_v59 = vld [vmem:[%s8171_s7 + $0xc0] sm:$0xff]  }
0x15dc   : > { %v4114_v33 = vmul.f32 %v4110_v46, %v4008_v57  ;;  %v4275_v54 = vmul.f32 %v4110_v46, %v4090_v27 }
0x15dd   : > { %v4102_v19 = vpop.f32.mrb[104].mxu1 }
0x15de   : > { %v4115_v6 = vpack.c.bf16 %v4114_v33, %v4113_v11  ;;  %v4276_v15 = vpack.c.bf16 %v4275_v54, %v4274_v41  ;;  %v6052_v1 = vpop.f32.mrb[105].mxu1  ;;  %v7868_v62 = vadd.f32 %v4102_v19, %v3939_v22  ;;  %v7896_v11 = vpop.permute.xlu0 %4264 }
0x15df   : > { %v4105_v47 = vpop.f32.mrb[106].mxu1  ;;  %v7898_v41 = vpop.permute.xlu1 %4269 }
0x15e0   : > { %6055 = vmatpush3.bf16.msra.mxu0 %v4115_v6  ;;  %v6053_v12 = vpop.f32.mrb[107].mxu1  ;;  %v7871_v23 = vadd.f32 %v4105_v47, %v3944_v34  ;;  %v4111_v24 = vsub.f32 %v4021_v58, %v7868_v62 }
0x15e1   : > { %6066 = vmatprep.subr.bf16.mxu0 %v6400_v9 }
0x15e3   : > { %6057 = vmatmul.mubr.msk.bf16.vlgmr.msra.gmra.mrb[180].mxu0 %vm563_vm1, %v7542_v31 }
0x15e4   : > { %6068 = vmatprep.mubr.msk.bf16.mxu0 %vm6401_vm0, %v6400_v9 }
0x16b6   : > { %v4150_v17 = vpop.f32.mrb[180].mxu0 }
0x16b7   : > { %v4156_v28 = vsub.f32 0.0, %v4150_v17  ;;  %v6058_v21 = vpop.f32.mrb[181].mxu0 }
0x16b8   : > { %v4153_v51 = vpop.f32.mrb[182].mxu0 }
0x16b9   : > { %v4157_v18 = vmul.f32 1.442695, %v4156_v28  ;;  %v6059_v32 = vpop.f32.mrb[183].mxu0 }
0x16bb   : > { %6318 = vpow2.f32 %v4157_v18 }
0x16c5   : > { %v6319_v10 = vpop.eup %6318 }
0x16c6   : > { %v4159_v50 = vadd.f32 1.0, %v6319_v10 }
0x16c8   : > { %6320 = vrcp.f32 %v4159_v50 }
0x16d2   : > { %v6321_v53 = vpop.eup %6320 }
0x16d3   : > { %v4161_v52 = vpack.c.bf16 %v6321_v53, %v6321_v53 }
0x16d5   : > { %v4163_v25 = vsel %vm777_vm2, %v4161_v52, 0 }
0x16d6   : > { %6061 = vmatpush3.bf16.msra.mxu1 %v4163_v25 }
0x16d7   : > { %6072 = vmatprep.subr.bf16.mxu1 %v6400_v9 }
0x16d9   : > { %6063 = vmatmul.mubr.msk.bf16.vlgmr.msra.gmra.mrb[108].mxu1 %vm773_vm3, %v6334_v38 }
0x16da   : > { %6073 = vmatpush3.bf16.msra.mxu1 %v4276_v15  ;;  %6074 = vmatprep.mubr.msk.bf16.mxu1 %vm6401_vm0, %v6400_v9 }
0x16db   : > { %6084 = vmatprep.subr.bf16.mxu1 %v6400_v9 }
0x16e1   : > { %6075 = vmatmul.mubr.msk.bf16.vlgmr.msra.gmra.mrb[112].mxu1 %vm563_vm1, %v7542_v31  ;;  %v4112_v31 = vsub.f32 %v4024_v49, %v7871_v23 }
0x16e2   : > { %6086 = vmatprep.mubr.msk.bf16.mxu1 %vm6401_vm0, %v6400_v9 }
0x17ac   : > { %v4199_v3 = vpop.f32.mrb[108].mxu1 }
0x17ad   : > { %v4206_v45 = vmul.f32 %v4199_v3, %v4111_v24  ;;  %v6064_v42 = vpop.f32.mrb[109].mxu1 }
0x17ae   : > { %v4202_v61 = vpop.f32.mrb[110].mxu1 }
0x17af   : > { %v4207_v56 = vmul.f32 %v4202_v61, %v4112_v31  ;;  %v6065_v55 = vpop.f32.mrb[111].mxu1  ;;  %v4208_v48 = vadd.f32 %v4206_v45, %v7868_v62 }
0x17b1   : > { %v4209_v37 = vadd.f32 %v4207_v56, %v7871_v23 }
0x17b3   : > { %v4210_v44 = vpack.c.bf16 %v4209_v37, %v4208_v48  ;;  %v7924_v48 = vld [vmem:[%s8171_s7 + $0xd0] sm:$0xff]   ;;  %v7933_v37 = vld [vmem:[%s8171_s7 + $0xd8] sm:$0xff]  }
0x17b4   : > { %v4311_v5 = vpop.f32.mrb[112].mxu1 }
0x17b5   : > { %v4317_v26 = vsub.f32 0.0, %v4311_v5  ;;  %6067 = vmatpush3.bf16.msra.mxu0 %v4210_v44  ;;  %v6076_v2 = vpop.f32.mrb[113].mxu1  ;;  %v7938_v44 = vld [vmem:[%s8171_s7 + $0xe0] sm:$0xff]   ;;  %v7947_v5 = vld [vmem:[%s8171_s7 + $0xe8] sm:$0xff]  }
0x17b6   : > { %v4314_v40 = vpop.f32.mrb[114].mxu1  ;;  %6078 = vmatprep.subr.bf16.mxu0 %v6400_v9 }
0x17b7   : > { %v4318_v43 = vmul.f32 1.442695, %v4317_v26  ;;  %v6077_v20 = vpop.f32.mrb[115].mxu1  ;;  %v7961_v26 = vld [vmem:[%s8171_s7 + $0xf8] sm:$0xff]  }
0x17b8   : > { %6069 = vmatmul.mubr.msk.bf16.vlgmr.msra.gmra.mrb[184].mxu0 %vm563_vm1, %v6256_v16 }
0x17b9   : > { %6322 = vpow2.f32 %v4318_v43  ;;  %6080 = vmatprep.mubr.msk.bf16.mxu0 %vm6401_vm0, %v6400_v9 }
0x17c3   : > { %v6323_v14 = vpop.eup %6322 }
0x17c4   : > { %v4320_v60 = vadd.f32 1.0, %v6323_v14  ;;  %v7968_v14 = vpop.permute.xlu0 %4444 }
0x17c6   : > { %6324 = vrcp.f32 %v4320_v60 }
0x17d0   : > { %v6325_v63 = vpop.eup %6324 }
0x17d1   : > { %v4322_v7 = vpack.c.bf16 %v6325_v63, %v6325_v63 }
0x17d3   : > { %v4324_v36 = vsel %vm777_vm2, %v4322_v7, 0  ;;  %v7971_v7 = vpop.permute.xlu1 %4449 }
0x17d4   : > { %6079 = vmatpush3.bf16.msra.mxu0 %v4324_v36 }
0x17d7   : > { %6081 = vmatmul.mubr.msk.bf16.vlgmr.msra.gmra.mrb[188].mxu0 %vm773_vm3, %v6334_v38 }
0x17d8   : > { %6092 = vmatprep.mubr.msk.bf16.mxu0 %vm563_vm1, %v7890_v59 }
0x188b   : > { %v4253_v30 = vpop.f32.mrb[184].mxu0 }
0x188c   : > { %v4260_v4 = vadd.f32 %v4253_v30, %v7771_v35  ;;  %v6070_v29 = vpop.f32.mrb[185].mxu0 }
0x188d   : > { %v4256_v13 = vpop.f32.mrb[186].mxu0  ;;  %v7983_v29 = vpop.permute.xlu1 %4459 }
0x188e   : > { %v4261_v57 = vadd.f32 %v4256_v13, %v7774_v0  ;;  %v6071_v27 = vpop.f32.mrb[187].mxu0  ;;  %v7901_v46 = vadd.f32 %v7896_v11, %v4260_v4  ;;  %v7981_v4 = vpop.permute.xlu0 %4454 }
0x1890   : > { %v7904_v33 = vadd.f32 %v7898_v41, %v4261_v57 }
0x1892   : > { %v4417_v54 = vadd.f32 %v7904_v33, %v7901_v46 }
0x1894   : > { %v4418_v19 = vrot.slane %v4417_v54, 4 }
0x1896   : > { %v4419_v35 = vadd.f32 %v4418_v19, %v4417_v54  ;;  %v7987_v54 = vpop.permute.xlu1 %4469 }
0x1898   : > { %v4420_v6 = vrot.slane %v4419_v35, 2 }
0x189a   : > { %v4421_v15 = vadd.f32 %v4420_v6, %v4419_v35 }
0x189c   : > { %v4422_v1 = vrot.slane %v4421_v15, 1 }
0x189e   : > { %v4423_v0 = vadd.f32 %v4422_v1, %v4421_v15 }
0x18a0   : > { %v4424_v47 = vmul.f32 0.0625, %v4423_v0  ;;  %v7992_v0 = vpop.permute.xlu1 %4479 }
0x18a2   : > { %v4426_v12 = vsub.f32 %v7904_v33, %v4424_v47  ;;  %v4425_v17 = vsub.f32 %v7901_v46, %v4424_v47 }
0x18a4   : > { %v4428_v28 = vmul.f32 %v4426_v12, %v4426_v12  ;;  %v4427_v21 = vmul.f32 %v4425_v17, %v4425_v17 }
0x18a6   : > { %v4429_v51 = vadd.f32 %v4428_v28, %v4427_v21 }
0x18a8   : > { %v4430_v18 = vrot.slane %v4429_v51, 4 }
0x18aa   : > { %v4360_v32 = vpop.f32.mrb[188].mxu0  ;;  %v4431_v10 = vadd.f32 %v4430_v18, %v4429_v51 }
0x18ab   : > { %v4367_v50 = vmul.f32 %v4360_v32, %v4111_v24  ;;  %v6082_v53 = vpop.f32.mrb[189].mxu0 }
0x18ac   : > { %v4363_v52 = vpop.f32.mrb[190].mxu0  ;;  %v4432_v25 = vrot.slane %v4431_v10, 2 }
0x18ad   : > { %v4368_v38 = vmul.f32 %v4363_v52, %v4112_v31  ;;  %v6083_v22 = vpop.f32.mrb[191].mxu0  ;;  %v4369_v58 = vadd.f32 %v4367_v50, %v7868_v62 }
0x18ae   : > { %v4433_v34 = vadd.f32 %v4432_v25, %v4431_v10 }
0x18af   : > { %v4370_v49 = vadd.f32 %v4368_v38, %v7871_v23  ;;  %v7919_v23 = vld [vmem:[%s8171_s7 + $0xc8] sm:$0xff]  }
0x18b0   : > { %v4434_v3 = vrot.slane %v4433_v34, 1 }
0x18b1   : > { %v4371_v45 = vpack.c.bf16 %v4370_v49, %v4369_v58  ;;  %v8009_v58 = vpop.permute.xlu1 %4489 }
0x18b2   : > { %v4435_v42 = vadd.f32 %v4434_v3, %v4433_v34 }
0x18b3   : > { %6085 = vmatpush3.bf16.msra.mxu1 %v4371_v45 }
0x18b4   : > { %v4436_v61 = vmul.f32 0.0625, %v4435_v42  ;;  %6108 = vmatprep.subr.bf16.mxu1 %v6400_v9 }
0x18b6   : > { %6087 = vmatmul.mubr.msk.bf16.vlgmr.msra.gmra.mrb[116].mxu1 %vm563_vm1, %v6256_v16  ;;  %v4437_v24 = vadd.f32 1e-05, %v4436_v61  ;;  %v7952_v16 = vld [vmem:[%s8171_s7 + $0xf0] sm:$0xff]  }
0x18b7   : > { %6124 = vmatprep.mubr.msk.bf16.mxu1 %vm6401_vm0, %v6400_v9 }
0x18b8   : > { %6326 = vrsqrt.f32 %v4437_v24 }
0x18c2   : > { %v6327_v31 = vpop.eup %6326 }
0x18c3   : > { %v4439_v56 = vmul.f32 %v6327_v31, %v4425_v17  ;;  %v4440_v55 = vmul.f32 %v6327_v31, %v4426_v12 }
0x18c5   : > { %v4441_v62 = vpack.c.bf16 %v4440_v55, %v4439_v56 }
0x18c7   : > { %6090 = vmatprep.subr.bf16.mxu0 %v4441_v62 }
0x18c8   : > { %6091 = vmatpush3.bf16.msra.mxu0 %v4441_v62 }
0x18cb   : > { %6093 = vmatmul.mubr.msk.bf16.vlgmr.msra.gmra.mrb[192].mxu0 %vm563_vm1, %v7919_v23 }
0x18cc   : > { %6096 = vmatprep.mubr.msk.bf16.mxu0 %vm563_vm1, %v7924_v48 }
0x18d3   : > { %6097 = vmatmul.mubr.msk.bf16.gmra.mrb[196].mxu0 %vm563_vm1, %v7933_v37 }
0x18d4   : > { %6100 = vmatprep.mubr.msk.bf16.mxu0 %vm563_vm1, %v7938_v44 }
0x18db   : > { %6101 = vmatmul.mubr.msk.bf16.gmra.mrb[200].mxu0 %vm563_vm1, %v7947_v5 }
0x18dc   : > { %6104 = vmatprep.mubr.msk.bf16.mxu0 %vm563_vm1, %v7952_v16 }
0x18e3   : > { %6105 = vmatmul.mubr.msk.bf16.gmra.mrb[204].mxu0 %vm563_vm1, %v7961_v26 }
0x18e4   : > { %6130 = vmatprep.mubr.msk.bf16.mxu0 %vm563_vm1, %v7890_v59 }
0x1989   : > { %v4406_v2 = vpop.f32.mrb[116].mxu1 }
0x198a   : > { %v4413_v40 = vadd.f32 %v4406_v2, %v7827_v8  ;;  %v6088_v43 = vpop.f32.mrb[117].mxu1 }
0x198b   : > { %v4409_v20 = vpop.f32.mrb[118].mxu1 }
0x198c   : > { %v4414_v60 = vadd.f32 %v4409_v20, %v7830_v39  ;;  %v6089_v63 = vpop.f32.mrb[119].mxu1  ;;  %v7974_v36 = vadd.f32 %v4413_v40, %v7896_v11  ;;  %v7985_v39 = vpop.permute.xlu0 %4464 }
0x198d   : > { %v8018_v63 = vpop.permute.xlu1 %4499 }
0x198e   : > { %v7977_v30 = vadd.f32 %v4414_v60, %v7898_v41 }
0x1990   : > { %v4768_v59 = vadd.f32 %v7977_v30, %v7974_v36  ;;  %v7989_v35 = vpop.permute.xlu0 %4474 }
0x1992   : > { %v4769_v8 = vrot.slane %v4768_v59, 4 }
0x1994   : > { %v4770_v13 = vadd.f32 %v4769_v8, %v4768_v59  ;;  %v8007_v52 = vpop.permute.xlu0 %4484 }
0x1996   : > { %v4771_v57 = vrot.slane %v4770_v13, 2 }
0x1998   : > { %v4772_v27 = vadd.f32 %v4771_v57, %v4770_v13  ;;  %v8015_v2 = vpop.permute.xlu0 %4494 }
0x199a   : > { %v4773_v11 = vrot.slane %v4772_v27, 1 }
0x199c   : > { %v4774_v19 = vadd.f32 %v4773_v11, %v4772_v27 }
0x199e   : > { %v4775_v41 = vmul.f32 0.0625, %v4774_v19  ;;  %v6094_v6 = vpop.f32.mrb[192].mxu0 }
0x199f   : > { %v4629_v15 = vadd.f32 %v6094_v6, %v7981_v4  ;;  %v4620_v1 = vpop.f32.mrb[193].mxu0 }
0x19a0   : > { %v7995_v47 = vsub.f32 %v7977_v30, %v4775_v41  ;;  %v4621_v12 = vadd.f32 %v4620_v1, %v7968_v14  ;;  %v6095_v17 = vpop.f32.mrb[194].mxu0  ;;  %v7999_v28 = vsub.f32 %v7974_v36, %v4775_v41 }
0x19a1   : > { %v4632_v21 = vadd.f32 %v6095_v17, %v7983_v29  ;;  %v4623_v51 = vpop.f32.mrb[195].mxu0  ;;  %v4685_v50 = vmax.f32 %v4629_v15, 0.0  ;;  %v8022_v15 = vpop.permute.xlu0 %4504 }
0x19a2   : > { %v4779_v18 = vmul.f32 %v7995_v47, %v7995_v47  ;;  %v4624_v32 = vadd.f32 %v4623_v51, %v7971_v7  ;;  %v4778_v10 = vmul.f32 %v7999_v28, %v7999_v28  ;;  %v4683_v25 = vmax.f32 %v4621_v12, 0.0 }
0x19a3   : > { %v4686_v53 = vmax.f32 %v4632_v21, 0.0 }
0x19a4   : > { %v4684_v38 = vmax.f32 %v4624_v32, 0.0  ;;  %v4780_v22 = vadd.f32 %v4779_v18, %v4778_v10  ;;  %v8027_v18 = vpop.permute.xlu1 %4509 }
0x19a5   : > { %v4700_v34 = vpack.c.bf16 %v4686_v53, %v4685_v50 }
0x19a6   : > { %v4699_v49 = vpack.c.bf16 %v4684_v38, %v4683_v25  ;;  %v6098_v3 = vpop.f32.mrb[196].mxu0  ;;  %v4781_v45 = vrot.slane %v4780_v22, 4 }
0x19a7   : > { %v4645_v42 = vadd.f32 %v6098_v3, %v7989_v35  ;;  %v4636_v61 = vpop.f32.mrb[197].mxu0 }
0x19a8   : > { %v4637_v24 = vadd.f32 %v4636_v61, %v7985_v39  ;;  %v6099_v31 = vpop.f32.mrb[198].mxu0  ;;  %6109 = vmatpush3.bf16.msra.mxu1 %v4699_v49  ;;  %v4782_v56 = vadd.f32 %v4781_v45, %v4780_v22  ;;  %v8031_v49 = vpop.permute.xlu0 %4514 }
0x19a9   : > { %v4648_v55 = vadd.f32 %v6099_v31, %v7992_v0  ;;  %v4639_v62 = vpop.f32.mrb[199].mxu0  ;;  %6110 = vmatprep.subr.bf16.mxu1 %v6400_v9  ;;  %v4689_v20 = vmax.f32 %v4645_v42, 0.0 }
0x19aa   : > { %v4640_v40 = vadd.f32 %v4639_v62, %v7987_v54  ;;  %v4783_v43 = vrot.slane %v4782_v56, 2  ;;  %v4687_v59 = vmax.f32 %v4637_v24, 0.0  ;;  %v8034_v24 = vpop.permute.xlu1 %4519 }
0x19ab   : > { %v4690_v60 = vmax.f32 %v4648_v55, 0.0 }
0x19ac   : > { %v4688_v8 = vmax.f32 %v4640_v40, 0.0  ;;  %6111 = vmatpush3.bf16.msra.mxu1 %v4700_v34  ;;  %v4784_v13 = vadd.f32 %v4783_v43, %v4782_v56 }
0x19ad   : > { %v4702_v57 = vpack.c.bf16 %v4690_v60, %v4689_v20  ;;  %6112 = vmatprep.subr.bf16.mxu1 %v6400_v9 }
0x19ae   : > { %v4701_v27 = vpack.c.bf16 %v4688_v8, %v4687_v59  ;;  %v6102_v11 = vpop.f32.mrb[200].mxu0  ;;  %v4785_v19 = vrot.slane %v4784_v13, 1 }
0x19af   : > { %v4661_v41 = vadd.f32 %v6102_v11, %v8015_v2  ;;  %v4652_v6 = vpop.f32.mrb[201].mxu0 }
0x19b0   : > { %v4653_v1 = vadd.f32 %v4652_v6, %v8007_v52  ;;  %v6103_v12 = vpop.f32.mrb[202].mxu0  ;;  %6113 = vmatpush3.bf16.msra.mxu1 %v4701_v27  ;;  %v4786_v17 = vadd.f32 %v4785_v19, %v4784_v13 }
0x19b1   : > { %v4664_v21 = vadd.f32 %v6103_v12, %v8018_v63  ;;  %v4655_v51 = vpop.f32.mrb[203].mxu0  ;;  %6114 = vmatprep.subr.bf16.mxu1 %v6400_v9  ;;  %v4693_v50 = vmax.f32 %v4661_v41, 0.0  ;;  %v8047_v41 = vld [vmem:[%s8173_s9 + $0x18] sm:$0xff]  }
0x19b2   : > { %v4656_v32 = vadd.f32 %v4655_v51, %v8009_v58  ;;  %v4787_v10 = vmul.f32 0.0625, %v4786_v17  ;;  %v4691_v25 = vmax.f32 %v4653_v1, 0.0  ;;  %v8073_v17 = vpop.permute.xlu1 %4763 }
0x19b3   : > { %v4694_v53 = vmax.f32 %v4664_v21, 0.0 }
0x19b4   : > { %v4692_v38 = vmax.f32 %v4656_v32, 0.0  ;;  %6115 = vmatpush3.bf16.msra.mxu1 %v4702_v57  ;;  %v4788_v22 = vadd.f32 1e-05, %v4787_v10 }
0x19b5   : > { %v4704_v34 = vpack.c.bf16 %v4694_v53, %v4693_v50  ;;  %6116 = vmatprep.subr.bf16.mxu1 %v6400_v9 }
0x19b6   : > { %v4703_v3 = vpack.c.bf16 %v4692_v38, %v4691_v25  ;;  %v6106_v45 = vpop.f32.mrb[204].mxu0  ;;  %6328 = vrsqrt.f32 %v4788_v22 }
0x19b7   : > { %v4677_v42 = vadd.f32 %v6106_v45, %v8031_v49  ;;  %v4668_v61 = vpop.f32.mrb[205].mxu0 }
0x19b8   : > { %v4669_v31 = vadd.f32 %v4668_v61, %v8022_v15  ;;  %v6107_v56 = vpop.f32.mrb[206].mxu0  ;;  %6117 = vmatpush3.bf16.msra.mxu1 %v4703_v3 }
0x19b9   : > { %v4680_v55 = vadd.f32 %v6107_v56, %v8034_v24  ;;  %v4671_v62 = vpop.f32.mrb[207].mxu0  ;;  %6118 = vmatprep.subr.bf16.mxu1 %v6400_v9  ;;  %v4697_v43 = vmax.f32 %v4677_v42, 0.0 }
0x19ba   : > { %v4672_v40 = vadd.f32 %v4671_v62, %v8027_v18  ;;  %v4695_v60 = vmax.f32 %v4669_v31, 0.0 }
0x19bb   : > { %v4698_v20 = vmax.f32 %v4680_v55, 0.0 }
0x19bc   : > { %v4696_v59 = vmax.f32 %v4672_v40, 0.0  ;;  %6119 = vmatpush3.bf16.msra.mxu1 %v4704_v34 }
0x19bd   : > { %v4706_v8 = vpack.c.bf16 %v4698_v20, %v4697_v43  ;;  %6120 = vmatprep.subr.bf16.mxu1 %v6400_v9 }
0x19be   : > { %v4705_v13 = vpack.c.bf16 %v4696_v59, %v4695_v60 }
0x19c0   : > { %v6329_v57 = vpop.eup %6328  ;;  %6121 = vmatpush3.bf16.msra.mxu1 %v4705_v13 }
0x19c1   : > { %6122 = vmatprep.subr.bf16.mxu1 %v6400_v9  ;;  %v4790_v27 = vmul.f32 %v6329_v57, %v7999_v28  ;;  %v4791_v11 = vmul.f32 %v6329_v57, %v7995_v47  ;;  %v8067_v47 = vpop.permute.xlu0 %4758 }
0x19c3   : > { %v4792_v19 = vpack.c.bf16 %v4791_v11, %v4790_v27 }
0x19c4   : > { %6123 = vmatpush3.bf16.msra.mxu1 %v4706_v8 }
0x19c5   : > { %6128 = vmatprep.subr.bf16.mxu0 %v4792_v19  ;;  %6146 = vmatprep.subr.bf16.mxu1 %v6400_v9 }
0x19c6   : > { %6129 = vmatpush3.bf16.msra.mxu0 %v4792_v19 }
0x19c7   : > { %6125 = vmatmul.mubr.bf16.vlgmr.msra.gmra.mrb[120].mxu1 %v8047_v41 }
0x19c8   : > { %6162 = vmatprep.mubr.msk.bf16.mxu1 %vm6401_vm0, %v6400_v9 }
0x19c9   : > { %6131 = vmatmul.mubr.msk.bf16.vlgmr.msra.gmra.mrb[208].mxu0 %vm563_vm1, %v7919_v23 }
0x19ca   : > { %6134 = vmatprep.mubr.msk.bf16.mxu0 %vm563_vm1, %v7924_v48 }
0x19d1   : > { %6135 = vmatmul.mubr.msk.bf16.gmra.mrb[212].mxu0 %vm563_vm1, %v7933_v37 }
0x19d2   : > { %6138 = vmatprep.mubr.msk.bf16.mxu0 %vm563_vm1, %v7938_v44 }
0x19d9   : > { %6139 = vmatmul.mubr.msk.bf16.gmra.mrb[216].mxu0 %vm563_vm1, %v7947_v5 }
0x19da   : > { %6142 = vmatprep.mubr.msk.bf16.mxu0 %vm563_vm1, %v7952_v16 }
0x19e1   : > { %6143 = vmatmul.mubr.msk.bf16.gmra.mrb[220].mxu0 %vm563_vm1, %v7961_v26 }
0x1a9a   : > { %v4747_v23 = vpop.f32.mrb[120].mxu1 }
0x1a9b   : > { %v4754_v48 = vadd.f32 %v4747_v23, %v7901_v46  ;;  %v6126_v28 = vpop.f32.mrb[121].mxu1 }
0x1a9c   : > { %v4750_v37 = vpop.f32.mrb[122].mxu1  ;;  %v6132_v6 = vpop.f32.mrb[208].mxu0 }
0x1a9d   : > { %v4766_v44 = vadd.f32 %v8067_v47, %v4754_v48  ;;  %v4755_v1 = vadd.f32 %v4750_v37, %v7904_v33  ;;  %v4836_v5 = vadd.f32 %v6132_v6, %v7981_v4  ;;  %v4827_v12 = vpop.f32.mrb[209].mxu0  ;;  %v6127_v16 = vpop.f32.mrb[123].mxu1 }
0x1a9e   : > { %v4828_v26 = vadd.f32 %v4827_v12, %v7968_v14  ;;  %v6133_v21 = vpop.f32.mrb[210].mxu0 }
0x1a9f   : > { %4959 = vst [vmem:[%s8077_s25] sm:$0xff] %v4766_v44  ;;  %v4767_v46 = vadd.f32 %v8073_v17, %v4755_v1  ;;  %v4839_v51 = vadd.f32 %v6133_v21, %v7983_v29  ;;  %v4830_v32 = vpop.f32.mrb[211].mxu0  ;;  %v4892_v4 = vmax.f32 %v4836_v5, 0.0 }
0x1aa0   : > { %v4831_v33 = vadd.f32 %v4830_v32, %v7971_v7  ;;  %v4890_v50 = vmax.f32 %v4828_v26, 0.0 }
0x1aa1   : > { %4960 = vst [vmem:[%s8077_s25 + $0x8] sm:$0xff] %v4767_v46  ;;  %v4893_v10 = vmax.f32 %v4839_v51, 0.0 }
0x1aa2   : > { %v4891_v53 = vmax.f32 %v4831_v33, 0.0 }
0x1aa3   : > { %v4907_v25 = vpack.c.bf16 %v4893_v10, %v4892_v4 }
0x1aa4   : > { %v4906_v14 = vpack.c.bf16 %v4891_v53, %v4890_v50  ;;  %v6136_v38 = vpop.f32.mrb[212].mxu0 }
0x1aa5   : > { %v4852_v22 = vadd.f32 %v6136_v38, %v7989_v35  ;;  %v4843_v34 = vpop.f32.mrb[213].mxu0 }
0x1aa6   : > { %v4844_v3 = vadd.f32 %v4843_v34, %v7985_v39  ;;  %v6137_v45 = vpop.f32.mrb[214].mxu0  ;;  %6147 = vmatpush3.bf16.msra.mxu1 %v4906_v14 }
0x1aa7   : > { %v4855_v29 = vadd.f32 %v6137_v45, %v7992_v0  ;;  %v4846_v42 = vpop.f32.mrb[215].mxu0  ;;  %6148 = vmatprep.subr.bf16.mxu1 %v6400_v9  ;;  %v4896_v61 = vmax.f32 %v4852_v22, 0.0 }
0x1aa8   : > { %v4847_v7 = vadd.f32 %v4846_v42, %v7987_v54  ;;  %v4894_v56 = vmax.f32 %v4844_v3, 0.0 }
0x1aa9   : > { %v4897_v31 = vmax.f32 %v4855_v29, 0.0 }
0x1aaa   : > { %v4895_v55 = vmax.f32 %v4847_v7, 0.0  ;;  %6149 = vmatpush3.bf16.msra.mxu1 %v4907_v25 }
0x1aab   : > { %v4909_v62 = vpack.c.bf16 %v4897_v31, %v4896_v61  ;;  %6150 = vmatprep.subr.bf16.mxu1 %v6400_v9 }
0x1aac   : > { %v4908_v35 = vpack.c.bf16 %v4895_v55, %v4894_v56  ;;  %v6140_v40 = vpop.f32.mrb[216].mxu0 }
0x1aad   : > { %v4868_v39 = vadd.f32 %v6140_v40, %v8015_v2  ;;  %v4859_v43 = vpop.f32.mrb[217].mxu0 }
0x1aae   : > { %v4860_v0 = vadd.f32 %v4859_v43, %v8007_v52  ;;  %v6141_v20 = vpop.f32.mrb[218].mxu0  ;;  %6151 = vmatpush3.bf16.msra.mxu1 %v4908_v35 }
0x1aaf   : > { %v4871_v60 = vadd.f32 %v6141_v20, %v8018_v63  ;;  %v4862_v54 = vpop.f32.mrb[219].mxu0  ;;  %6152 = vmatprep.subr.bf16.mxu1 %v6400_v9  ;;  %v4900_v8 = vmax.f32 %v4868_v39, 0.0 }
0x1ab0   : > { %v4863_v59 = vadd.f32 %v4862_v54, %v8009_v58  ;;  %v4898_v57 = vmax.f32 %v4860_v0, 0.0 }
0x1ab1   : > { %v4901_v13 = vmax.f32 %v4871_v60, 0.0 }
0x1ab2   : > { %v4899_v27 = vmax.f32 %v4863_v59, 0.0  ;;  %6153 = vmatpush3.bf16.msra.mxu1 %v4909_v62 }
0x1ab3   : > { %v4911_v11 = vpack.c.bf16 %v4901_v13, %v4900_v8  ;;  %6154 = vmatprep.subr.bf16.mxu1 %v6400_v9 }
0x1ab4   : > { %v4910_v2 = vpack.c.bf16 %v4899_v27, %v4898_v57  ;;  %v6144_v19 = vpop.f32.mrb[220].mxu0 }
0x1ab5   : > { %v4884_v52 = vadd.f32 %v6144_v19, %v8031_v49  ;;  %v4875_v23 = vpop.f32.mrb[221].mxu0 }
0x1ab6   : > { %v4876_v63 = vadd.f32 %v4875_v23, %v8022_v15  ;;  %v6145_v48 = vpop.f32.mrb[222].mxu0  ;;  %6155 = vmatpush3.bf16.msra.mxu1 %v4910_v2 }
0x1ab7   : > { %v4887_v28 = vadd.f32 %v6145_v48, %v8034_v24  ;;  %v4878_v58 = vpop.f32.mrb[223].mxu0  ;;  %6156 = vmatprep.subr.bf16.mxu1 %v6400_v9  ;;  %v4904_v6 = vmax.f32 %v4884_v52, 0.0 }
0x1ab8   : > { %v4879_v37 = vadd.f32 %v4878_v58, %v8027_v18  ;;  %v4902_v1 = vmax.f32 %v4876_v63, 0.0 }
0x1ab9   : > { %v4905_v44 = vmax.f32 %v4887_v28, 0.0 }
0x1aba   : > { %v4903_v5 = vmax.f32 %v4879_v37, 0.0  ;;  %6157 = vmatpush3.bf16.msra.mxu1 %v4911_v11 }
0x1abb   : > { %v4913_v49 = vpack.c.bf16 %v4905_v44, %v4904_v6  ;;  %6158 = vmatprep.subr.bf16.mxu1 %v6400_v9 }
0x1abc   : > { %v4912_v15 = vpack.c.bf16 %v4903_v5, %v4902_v1 }
0x1abe   : > { %6159 = vmatpush3.bf16.msra.mxu1 %v4912_v15 }
0x1abf   : > { %6160 = vmatprep.subr.bf16.mxu1 %v6400_v9 }
0x1ac2   : > { %6161 = vmatpush3.bf16.msra.mxu1 %v4913_v49 }
0x1ac5   : > { %6163 = vmatmul.mubr.bf16.vlgmr.msra.gmra.mrb[124].mxu1 %v8047_v41 }
0x1b98   : > { %v4948_v18 = vpop.f32.mrb[124].mxu1 }
0x1b99   : > { %v4955_v24 = vadd.f32 %v4948_v18, %v7974_v36  ;;  %v6164_v12 = vpop.f32.mrb[125].mxu1 }
0x1b9a   : > { %v4951_v16 = vpop.f32.mrb[126].mxu1 }
0x1b9b   : > { %v4957_v9 = vadd.f32 %v4955_v24, %v8067_v47  ;;  %v4956_v26 = vadd.f32 %v4951_v16, %v7977_v30  ;;  %v6165_v21 = vpop.f32.mrb[127].mxu1 }
0x1b9d   : > { %5376 = vst [vmem:[%s8077_s25 + $0x10] sm:$0xff] %v4957_v9  ;;  %v4958_v36 = vadd.f32 %v4956_v26, %v8073_v17 }
0x1b9f   : > { %5377 = vst [vmem:[%s8077_s25 + $0x18] sm:$0xff] %v4958_v36 }
0x1ba0   : > { %6348 = shalt.err (!%p6345_p5)
}
0x1ba1   : > { %s6349_s25 = scalar_lea.hbm %s8115_s14, 512  ;;  %s6353_s30 = scalar_lea.hbm %s8175_s11, 1024 }
0x1ba2   : > { %p6350_p7 = scmp.ne.s32.totalorder %s8115_s14, %s6349_s25  ;;  %p6354_p12 = scmp.lt.u32.totalorder %s8115_s14, %s8175_s11 }
0x1ba3   : > { %p6355_p13 = scmp.lt.u32.totalorder %s6353_s30, %s6349_s25  ;;  %p6357_p1 = scmp.lt.u32.totalorder %s6349_s25, %s8115_s14 }
0x1ba4   : > { %p6351_p10 = pnand %p6350_p7, %p6504_p6 }
0x1ba5   : > { %p6356_p0 = por %p6355_p13, %p6354_p12 }
0x1ba6   : > { %p6352_p11 = pneg %p6351_p10 }
0x1ba7   : > { %p6358_p2 = por %p6357_p1, %p6356_p0 }
0x1ba9   : > { %p6359_p3 = pnand %p6358_p2, %p6352_p11 }
0x1bab   : > { %6362 = shalt.err (!%p6359_p3)
}
0x1bac   : > { %s6403_s24 = smov 128   ;;  %s6404_s21 = smov 256  }
0x1bad   : > { %s6405_s29 = smov 8  }
0x1bae   : > { %6166 = dma.vmem_to_hbm [thread:$0]  (%p6504_p6), %s8108_s16, 512, %s8115_s14, %s8122_s22, %s6403_s24, %s6404_s21, %s6405_s29  }
0x1baf PF: > { %s4992_s12 = sand.u32 1, %s6385_s17   ;;  %p6169_p4 = pnand %p5047_p9, %p6508_p8 }
0x1bb0   : > { %s4993_s25 = scalar_lea.sflag [#allocation4], %s4992_s12 }
0x1bb1   : > { %6380 = dma.done.wait (!%p6169_p4), %s4993_s25, 512  }
0x1bb2   : > { %6382 = vsyncadd (!%p6169_p4), %s4993_s25, 4294966784  ;;  %p21_p5 = scmp.ge.s32.totalorder %s6489_s23, 4   ;;  %s8184_s17 = smov %s6389_s18 }
0x1bb3   : > { %s8185_s18 = smov %s6393_s19  ;;  %s8186_s19 = smov %s6502_s26 }
0x1bb4   : > { %s8187_s20 = smov %s6489_s23  ;;  %23 = sbr.rel (!%p21_p5) target bundleno = 5 (0x5), region = 168 }
0x1bbb   :  { %4998 = vsyncpa [#allocation4], 1 }
0x1bbc   :  { %5000 = vsyncpa [#allocation4 + $0x1], 1 }

</bundles_post_ra>
